<compile_context>
chip_gen: v7x
topology: tpu7x:2x2x1
jax: 0.10.0
libtpu: 0.0.40
codegen_flags: <defaults>
</compile_context>

<pallas_src>
import functools
import math

import numpy as np
import jax
import jax.numpy as jnp
from jax import lax
from jax.experimental import pallas as pl
from jax.experimental.pallas import tpu as pltpu  # noqa: F401  (v7x grid ext.)


# ----------------------------- in-kernel helpers ---------------------------

def _layer_norm(x, g, b, eps=1e-5):
    # TODO(synk): protnet_v2's custom LayerNorm may use (std + eps) with Bessel
    # correction; this uses nn.LayerNorm semantics (eps added to the variance).
    mu = jnp.mean(x, axis=-1, keepdims=True)
    xc = x - mu
    var = jnp.mean(xc * xc, axis=-1, keepdims=True)
    return xc * lax.rsqrt(var + eps) * g + b


# ----------------------------- fused kernel --------------------------------

def _make_kernel(offsets, *, batch, sx, sp, emb, nhead, n_layers):
    bsx = batch * sx            # rows of the decoder activation slab
    bsp = batch * sp            # rows of the encoder memory slab

    def kernel(slab_ref, x_ref, xp_ref, tkp_ref, out_ref):
        def w(name):
            off, r, c = offsets[name]
            return slab_ref[off:off + r, 0:c]   # static-offset VMEM load

        x = x_ref[...]                          # [B*Sx, E]
        xp = xp_ref[...]                        # [B*Sp, P]
        tgt_keypad = tkp_ref[...]               # [1, B*Sx] additive key bias

        head_mask = w('head_mask')              # [H*B*Sx, E]   0/1 head blocks
        self_bd = w('self_bd')                  # [H*B*Sx, B*Sx] 0 / -1e9
        cross_bd = w('cross_bd')                # [H*B*Sx, B*Sp] 0 / -1e9

        # prot_mapper = Linear(protdim -> embdim, bias=False) + LayerNorm
        memory = _layer_norm(
            jnp.dot(xp, w('prot_w'), preferred_element_type=jnp.float32),
            w('prot_ln_g'), w('prot_ln_b'))     # [B*Sp, E]
        # n_prot_layers == 0 -> encoder acts as identity on the mapped feats.
        # TODO(synk): add encoder self-attention layers here if n_prot_layers > 0.

        # Memory key-padding bias.  Faithful to TEnc.forward: prot_mask is
        # derived from the MAPPED x_prot (post Linear+LayerNorm) first feature.
        # TODO(synk): polarity follows key_padding_mask semantics (True -> -1e9);
        # flip if protnet_v2's attention masks positions where mask == 0.
        mem_keypad = jnp.where(memory[:, 0:1] == 0.0, -1e9, 0.0).T   # [1, B*Sp]

        def mha(q, k, v, wo_name, bo_name, bd, keypad_row):
            """Batch+head fused MHA. q:[B*Sx,E] (scale folded), k/v:[B*Sk,E]."""
            # Replicate Q per head along sublanes, zero non-head lanes.
            q_h = jnp.concatenate([q] * nhead, axis=0) * head_mask   # [H*B*Sx, E]
            # One QK^T for every (head, batch): cross-batch cols get -1e9 bias.
            scores = lax.dot_general(q_h, k, (((1,), (1,)), ((), ())),
                                     preferred_element_type=jnp.float32)
            scores = scores + bd + keypad_row                        # [H*B*Sx, B*Sk]
            m = jnp.max(scores, axis=-1, keepdims=True)
            p = jnp.exp(scores - m)
            pn = p * pl.reciprocal(jnp.sum(p, axis=-1, keepdims=True), approx=True)
            # One PV matmul; keep only each head's lane slice, then sum heads.
            ctx_full = jnp.dot(pn, v, preferred_element_type=jnp.float32) * head_mask
            ctx = ctx_full[0:bsx, :]
            for hh in range(1, nhead):
                ctx = ctx + ctx_full[hh * bsx:(hh + 1) * bsx, :]     # [B*Sx, E]
            return jnp.dot(ctx, w(wo_name),
                           preferred_element_type=jnp.float32) + w(bo_name)

        h = x
        for li in range(n_layers):
            L = f'L{li}_'

            # ---- self attention (pre-norm), fused QKV projection ----
            n1 = _layer_norm(h, w(L + 'ln1_g'), w(L + 'ln1_b'))
            qkv = jnp.dot(n1, w(L + 'sa_wqkv'),
                          preferred_element_type=jnp.float32) + w(L + 'sa_bqkv')
            h = h + mha(qkv[:, 0:emb], qkv[:, emb:2 * emb], qkv[:, 2 * emb:3 * emb],
                        L + 'sa_wo', L + 'sa_bo', self_bd, tgt_keypad)

            # ---- cross attention over encoder memory, fused KV projection ----
            n2 = _layer_norm(h, w(L + 'ln2_g'), w(L + 'ln2_b'))
            qc = jnp.dot(n2, w(L + 'ca_wq'),
                         preferred_element_type=jnp.float32) + w(L + 'ca_bq')
            kv = jnp.dot(memory, w(L + 'ca_wkv'),
                         preferred_element_type=jnp.float32) + w(L + 'ca_bkv')
            h = h + mha(qc, kv[:, 0:emb], kv[:, emb:2 * emb],
                        L + 'ca_wo', L + 'ca_bo', cross_bd, mem_keypad)

            # ---- feed forward (ReLU) ----
            n3 = _layer_norm(h, w(L + 'ln3_g'), w(L + 'ln3_b'))
            f = jnp.maximum(
                jnp.dot(n3, w(L + 'ff_w1'), preferred_element_type=jnp.float32)
                + w(L + 'ff_b1'), 0.0)
            h = h + jnp.dot(f, w(L + 'ff_w2'),
                            preferred_element_type=jnp.float32) + w(L + 'ff_b2')

        # decoder final LayerNorm, per-batch max over sequence, output linear
        h = _layer_norm(h, w('dec_norm_g'), w('dec_norm_b'))
        pooled = jnp.concatenate(
            [jnp.max(h[b * sx:(b + 1) * sx, :], axis=0, keepdims=True)
             for b in range(batch)], axis=0)                          # [B, E]
        out = jnp.dot(pooled, w('ff_w'),
                      preferred_element_type=jnp.float32) + w('ff_b')  # [B, T]
        out_ref[...] = out.astype(out_ref.dtype)

    return kernel


# ----------------------------- host-side packing ----------------------------

def pack_params(params, *, nhead, batch, sx, sp):
    """Build ONE [R,128] f32 slab: fused QKV/KV weights (1/sqrt(Dh) folded
    into Q), bias rows, and the constant head / batch-block-diag masks.
    Runs once at init; returns (slab, static offset table)."""
    emb = int(params['prot_w'].shape[1])
    dh = emb // nhead
    scale = 1.0 / math.sqrt(dh)
    LANES = 128

    chunks, offsets = [], {}
    cursor = 0

    def put(name, arr):
        nonlocal cursor
        a = np.asarray(arr, np.float32)
        if a.ndim == 1:
            a = a.reshape(1, -1)
        r, c = a.shape
        assert c <= LANES, f"{name} too wide for 128-lane slab"
        buf = np.zeros((r, LANES), np.float32)
        buf[:, :c] = a
        chunks.append(buf)
        offsets[name] = (cursor, r, c)
        cursor += r

    # ---- constant masks for the (batch, head)-stacked fused attention ----
    bsx, bsp, hbs = batch * sx, batch * sp, nhead * batch * sx
    rows = np.arange(hbs)
    head_of_row = rows // bsx
    batch_of_row = (rows % bsx) // sx
    head_mask = (head_of_row[:, None] == (np.arange(emb)[None, :] // dh)
                 ).astype(np.float32)
    self_bd = np.where(batch_of_row[:, None] == (np.arange(bsx)[None, :] // sx),
                       0.0, -1e9).astype(np.float32)
    cross_bd = np.where(batch_of_row[:, None] == (np.arange(bsp)[None, :] // sp),
                        0.0, -1e9).astype(np.float32)
    put('head_mask', head_mask)
    put('self_bd', self_bd)
    put('cross_bd', cross_bd)

    put('prot_w', params['prot_w'])
    put('prot_ln_g', params['prot_ln_g'])
    put('prot_ln_b', params['prot_ln_b'])

    for li, lp in enumerate(params['dec_layers']):
        L = f'L{li}_'
        sa, ca = lp['self_attn'], lp['cross_attn']
        put(L + 'ln1_g', lp['ln1_g']); put(L + 'ln1_b', lp['ln1_b'])
        put(L + 'ln2_g', lp['ln2_g']); put(L + 'ln2_b', lp['ln2_b'])
        put(L + 'ln3_g', lp['ln3_g']); put(L + 'ln3_b', lp['ln3_b'])
        put(L + 'sa_wqkv', np.concatenate(
            [np.asarray(sa['wq'], np.float32) * scale, sa['wk'], sa['wv']], axis=1))
        put(L + 'sa_bqkv', np.concatenate(
            [np.asarray(sa['bq'], np.float32) * scale, sa['bk'], sa['bv']]))
        put(L + 'sa_wo', sa['wo']); put(L + 'sa_bo', sa['bo'])
        put(L + 'ca_wq', np.asarray(ca['wq'], np.float32) * scale)
        put(L + 'ca_bq', np.asarray(ca['bq'], np.float32) * scale)
        put(L + 'ca_wkv', np.concatenate([ca['wk'], ca['wv']], axis=1))
        put(L + 'ca_bkv', np.concatenate([ca['bk'], ca['bv']]))
        put(L + 'ca_wo', ca['wo']); put(L + 'ca_bo', ca['bo'])
        put(L + 'ff_w1', lp['ff_w1']); put(L + 'ff_b1', lp['ff_b1'])
        put(L + 'ff_w2', lp['ff_w2']); put(L + 'ff_b2', lp['ff_b2'])

    put('dec_norm_g', params['dec_norm_g'])
    put('dec_norm_b', params['dec_norm_b'])
    put('ff_w', params['ff_w'])
    put('ff_b', params['ff_b'])

    slab = np.concatenate(chunks, axis=0)
    pad = (-slab.shape[0]) % 8                          # sublane-tile align
    if pad:
        slab = np.concatenate([slab, np.zeros((pad, LANES), np.float32)], axis=0)
    return jnp.asarray(slab), offsets


# ----------------------------- forward wrapper ------------------------------

def tenc_forward(slab, x, x_prot, *, offsets, nhead):
    batch, sx, emb = x.shape
    sp, protdim = x_prot.shape[1], x_prot.shape[2]
    n_layers = len([k for k in offsets if k.endswith('_sa_wo')])
    n_targets = offsets['ff_w'][2]

    # x_mask = (x[:, :, 0] == 0): additive key bias for decoder self-attention.
    tgt_keypad = jnp.where(x[:, :, 0] == 0.0, -1e9, 0.0).astype(
        jnp.float32).reshape(1, batch * sx)

    kernel = _make_kernel(offsets, batch=batch, sx=sx, sp=sp, emb=emb,
                          nhead=nhead, n_layers=n_layers)
    # No grid: single invocation; slab + activations fully VMEM resident.
    return pl.pallas_call(
        kernel,
        out_shape=jax.ShapeDtypeStruct((batch, n_targets), jnp.float32),
    )(slab,
      x.reshape(batch * sx, emb),
      x_prot.reshape(batch * sp, protdim),
      tgt_keypad)


# ----------------------------- params init ---------------------------------

def init_params(key, embdim, protdim, n_targets, n_layers):
    keys = iter(jax.random.split(key, 256))

    def dense(shape, scale=0.05):
        return scale * jax.random.normal(next(keys), shape, jnp.float32)

    def attn_params():
        return dict(
            wq=dense((embdim, embdim)), bq=jnp.zeros((embdim,), jnp.float32),
            wk=dense((embdim, embdim)), bk=jnp.zeros((embdim,), jnp.float32),
            wv=dense((embdim, embdim)), bv=jnp.zeros((embdim,), jnp.float32),
            wo=dense((embdim, embdim)), bo=jnp.zeros((embdim,), jnp.float32))

    layers = []
    for _ in range(n_layers):
        layers.append(dict(
            ln1_g=jnp.ones((embdim,), jnp.float32), ln1_b=jnp.zeros((embdim,), jnp.float32),
            ln2_g=jnp.ones((embdim,), jnp.float32), ln2_b=jnp.zeros((embdim,), jnp.float32),
            ln3_g=jnp.ones((embdim,), jnp.float32), ln3_b=jnp.zeros((embdim,), jnp.float32),
            self_attn=attn_params(),
            cross_attn=attn_params(),
            ff_w1=dense((embdim, 4 * embdim)), ff_b1=jnp.zeros((4 * embdim,), jnp.float32),
            ff_w2=dense((4 * embdim, embdim)), ff_b2=jnp.zeros((embdim,), jnp.float32),
        ))

    # TODO(synk): esm.Encoder (protein-sequence featurization) and the unused
    # conv prot_mapper are not instantiated; the kernel consumes x_prot features.
    return dict(
        prot_w=dense((protdim, embdim)),
        prot_ln_g=jnp.ones((embdim,), jnp.float32),
        prot_ln_b=jnp.zeros((embdim,), jnp.float32),
        dec_layers=layers,
        dec_norm_g=jnp.ones((embdim,), jnp.float32),
        dec_norm_b=jnp.zeros((embdim,), jnp.float32),
        ff_w=dense((embdim, n_targets)),
        ff_b=jnp.zeros((n_targets,), jnp.float32),
    )


# ----------------------------- main -----------------------------------------

if __name__ == "__main__":
    embdim, protdim, n_targets = 32, 16, 4
    n_layers, n_prot_layers, nhead = 2, 0, 8
    B, Sx, Sp = 2, 8, 12

    key = jax.random.PRNGKey(0)
    kp, kx, kxp = jax.random.split(key, 3)
    params = init_params(kp, embdim, protdim, n_targets, n_layers)

    x = jax.random.normal(kx, (B, Sx, embdim), jnp.float32)         # tgt tokens
    x_prot = jax.random.normal(kxp, (B, Sp, protdim), jnp.float32)  # protein feats

    # Pack once at init (hoisted out of the per-call path).
    slab, offsets = pack_params(params, nhead=nhead, batch=B, sx=Sx, sp=Sp)

    fwd = jax.jit(functools.partial(tenc_forward, offsets=offsets, nhead=nhead))
    out = fwd(slab, x, x_prot)
    jax.block_until_ready(out)

    assert out.shape == (B, n_targets)
    assert bool(jnp.all(jnp.isfinite(out)))
    print("KERNEL_OK")
</pallas_src>

<mosaic_0001>
module attributes {stable_mosaic.version = 11 : i64} {
  func.func @kernel(%arg0: memref<1104x128xf32, #tpu.memory_space<vmem>>, %arg1: memref<16x32xf32, #tpu.memory_space<vmem>>, %arg2: memref<24x16xf32, #tpu.memory_space<vmem>>, %arg3: memref<1x16xf32, #tpu.memory_space<vmem>>, %arg4: memref<2x4xf32, #tpu.memory_space<vmem>>) attributes {dimension_semantics = [], scalar_prefetch = 0 : i64, scratch_operands = 0 : i64, tpu.core_type = #tpu.core_type<tc>} {
    %c0 = arith.constant 0 : index
    %c0_0 = arith.constant 0 : index
    %0 = vector.load %arg1[%c0, %c0_0] : memref<16x32xf32, #tpu.memory_space<vmem>>, vector<16x32xf32>
    %c0_1 = arith.constant 0 : index
    %c0_2 = arith.constant 0 : index
    %1 = vector.load %arg2[%c0_1, %c0_2] : memref<24x16xf32, #tpu.memory_space<vmem>>, vector<24x16xf32>
    %c0_3 = arith.constant 0 : index
    %c0_4 = arith.constant 0 : index
    %2 = vector.load %arg3[%c0_3, %c0_4] : memref<1x16xf32, #tpu.memory_space<vmem>>, vector<1x16xf32>
    %c0_5 = arith.constant 0 : index
    %c0_6 = arith.constant 0 : index
    %3 = vector.load %arg0[%c0_5, %c0_6] : memref<1104x128xf32, #tpu.memory_space<vmem>>, vector<128x32xf32>
    %c128 = arith.constant 128 : index
    %c0_7 = arith.constant 0 : index
    %4 = vector.load %arg0[%c128, %c0_7] : memref<1104x128xf32, #tpu.memory_space<vmem>>, vector<128x16xf32>
    %c256 = arith.constant 256 : index
    %c0_8 = arith.constant 0 : index
    %5 = vector.load %arg0[%c256, %c0_8] : memref<1104x128xf32, #tpu.memory_space<vmem>>, vector<128x24xf32>
    %c384 = arith.constant 384 : index
    %c0_9 = arith.constant 0 : index
    %6 = vector.load %arg0[%c384, %c0_9] : memref<1104x128xf32, #tpu.memory_space<vmem>>, vector<16x32xf32>
    %cst = arith.constant dense<0.000000e+00> : vector<24x32xf32>
    %7 = tpu.matmul %1, %6, %cst {dimension_numbers = #tpu.dot_dimension_numbers<[1], [0], [0], [1], [0, 0, 1, 1], [], []>} : vector<24x16xf32>, vector<16x32xf32>, vector<24x32xf32> -> vector<24x32xf32>
    %c400 = arith.constant 400 : index
    %c0_10 = arith.constant 0 : index
    %8 = vector.load %arg0[%c400, %c0_10] : memref<1104x128xf32, #tpu.memory_space<vmem>>, vector<1x32xf32>
    %c401 = arith.constant 401 : index
    %c0_11 = arith.constant 0 : index
    %9 = vector.load %arg0[%c401, %c0_11] : memref<1104x128xf32, #tpu.memory_space<vmem>>, vector<1x32xf32>
    %cst_12 = arith.constant dense<0.000000e+00> : vector<24xf32>
    %10 = vector.multi_reduction <add>, %7, %cst_12 [1] : vector<24x32xf32> to vector<24xf32>
    %11 = vector.shape_cast %10 : vector<24xf32> to vector<24x1xf32>
    %cst_13 = arith.constant 3.200000e+01 : f32
    %12 = vector.broadcast %cst_13 : f32 to vector<24x1xf32>
    %13 = arith.divf %11, %12 : vector<24x1xf32>
    %14 = vector.broadcast %13 : vector<24x1xf32> to vector<24x32xf32>
    %15 = arith.subf %7, %14 : vector<24x32xf32>
    %16 = arith.mulf %15, %15 : vector<24x32xf32>
    %cst_14 = arith.constant dense<0.000000e+00> : vector<24xf32>
    %17 = vector.multi_reduction <add>, %16, %cst_14 [1] : vector<24x32xf32> to vector<24xf32>
    %18 = vector.shape_cast %17 : vector<24xf32> to vector<24x1xf32>
    %cst_15 = arith.constant 3.200000e+01 : f32
    %19 = vector.broadcast %cst_15 : f32 to vector<24x1xf32>
    %20 = arith.divf %18, %19 : vector<24x1xf32>
    %cst_16 = arith.constant 9.99999974E-6 : f32
    %21 = vector.broadcast %cst_16 : f32 to vector<24x1xf32>
    %22 = arith.addf %20, %21 : vector<24x1xf32>
    %23 = math.rsqrt %22 : vector<24x1xf32>
    %24 = vector.broadcast %23 : vector<24x1xf32> to vector<24x32xf32>
    %25 = arith.mulf %15, %24 : vector<24x32xf32>
    %26 = vector.broadcast %8 : vector<1x32xf32> to vector<24x32xf32>
    %27 = arith.mulf %25, %26 : vector<24x32xf32>
    %28 = vector.broadcast %9 : vector<1x32xf32> to vector<24x32xf32>
    %29 = arith.addf %27, %28 : vector<24x32xf32>
    %30 = vector.extract_strided_slice %29 {offsets = [0, 0], sizes = [24, 1], strides = [1, 1]} : vector<24x32xf32> to vector<24x1xf32>
    %cst_17 = arith.constant 0.000000e+00 : f32
    %31 = vector.broadcast %cst_17 : f32 to vector<24x1xf32>
    %32 = arith.cmpf oeq, %30, %31 : vector<24x1xf32>
    %cst_18 = arith.constant -1.000000e+09 : f32
    %cst_19 = arith.constant 0.000000e+00 : f32
    %33 = vector.broadcast %cst_18 : f32 to vector<24x1xf32>
    %34 = vector.broadcast %cst_19 : f32 to vector<24x1xf32>
    %35 = arith.select %32, %33, %34 : vector<24x1xi1>, vector<24x1xf32>
    %36 = tpu.transpose %35, [1, 0] : vector<24x1xf32> -> vector<1x24xf32>
    %c402 = arith.constant 402 : index
    %c0_20 = arith.constant 0 : index
    %37 = vector.load %arg0[%c402, %c0_20] : memref<1104x128xf32, #tpu.memory_space<vmem>>, vector<1x32xf32>
    %c403 = arith.constant 403 : index
    %c0_21 = arith.constant 0 : index
    %38 = vector.load %arg0[%c403, %c0_21] : memref<1104x128xf32, #tpu.memory_space<vmem>>, vector<1x32xf32>
    %cst_22 = arith.constant dense<0.000000e+00> : vector<16xf32>
    %39 = vector.multi_reduction <add>, %0, %cst_22 [1] : vector<16x32xf32> to vector<16xf32>
    %40 = vector.shape_cast %39 : vector<16xf32> to vector<16x1xf32>
    %cst_23 = arith.constant 3.200000e+01 : f32
    %41 = vector.broadcast %cst_23 : f32 to vector<16x1xf32>
    %42 = arith.divf %40, %41 : vector<16x1xf32>
    %43 = vector.broadcast %42 : vector<16x1xf32> to vector<16x32xf32>
    %44 = arith.subf %0, %43 : vector<16x32xf32>
    %45 = arith.mulf %44, %44 : vector<16x32xf32>
    %cst_24 = arith.constant dense<0.000000e+00> : vector<16xf32>
    %46 = vector.multi_reduction <add>, %45, %cst_24 [1] : vector<16x32xf32> to vector<16xf32>
    %47 = vector.shape_cast %46 : vector<16xf32> to vector<16x1xf32>
    %cst_25 = arith.constant 3.200000e+01 : f32
    %48 = vector.broadcast %cst_25 : f32 to vector<16x1xf32>
    %49 = arith.divf %47, %48 : vector<16x1xf32>
    %cst_26 = arith.constant 9.99999974E-6 : f32
    %50 = vector.broadcast %cst_26 : f32 to vector<16x1xf32>
    %51 = arith.addf %49, %50 : vector<16x1xf32>
    %52 = math.rsqrt %51 : vector<16x1xf32>
    %53 = vector.broadcast %52 : vector<16x1xf32> to vector<16x32xf32>
    %54 = arith.mulf %44, %53 : vector<16x32xf32>
    %55 = vector.broadcast %37 : vector<1x32xf32> to vector<16x32xf32>
    %56 = arith.mulf %54, %55 : vector<16x32xf32>
    %57 = vector.broadcast %38 : vector<1x32xf32> to vector<16x32xf32>
    %58 = arith.addf %56, %57 : vector<16x32xf32>
    %c408 = arith.constant 408 : index
    %c0_27 = arith.constant 0 : index
    %59 = vector.load %arg0[%c408, %c0_27] : memref<1104x128xf32, #tpu.memory_space<vmem>>, vector<32x96xf32>
    %cst_28 = arith.constant dense<0.000000e+00> : vector<16x96xf32>
    %60 = tpu.matmul %58, %59, %cst_28 {dimension_numbers = #tpu.dot_dimension_numbers<[1], [0], [0], [1], [0, 0, 1, 1], [], []>} : vector<16x32xf32>, vector<32x96xf32>, vector<16x96xf32> -> vector<16x96xf32>
    %c440 = arith.constant 440 : index
    %c0_29 = arith.constant 0 : index
    %61 = vector.load %arg0[%c440, %c0_29] : memref<1104x128xf32, #tpu.memory_space<vmem>>, vector<1x96xf32>
    %62 = vector.broadcast %61 : vector<1x96xf32> to vector<16x96xf32>
    %63 = arith.addf %60, %62 : vector<16x96xf32>
    %64 = vector.extract_strided_slice %63 {offsets = [0, 0], sizes = [16, 32], strides = [1, 1]} : vector<16x96xf32> to vector<16x32xf32>
    %65 = vector.extract_strided_slice %63 {offsets = [0, 32], sizes = [16, 32], strides = [1, 1]} : vector<16x96xf32> to vector<16x32xf32>
    %66 = vector.extract_strided_slice %63 {offsets = [0, 64], sizes = [16, 32], strides = [1, 1]} : vector<16x96xf32> to vector<16x32xf32>
    %67 = tpu.concatenate %64, %64, %64, %64, %64, %64, %64, %64 in 0 : vector<16x32xf32>, vector<16x32xf32>, vector<16x32xf32>, vector<16x32xf32>, vector<16x32xf32>, vector<16x32xf32>, vector<16x32xf32>, vector<16x32xf32> -> vector<128x32xf32>
    %68 = arith.mulf %67, %3 : vector<128x32xf32>
    %cst_30 = arith.constant dense<0.000000e+00> : vector<128x16xf32>
    %69 = tpu.matmul %68, %65, %cst_30 {dimension_numbers = #tpu.dot_dimension_numbers<[1], [1], [0], [0], [0, 0, 1, 0], [], []>} : vector<128x32xf32>, vector<16x32xf32>, vector<128x16xf32> -> vector<128x16xf32>
    %70 = arith.addf %69, %4 : vector<128x16xf32>
    %71 = vector.broadcast %2 : vector<1x16xf32> to vector<128x16xf32>
    %72 = arith.addf %70, %71 : vector<128x16xf32>
    %cst_31 = arith.constant dense<0xFF800000> : vector<128xf32>
    %73 = vector.multi_reduction <maximumf>, %72, %cst_31 [1] : vector<128x16xf32> to vector<128xf32>
    %74 = vector.shape_cast %73 : vector<128xf32> to vector<128x1xf32>
    %75 = vector.broadcast %74 : vector<128x1xf32> to vector<128x16xf32>
    %76 = arith.subf %72, %75 : vector<128x16xf32>
    %77 = math.exp %76 : vector<128x16xf32>
    %cst_32 = arith.constant dense<0.000000e+00> : vector<128xf32>
    %78 = vector.multi_reduction <add>, %77, %cst_32 [1] : vector<128x16xf32> to vector<128xf32>
    %79 = vector.shape_cast %78 : vector<128xf32> to vector<128x1xf32>
    %80 = tpu.reciprocal %79 {approx = true} : vector<128x1xf32> -> vector<128x1xf32>
    %81 = vector.broadcast %80 : vector<128x1xf32> to vector<128x16xf32>
    %82 = arith.mulf %77, %81 : vector<128x16xf32>
    %cst_33 = arith.constant dense<0.000000e+00> : vector<128x32xf32>
    %83 = tpu.matmul %82, %66, %cst_33 {dimension_numbers = #tpu.dot_dimension_numbers<[1], [0], [0], [1], [0, 0, 1, 1], [], []>} : vector<128x16xf32>, vector<16x32xf32>, vector<128x32xf32> -> vector<128x32xf32>
    %84 = arith.mulf %83, %3 : vector<128x32xf32>
    %85 = vector.extract_strided_slice %84 {offsets = [0, 0], sizes = [16, 32], strides = [1, 1]} : vector<128x32xf32> to vector<16x32xf32>
    %86 = vector.extract_strided_slice %84 {offsets = [16, 0], sizes = [16, 32], strides = [1, 1]} : vector<128x32xf32> to vector<16x32xf32>
    %87 = arith.addf %85, %86 : vector<16x32xf32>
    %88 = vector.extract_strided_slice %84 {offsets = [32, 0], sizes = [16, 32], strides = [1, 1]} : vector<128x32xf32> to vector<16x32xf32>
    %89 = arith.addf %87, %88 : vector<16x32xf32>
    %90 = vector.extract_strided_slice %84 {offsets = [48, 0], sizes = [16, 32], strides = [1, 1]} : vector<128x32xf32> to vector<16x32xf32>
    %91 = arith.addf %89, %90 : vector<16x32xf32>
    %92 = vector.extract_strided_slice %84 {offsets = [64, 0], sizes = [16, 32], strides = [1, 1]} : vector<128x32xf32> to vector<16x32xf32>
    %93 = arith.addf %91, %92 : vector<16x32xf32>
    %94 = vector.extract_strided_slice %84 {offsets = [80, 0], sizes = [16, 32], strides = [1, 1]} : vector<128x32xf32> to vector<16x32xf32>
    %95 = arith.addf %93, %94 : vector<16x32xf32>
    %96 = vector.extract_strided_slice %84 {offsets = [96, 0], sizes = [16, 32], strides = [1, 1]} : vector<128x32xf32> to vector<16x32xf32>
    %97 = arith.addf %95, %96 : vector<16x32xf32>
    %98 = vector.extract_strided_slice %84 {offsets = [112, 0], sizes = [16, 32], strides = [1, 1]} : vector<128x32xf32> to vector<16x32xf32>
    %99 = arith.addf %97, %98 : vector<16x32xf32>
    %c441 = arith.constant 441 : index
    %c0_34 = arith.constant 0 : index
    %100 = vector.load %arg0[%c441, %c0_34] : memref<1104x128xf32, #tpu.memory_space<vmem>>, vector<32x32xf32>
    %cst_35 = arith.constant dense<0.000000e+00> : vector<16x32xf32>
    %101 = tpu.matmul %99, %100, %cst_35 {dimension_numbers = #tpu.dot_dimension_numbers<[1], [0], [0], [1], [0, 0, 1, 1], [], []>} : vector<16x32xf32>, vector<32x32xf32>, vector<16x32xf32> -> vector<16x32xf32>
    %c473 = arith.constant 473 : index
    %c0_36 = arith.constant 0 : index
    %102 = vector.load %arg0[%c473, %c0_36] : memref<1104x128xf32, #tpu.memory_space<vmem>>, vector<1x32xf32>
    %103 = vector.broadcast %102 : vector<1x32xf32> to vector<16x32xf32>
    %104 = arith.addf %101, %103 : vector<16x32xf32>
    %105 = arith.addf %0, %104 : vector<16x32xf32>
    %c404 = arith.constant 404 : index
    %c0_37 = arith.constant 0 : index
    %106 = vector.load %arg0[%c404, %c0_37] : memref<1104x128xf32, #tpu.memory_space<vmem>>, vector<1x32xf32>
    %c405 = arith.constant 405 : index
    %c0_38 = arith.constant 0 : index
    %107 = vector.load %arg0[%c405, %c0_38] : memref<1104x128xf32, #tpu.memory_space<vmem>>, vector<1x32xf32>
    %cst_39 = arith.constant dense<0.000000e+00> : vector<16xf32>
    %108 = vector.multi_reduction <add>, %105, %cst_39 [1] : vector<16x32xf32> to vector<16xf32>
    %109 = vector.shape_cast %108 : vector<16xf32> to vector<16x1xf32>
    %cst_40 = arith.constant 3.200000e+01 : f32
    %110 = vector.broadcast %cst_40 : f32 to vector<16x1xf32>
    %111 = arith.divf %109, %110 : vector<16x1xf32>
    %112 = vector.broadcast %111 : vector<16x1xf32> to vector<16x32xf32>
    %113 = arith.subf %105, %112 : vector<16x32xf32>
    %114 = arith.mulf %113, %113 : vector<16x32xf32>
    %cst_41 = arith.constant dense<0.000000e+00> : vector<16xf32>
    %115 = vector.multi_reduction <add>, %114, %cst_41 [1] : vector<16x32xf32> to vector<16xf32>
    %116 = vector.shape_cast %115 : vector<16xf32> to vector<16x1xf32>
    %cst_42 = arith.constant 3.200000e+01 : f32
    %117 = vector.broadcast %cst_42 : f32 to vector<16x1xf32>
    %118 = arith.divf %116, %117 : vector<16x1xf32>
    %cst_43 = arith.constant 9.99999974E-6 : f32
    %119 = vector.broadcast %cst_43 : f32 to vector<16x1xf32>
    %120 = arith.addf %118, %119 : vector<16x1xf32>
    %121 = math.rsqrt %120 : vector<16x1xf32>
    %122 = vector.broadcast %121 : vector<16x1xf32> to vector<16x32xf32>
    %123 = arith.mulf %113, %122 : vector<16x32xf32>
    %124 = vector.broadcast %106 : vector<1x32xf32> to vector<16x32xf32>
    %125 = arith.mulf %123, %124 : vector<16x32xf32>
    %126 = vector.broadcast %107 : vector<1x32xf32> to vector<16x32xf32>
    %127 = arith.addf %125, %126 : vector<16x32xf32>
    %c474 = arith.constant 474 : index
    %c0_44 = arith.constant 0 : index
    %128 = vector.load %arg0[%c474, %c0_44] : memref<1104x128xf32, #tpu.memory_space<vmem>>, vector<32x32xf32>
    %cst_45 = arith.constant dense<0.000000e+00> : vector<16x32xf32>
    %129 = tpu.matmul %127, %128, %cst_45 {dimension_numbers = #tpu.dot_dimension_numbers<[1], [0], [0], [1], [0, 0, 1, 1], [], []>} : vector<16x32xf32>, vector<32x32xf32>, vector<16x32xf32> -> vector<16x32xf32>
    %c506 = arith.constant 506 : index
    %c0_46 = arith.constant 0 : index
    %130 = vector.load %arg0[%c506, %c0_46] : memref<1104x128xf32, #tpu.memory_space<vmem>>, vector<1x32xf32>
    %131 = vector.broadcast %130 : vector<1x32xf32> to vector<16x32xf32>
    %132 = arith.addf %129, %131 : vector<16x32xf32>
    %c507 = arith.constant 507 : index
    %c0_47 = arith.constant 0 : index
    %133 = vector.load %arg0[%c507, %c0_47] : memref<1104x128xf32, #tpu.memory_space<vmem>>, vector<32x64xf32>
    %cst_48 = arith.constant dense<0.000000e+00> : vector<24x64xf32>
    %134 = tpu.matmul %29, %133, %cst_48 {dimension_numbers = #tpu.dot_dimension_numbers<[1], [0], [0], [1], [0, 0, 1, 1], [], []>} : vector<24x32xf32>, vector<32x64xf32>, vector<24x64xf32> -> vector<24x64xf32>
    %c539 = arith.constant 539 : index
    %c0_49 = arith.constant 0 : index
    %135 = vector.load %arg0[%c539, %c0_49] : memref<1104x128xf32, #tpu.memory_space<vmem>>, vector<1x64xf32>
    %136 = vector.broadcast %135 : vector<1x64xf32> to vector<24x64xf32>
    %137 = arith.addf %134, %136 : vector<24x64xf32>
    %138 = vector.extract_strided_slice %137 {offsets = [0, 0], sizes = [24, 32], strides = [1, 1]} : vector<24x64xf32> to vector<24x32xf32>
    %139 = vector.extract_strided_slice %137 {offsets = [0, 32], sizes = [24, 32], strides = [1, 1]} : vector<24x64xf32> to vector<24x32xf32>
    %140 = tpu.concatenate %132, %132, %132, %132, %132, %132, %132, %132 in 0 : vector<16x32xf32>, vector<16x32xf32>, vector<16x32xf32>, vector<16x32xf32>, vector<16x32xf32>, vector<16x32xf32>, vector<16x32xf32>, vector<16x32xf32> -> vector<128x32xf32>
    %141 = arith.mulf %140, %3 : vector<128x32xf32>
    %cst_50 = arith.constant dense<0.000000e+00> : vector<128x24xf32>
    %142 = tpu.matmul %141, %138, %cst_50 {dimension_numbers = #tpu.dot_dimension_numbers<[1], [1], [0], [0], [0, 0, 1, 0], [], []>} : vector<128x32xf32>, vector<24x32xf32>, vector<128x24xf32> -> vector<128x24xf32>
    %143 = arith.addf %142, %5 : vector<128x24xf32>
    %144 = vector.broadcast %36 : vector<1x24xf32> to vector<128x24xf32>
    %145 = arith.addf %143, %144 : vector<128x24xf32>
    %cst_51 = arith.constant dense<0xFF800000> : vector<128xf32>
    %146 = vector.multi_reduction <maximumf>, %145, %cst_51 [1] : vector<128x24xf32> to vector<128xf32>
    %147 = vector.shape_cast %146 : vector<128xf32> to vector<128x1xf32>
    %148 = vector.broadcast %147 : vector<128x1xf32> to vector<128x24xf32>
    %149 = arith.subf %145, %148 : vector<128x24xf32>
    %150 = math.exp %149 : vector<128x24xf32>
    %cst_52 = arith.constant dense<0.000000e+00> : vector<128xf32>
    %151 = vector.multi_reduction <add>, %150, %cst_52 [1] : vector<128x24xf32> to vector<128xf32>
    %152 = vector.shape_cast %151 : vector<128xf32> to vector<128x1xf32>
    %153 = tpu.reciprocal %152 {approx = true} : vector<128x1xf32> -> vector<128x1xf32>
    %154 = vector.broadcast %153 : vector<128x1xf32> to vector<128x24xf32>
    %155 = arith.mulf %150, %154 : vector<128x24xf32>
    %cst_53 = arith.constant dense<0.000000e+00> : vector<128x32xf32>
    %156 = tpu.matmul %155, %139, %cst_53 {dimension_numbers = #tpu.dot_dimension_numbers<[1], [0], [0], [1], [0, 0, 1, 1], [], []>} : vector<128x24xf32>, vector<24x32xf32>, vector<128x32xf32> -> vector<128x32xf32>
    %157 = arith.mulf %156, %3 : vector<128x32xf32>
    %158 = vector.extract_strided_slice %157 {offsets = [0, 0], sizes = [16, 32], strides = [1, 1]} : vector<128x32xf32> to vector<16x32xf32>
    %159 = vector.extract_strided_slice %157 {offsets = [16, 0], sizes = [16, 32], strides = [1, 1]} : vector<128x32xf32> to vector<16x32xf32>
    %160 = arith.addf %158, %159 : vector<16x32xf32>
    %161 = vector.extract_strided_slice %157 {offsets = [32, 0], sizes = [16, 32], strides = [1, 1]} : vector<128x32xf32> to vector<16x32xf32>
    %162 = arith.addf %160, %161 : vector<16x32xf32>
    %163 = vector.extract_strided_slice %157 {offsets = [48, 0], sizes = [16, 32], strides = [1, 1]} : vector<128x32xf32> to vector<16x32xf32>
    %164 = arith.addf %162, %163 : vector<16x32xf32>
    %165 = vector.extract_strided_slice %157 {offsets = [64, 0], sizes = [16, 32], strides = [1, 1]} : vector<128x32xf32> to vector<16x32xf32>
    %166 = arith.addf %164, %165 : vector<16x32xf32>
    %167 = vector.extract_strided_slice %157 {offsets = [80, 0], sizes = [16, 32], strides = [1, 1]} : vector<128x32xf32> to vector<16x32xf32>
    %168 = arith.addf %166, %167 : vector<16x32xf32>
    %169 = vector.extract_strided_slice %157 {offsets = [96, 0], sizes = [16, 32], strides = [1, 1]} : vector<128x32xf32> to vector<16x32xf32>
    %170 = arith.addf %168, %169 : vector<16x32xf32>
    %171 = vector.extract_strided_slice %157 {offsets = [112, 0], sizes = [16, 32], strides = [1, 1]} : vector<128x32xf32> to vector<16x32xf32>
    %172 = arith.addf %170, %171 : vector<16x32xf32>
    %c540 = arith.constant 540 : index
    %c0_54 = arith.constant 0 : index
    %173 = vector.load %arg0[%c540, %c0_54] : memref<1104x128xf32, #tpu.memory_space<vmem>>, vector<32x32xf32>
    %cst_55 = arith.constant dense<0.000000e+00> : vector<16x32xf32>
    %174 = tpu.matmul %172, %173, %cst_55 {dimension_numbers = #tpu.dot_dimension_numbers<[1], [0], [0], [1], [0, 0, 1, 1], [], []>} : vector<16x32xf32>, vector<32x32xf32>, vector<16x32xf32> -> vector<16x32xf32>
    %c572 = arith.constant 572 : index
    %c0_56 = arith.constant 0 : index
    %175 = vector.load %arg0[%c572, %c0_56] : memref<1104x128xf32, #tpu.memory_space<vmem>>, vector<1x32xf32>
    %176 = vector.broadcast %175 : vector<1x32xf32> to vector<16x32xf32>
    %177 = arith.addf %174, %176 : vector<16x32xf32>
    %178 = arith.addf %105, %177 : vector<16x32xf32>
    %c406 = arith.constant 406 : index
    %c0_57 = arith.constant 0 : index
    %179 = vector.load %arg0[%c406, %c0_57] : memref<1104x128xf32, #tpu.memory_space<vmem>>, vector<1x32xf32>
    %c407 = arith.constant 407 : index
    %c0_58 = arith.constant 0 : index
    %180 = vector.load %arg0[%c407, %c0_58] : memref<1104x128xf32, #tpu.memory_space<vmem>>, vector<1x32xf32>
    %cst_59 = arith.constant dense<0.000000e+00> : vector<16xf32>
    %181 = vector.multi_reduction <add>, %178, %cst_59 [1] : vector<16x32xf32> to vector<16xf32>
    %182 = vector.shape_cast %181 : vector<16xf32> to vector<16x1xf32>
    %cst_60 = arith.constant 3.200000e+01 : f32
    %183 = vector.broadcast %cst_60 : f32 to vector<16x1xf32>
    %184 = arith.divf %182, %183 : vector<16x1xf32>
    %185 = vector.broadcast %184 : vector<16x1xf32> to vector<16x32xf32>
    %186 = arith.subf %178, %185 : vector<16x32xf32>
    %187 = arith.mulf %186, %186 : vector<16x32xf32>
    %cst_61 = arith.constant dense<0.000000e+00> : vector<16xf32>
    %188 = vector.multi_reduction <add>, %187, %cst_61 [1] : vector<16x32xf32> to vector<16xf32>
    %189 = vector.shape_cast %188 : vector<16xf32> to vector<16x1xf32>
    %cst_62 = arith.constant 3.200000e+01 : f32
    %190 = vector.broadcast %cst_62 : f32 to vector<16x1xf32>
    %191 = arith.divf %189, %190 : vector<16x1xf32>
    %cst_63 = arith.constant 9.99999974E-6 : f32
    %192 = vector.broadcast %cst_63 : f32 to vector<16x1xf32>
    %193 = arith.addf %191, %192 : vector<16x1xf32>
    %194 = math.rsqrt %193 : vector<16x1xf32>
    %195 = vector.broadcast %194 : vector<16x1xf32> to vector<16x32xf32>
    %196 = arith.mulf %186, %195 : vector<16x32xf32>
    %197 = vector.broadcast %179 : vector<1x32xf32> to vector<16x32xf32>
    %198 = arith.mulf %196, %197 : vector<16x32xf32>
    %199 = vector.broadcast %180 : vector<1x32xf32> to vector<16x32xf32>
    %200 = arith.addf %198, %199 : vector<16x32xf32>
    %c573 = arith.constant 573 : index
    %c0_64 = arith.constant 0 : index
    %201 = vector.load %arg0[%c573, %c0_64] : memref<1104x128xf32, #tpu.memory_space<vmem>>, vector<32x128xf32>
    %cst_65 = arith.constant dense<0.000000e+00> : vector<16x128xf32>
    %202 = tpu.matmul %200, %201, %cst_65 {dimension_numbers = #tpu.dot_dimension_numbers<[1], [0], [0], [1], [0, 0, 1, 1], [], []>} : vector<16x32xf32>, vector<32x128xf32>, vector<16x128xf32> -> vector<16x128xf32>
    %c605 = arith.constant 605 : index
    %c0_66 = arith.constant 0 : index
    %203 = vector.load %arg0[%c605, %c0_66] : memref<1104x128xf32, #tpu.memory_space<vmem>>, vector<1x128xf32>
    %204 = vector.broadcast %203 : vector<1x128xf32> to vector<16x128xf32>
    %205 = arith.addf %202, %204 : vector<16x128xf32>
    %cst_67 = arith.constant 0.000000e+00 : f32
    %206 = vector.broadcast %cst_67 : f32 to vector<16x128xf32>
    %207 = arith.maximumf %205, %206 : vector<16x128xf32>
    %c606 = arith.constant 606 : index
    %c0_68 = arith.constant 0 : index
    %208 = vector.load %arg0[%c606, %c0_68] : memref<1104x128xf32, #tpu.memory_space<vmem>>, vector<128x32xf32>
    %cst_69 = arith.constant dense<0.000000e+00> : vector<16x32xf32>
    %209 = tpu.matmul %207, %208, %cst_69 {dimension_numbers = #tpu.dot_dimension_numbers<[1], [0], [0], [1], [0, 0, 1, 1], [], []>} : vector<16x128xf32>, vector<128x32xf32>, vector<16x32xf32> -> vector<16x32xf32>
    %210 = arith.addf %178, %209 : vector<16x32xf32>
    %c734 = arith.constant 734 : index
    %c0_70 = arith.constant 0 : index
    %211 = vector.load %arg0[%c734, %c0_70] : memref<1104x128xf32, #tpu.memory_space<vmem>>, vector<1x32xf32>
    %212 = vector.broadcast %211 : vector<1x32xf32> to vector<16x32xf32>
    %213 = arith.addf %210, %212 : vector<16x32xf32>
    %c735 = arith.constant 735 : index
    %c0_71 = arith.constant 0 : index
    %214 = vector.load %arg0[%c735, %c0_71] : memref<1104x128xf32, #tpu.memory_space<vmem>>, vector<1x32xf32>
    %c736 = arith.constant 736 : index
    %c0_72 = arith.constant 0 : index
    %215 = vector.load %arg0[%c736, %c0_72] : memref<1104x128xf32, #tpu.memory_space<vmem>>, vector<1x32xf32>
    %cst_73 = arith.constant dense<0.000000e+00> : vector<16xf32>
    %216 = vector.multi_reduction <add>, %213, %cst_73 [1] : vector<16x32xf32> to vector<16xf32>
    %217 = vector.shape_cast %216 : vector<16xf32> to vector<16x1xf32>
    %cst_74 = arith.constant 3.200000e+01 : f32
    %218 = vector.broadcast %cst_74 : f32 to vector<16x1xf32>
    %219 = arith.divf %217, %218 : vector<16x1xf32>
    %220 = vector.broadcast %219 : vector<16x1xf32> to vector<16x32xf32>
    %221 = arith.subf %213, %220 : vector<16x32xf32>
    %222 = arith.mulf %221, %221 : vector<16x32xf32>
    %cst_75 = arith.constant dense<0.000000e+00> : vector<16xf32>
    %223 = vector.multi_reduction <add>, %222, %cst_75 [1] : vector<16x32xf32> to vector<16xf32>
    %224 = vector.shape_cast %223 : vector<16xf32> to vector<16x1xf32>
    %cst_76 = arith.constant 3.200000e+01 : f32
    %225 = vector.broadcast %cst_76 : f32 to vector<16x1xf32>
    %226 = arith.divf %224, %225 : vector<16x1xf32>
    %cst_77 = arith.constant 9.99999974E-6 : f32
    %227 = vector.broadcast %cst_77 : f32 to vector<16x1xf32>
    %228 = arith.addf %226, %227 : vector<16x1xf32>
    %229 = math.rsqrt %228 : vector<16x1xf32>
    %230 = vector.broadcast %229 : vector<16x1xf32> to vector<16x32xf32>
    %231 = arith.mulf %221, %230 : vector<16x32xf32>
    %232 = vector.broadcast %214 : vector<1x32xf32> to vector<16x32xf32>
    %233 = arith.mulf %231, %232 : vector<16x32xf32>
    %234 = vector.broadcast %215 : vector<1x32xf32> to vector<16x32xf32>
    %235 = arith.addf %233, %234 : vector<16x32xf32>
    %c741 = arith.constant 741 : index
    %c0_78 = arith.constant 0 : index
    %236 = vector.load %arg0[%c741, %c0_78] : memref<1104x128xf32, #tpu.memory_space<vmem>>, vector<32x96xf32>
    %cst_79 = arith.constant dense<0.000000e+00> : vector<16x96xf32>
    %237 = tpu.matmul %235, %236, %cst_79 {dimension_numbers = #tpu.dot_dimension_numbers<[1], [0], [0], [1], [0, 0, 1, 1], [], []>} : vector<16x32xf32>, vector<32x96xf32>, vector<16x96xf32> -> vector<16x96xf32>
    %c773 = arith.constant 773 : index
    %c0_80 = arith.constant 0 : index
    %238 = vector.load %arg0[%c773, %c0_80] : memref<1104x128xf32, #tpu.memory_space<vmem>>, vector<1x96xf32>
    %239 = vector.broadcast %238 : vector<1x96xf32> to vector<16x96xf32>
    %240 = arith.addf %237, %239 : vector<16x96xf32>
    %241 = vector.extract_strided_slice %240 {offsets = [0, 0], sizes = [16, 32], strides = [1, 1]} : vector<16x96xf32> to vector<16x32xf32>
    %242 = vector.extract_strided_slice %240 {offsets = [0, 32], sizes = [16, 32], strides = [1, 1]} : vector<16x96xf32> to vector<16x32xf32>
    %243 = vector.extract_strided_slice %240 {offsets = [0, 64], sizes = [16, 32], strides = [1, 1]} : vector<16x96xf32> to vector<16x32xf32>
    %244 = tpu.concatenate %241, %241, %241, %241, %241, %241, %241, %241 in 0 : vector<16x32xf32>, vector<16x32xf32>, vector<16x32xf32>, vector<16x32xf32>, vector<16x32xf32>, vector<16x32xf32>, vector<16x32xf32>, vector<16x32xf32> -> vector<128x32xf32>
    %245 = arith.mulf %244, %3 : vector<128x32xf32>
    %cst_81 = arith.constant dense<0.000000e+00> : vector<128x16xf32>
    %246 = tpu.matmul %245, %242, %cst_81 {dimension_numbers = #tpu.dot_dimension_numbers<[1], [1], [0], [0], [0, 0, 1, 0], [], []>} : vector<128x32xf32>, vector<16x32xf32>, vector<128x16xf32> -> vector<128x16xf32>
    %247 = arith.addf %246, %4 : vector<128x16xf32>
    %248 = vector.broadcast %2 : vector<1x16xf32> to vector<128x16xf32>
    %249 = arith.addf %247, %248 : vector<128x16xf32>
    %cst_82 = arith.constant dense<0xFF800000> : vector<128xf32>
    %250 = vector.multi_reduction <maximumf>, %249, %cst_82 [1] : vector<128x16xf32> to vector<128xf32>
    %251 = vector.shape_cast %250 : vector<128xf32> to vector<128x1xf32>
    %252 = vector.broadcast %251 : vector<128x1xf32> to vector<128x16xf32>
    %253 = arith.subf %249, %252 : vector<128x16xf32>
    %254 = math.exp %253 : vector<128x16xf32>
    %cst_83 = arith.constant dense<0.000000e+00> : vector<128xf32>
    %255 = vector.multi_reduction <add>, %254, %cst_83 [1] : vector<128x16xf32> to vector<128xf32>
    %256 = vector.shape_cast %255 : vector<128xf32> to vector<128x1xf32>
    %257 = tpu.reciprocal %256 {approx = true} : vector<128x1xf32> -> vector<128x1xf32>
    %258 = vector.broadcast %257 : vector<128x1xf32> to vector<128x16xf32>
    %259 = arith.mulf %254, %258 : vector<128x16xf32>
    %cst_84 = arith.constant dense<0.000000e+00> : vector<128x32xf32>
    %260 = tpu.matmul %259, %243, %cst_84 {dimension_numbers = #tpu.dot_dimension_numbers<[1], [0], [0], [1], [0, 0, 1, 1], [], []>} : vector<128x16xf32>, vector<16x32xf32>, vector<128x32xf32> -> vector<128x32xf32>
    %261 = arith.mulf %260, %3 : vector<128x32xf32>
    %262 = vector.extract_strided_slice %261 {offsets = [0, 0], sizes = [16, 32], strides = [1, 1]} : vector<128x32xf32> to vector<16x32xf32>
    %263 = vector.extract_strided_slice %261 {offsets = [16, 0], sizes = [16, 32], strides = [1, 1]} : vector<128x32xf32> to vector<16x32xf32>
    %264 = arith.addf %262, %263 : vector<16x32xf32>
    %265 = vector.extract_strided_slice %261 {offsets = [32, 0], sizes = [16, 32], strides = [1, 1]} : vector<128x32xf32> to vector<16x32xf32>
    %266 = arith.addf %264, %265 : vector<16x32xf32>
    %267 = vector.extract_strided_slice %261 {offsets = [48, 0], sizes = [16, 32], strides = [1, 1]} : vector<128x32xf32> to vector<16x32xf32>
    %268 = arith.addf %266, %267 : vector<16x32xf32>
    %269 = vector.extract_strided_slice %261 {offsets = [64, 0], sizes = [16, 32], strides = [1, 1]} : vector<128x32xf32> to vector<16x32xf32>
    %270 = arith.addf %268, %269 : vector<16x32xf32>
    %271 = vector.extract_strided_slice %261 {offsets = [80, 0], sizes = [16, 32], strides = [1, 1]} : vector<128x32xf32> to vector<16x32xf32>
    %272 = arith.addf %270, %271 : vector<16x32xf32>
    %273 = vector.extract_strided_slice %261 {offsets = [96, 0], sizes = [16, 32], strides = [1, 1]} : vector<128x32xf32> to vector<16x32xf32>
    %274 = arith.addf %272, %273 : vector<16x32xf32>
    %275 = vector.extract_strided_slice %261 {offsets = [112, 0], sizes = [16, 32], strides = [1, 1]} : vector<128x32xf32> to vector<16x32xf32>
    %276 = arith.addf %274, %275 : vector<16x32xf32>
    %c774 = arith.constant 774 : index
    %c0_85 = arith.constant 0 : index
    %277 = vector.load %arg0[%c774, %c0_85] : memref<1104x128xf32, #tpu.memory_space<vmem>>, vector<32x32xf32>
    %cst_86 = arith.constant dense<0.000000e+00> : vector<16x32xf32>
    %278 = tpu.matmul %276, %277, %cst_86 {dimension_numbers = #tpu.dot_dimension_numbers<[1], [0], [0], [1], [0, 0, 1, 1], [], []>} : vector<16x32xf32>, vector<32x32xf32>, vector<16x32xf32> -> vector<16x32xf32>
    %c806 = arith.constant 806 : index
    %c0_87 = arith.constant 0 : index
    %279 = vector.load %arg0[%c806, %c0_87] : memref<1104x128xf32, #tpu.memory_space<vmem>>, vector<1x32xf32>
    %280 = vector.broadcast %279 : vector<1x32xf32> to vector<16x32xf32>
    %281 = arith.addf %278, %280 : vector<16x32xf32>
    %282 = arith.addf %213, %281 : vector<16x32xf32>
    %c737 = arith.constant 737 : index
    %c0_88 = arith.constant 0 : index
    %283 = vector.load %arg0[%c737, %c0_88] : memref<1104x128xf32, #tpu.memory_space<vmem>>, vector<1x32xf32>
    %c738 = arith.constant 738 : index
    %c0_89 = arith.constant 0 : index
    %284 = vector.load %arg0[%c738, %c0_89] : memref<1104x128xf32, #tpu.memory_space<vmem>>, vector<1x32xf32>
    %cst_90 = arith.constant dense<0.000000e+00> : vector<16xf32>
    %285 = vector.multi_reduction <add>, %282, %cst_90 [1] : vector<16x32xf32> to vector<16xf32>
    %286 = vector.shape_cast %285 : vector<16xf32> to vector<16x1xf32>
    %cst_91 = arith.constant 3.200000e+01 : f32
    %287 = vector.broadcast %cst_91 : f32 to vector<16x1xf32>
    %288 = arith.divf %286, %287 : vector<16x1xf32>
    %289 = vector.broadcast %288 : vector<16x1xf32> to vector<16x32xf32>
    %290 = arith.subf %282, %289 : vector<16x32xf32>
    %291 = arith.mulf %290, %290 : vector<16x32xf32>
    %cst_92 = arith.constant dense<0.000000e+00> : vector<16xf32>
    %292 = vector.multi_reduction <add>, %291, %cst_92 [1] : vector<16x32xf32> to vector<16xf32>
    %293 = vector.shape_cast %292 : vector<16xf32> to vector<16x1xf32>
    %cst_93 = arith.constant 3.200000e+01 : f32
    %294 = vector.broadcast %cst_93 : f32 to vector<16x1xf32>
    %295 = arith.divf %293, %294 : vector<16x1xf32>
    %cst_94 = arith.constant 9.99999974E-6 : f32
    %296 = vector.broadcast %cst_94 : f32 to vector<16x1xf32>
    %297 = arith.addf %295, %296 : vector<16x1xf32>
    %298 = math.rsqrt %297 : vector<16x1xf32>
    %299 = vector.broadcast %298 : vector<16x1xf32> to vector<16x32xf32>
    %300 = arith.mulf %290, %299 : vector<16x32xf32>
    %301 = vector.broadcast %283 : vector<1x32xf32> to vector<16x32xf32>
    %302 = arith.mulf %300, %301 : vector<16x32xf32>
    %303 = vector.broadcast %284 : vector<1x32xf32> to vector<16x32xf32>
    %304 = arith.addf %302, %303 : vector<16x32xf32>
    %c807 = arith.constant 807 : index
    %c0_95 = arith.constant 0 : index
    %305 = vector.load %arg0[%c807, %c0_95] : memref<1104x128xf32, #tpu.memory_space<vmem>>, vector<32x32xf32>
    %cst_96 = arith.constant dense<0.000000e+00> : vector<16x32xf32>
    %306 = tpu.matmul %304, %305, %cst_96 {dimension_numbers = #tpu.dot_dimension_numbers<[1], [0], [0], [1], [0, 0, 1, 1], [], []>} : vector<16x32xf32>, vector<32x32xf32>, vector<16x32xf32> -> vector<16x32xf32>
    %c839 = arith.constant 839 : index
    %c0_97 = arith.constant 0 : index
    %307 = vector.load %arg0[%c839, %c0_97] : memref<1104x128xf32, #tpu.memory_space<vmem>>, vector<1x32xf32>
    %308 = vector.broadcast %307 : vector<1x32xf32> to vector<16x32xf32>
    %309 = arith.addf %306, %308 : vector<16x32xf32>
    %c840 = arith.constant 840 : index
    %c0_98 = arith.constant 0 : index
    %310 = vector.load %arg0[%c840, %c0_98] : memref<1104x128xf32, #tpu.memory_space<vmem>>, vector<32x64xf32>
    %cst_99 = arith.constant dense<0.000000e+00> : vector<24x64xf32>
    %311 = tpu.matmul %29, %310, %cst_99 {dimension_numbers = #tpu.dot_dimension_numbers<[1], [0], [0], [1], [0, 0, 1, 1], [], []>} : vector<24x32xf32>, vector<32x64xf32>, vector<24x64xf32> -> vector<24x64xf32>
    %c872 = arith.constant 872 : index
    %c0_100 = arith.constant 0 : index
    %312 = vector.load %arg0[%c872, %c0_100] : memref<1104x128xf32, #tpu.memory_space<vmem>>, vector<1x64xf32>
    %313 = vector.broadcast %312 : vector<1x64xf32> to vector<24x64xf32>
    %314 = arith.addf %311, %313 : vector<24x64xf32>
    %315 = vector.extract_strided_slice %314 {offsets = [0, 0], sizes = [24, 32], strides = [1, 1]} : vector<24x64xf32> to vector<24x32xf32>
    %316 = vector.extract_strided_slice %314 {offsets = [0, 32], sizes = [24, 32], strides = [1, 1]} : vector<24x64xf32> to vector<24x32xf32>
    %317 = tpu.concatenate %309, %309, %309, %309, %309, %309, %309, %309 in 0 : vector<16x32xf32>, vector<16x32xf32>, vector<16x32xf32>, vector<16x32xf32>, vector<16x32xf32>, vector<16x32xf32>, vector<16x32xf32>, vector<16x32xf32> -> vector<128x32xf32>
    %318 = arith.mulf %317, %3 : vector<128x32xf32>
    %cst_101 = arith.constant dense<0.000000e+00> : vector<128x24xf32>
    %319 = tpu.matmul %318, %315, %cst_101 {dimension_numbers = #tpu.dot_dimension_numbers<[1], [1], [0], [0], [0, 0, 1, 0], [], []>} : vector<128x32xf32>, vector<24x32xf32>, vector<128x24xf32> -> vector<128x24xf32>
    %320 = arith.addf %319, %5 : vector<128x24xf32>
    %321 = vector.broadcast %36 : vector<1x24xf32> to vector<128x24xf32>
    %322 = arith.addf %320, %321 : vector<128x24xf32>
    %cst_102 = arith.constant dense<0xFF800000> : vector<128xf32>
    %323 = vector.multi_reduction <maximumf>, %322, %cst_102 [1] : vector<128x24xf32> to vector<128xf32>
    %324 = vector.shape_cast %323 : vector<128xf32> to vector<128x1xf32>
    %325 = vector.broadcast %324 : vector<128x1xf32> to vector<128x24xf32>
    %326 = arith.subf %322, %325 : vector<128x24xf32>
    %327 = math.exp %326 : vector<128x24xf32>
    %cst_103 = arith.constant dense<0.000000e+00> : vector<128xf32>
    %328 = vector.multi_reduction <add>, %327, %cst_103 [1] : vector<128x24xf32> to vector<128xf32>
    %329 = vector.shape_cast %328 : vector<128xf32> to vector<128x1xf32>
    %330 = tpu.reciprocal %329 {approx = true} : vector<128x1xf32> -> vector<128x1xf32>
    %331 = vector.broadcast %330 : vector<128x1xf32> to vector<128x24xf32>
    %332 = arith.mulf %327, %331 : vector<128x24xf32>
    %cst_104 = arith.constant dense<0.000000e+00> : vector<128x32xf32>
    %333 = tpu.matmul %332, %316, %cst_104 {dimension_numbers = #tpu.dot_dimension_numbers<[1], [0], [0], [1], [0, 0, 1, 1], [], []>} : vector<128x24xf32>, vector<24x32xf32>, vector<128x32xf32> -> vector<128x32xf32>
    %334 = arith.mulf %333, %3 : vector<128x32xf32>
    %335 = vector.extract_strided_slice %334 {offsets = [0, 0], sizes = [16, 32], strides = [1, 1]} : vector<128x32xf32> to vector<16x32xf32>
    %336 = vector.extract_strided_slice %334 {offsets = [16, 0], sizes = [16, 32], strides = [1, 1]} : vector<128x32xf32> to vector<16x32xf32>
    %337 = arith.addf %335, %336 : vector<16x32xf32>
    %338 = vector.extract_strided_slice %334 {offsets = [32, 0], sizes = [16, 32], strides = [1, 1]} : vector<128x32xf32> to vector<16x32xf32>
    %339 = arith.addf %337, %338 : vector<16x32xf32>
    %340 = vector.extract_strided_slice %334 {offsets = [48, 0], sizes = [16, 32], strides = [1, 1]} : vector<128x32xf32> to vector<16x32xf32>
    %341 = arith.addf %339, %340 : vector<16x32xf32>
    %342 = vector.extract_strided_slice %334 {offsets = [64, 0], sizes = [16, 32], strides = [1, 1]} : vector<128x32xf32> to vector<16x32xf32>
    %343 = arith.addf %341, %342 : vector<16x32xf32>
    %344 = vector.extract_strided_slice %334 {offsets = [80, 0], sizes = [16, 32], strides = [1, 1]} : vector<128x32xf32> to vector<16x32xf32>
    %345 = arith.addf %343, %344 : vector<16x32xf32>
    %346 = vector.extract_strided_slice %334 {offsets = [96, 0], sizes = [16, 32], strides = [1, 1]} : vector<128x32xf32> to vector<16x32xf32>
    %347 = arith.addf %345, %346 : vector<16x32xf32>
    %348 = vector.extract_strided_slice %334 {offsets = [112, 0], sizes = [16, 32], strides = [1, 1]} : vector<128x32xf32> to vector<16x32xf32>
    %349 = arith.addf %347, %348 : vector<16x32xf32>
    %c873 = arith.constant 873 : index
    %c0_105 = arith.constant 0 : index
    %350 = vector.load %arg0[%c873, %c0_105] : memref<1104x128xf32, #tpu.memory_space<vmem>>, vector<32x32xf32>
    %cst_106 = arith.constant dense<0.000000e+00> : vector<16x32xf32>
    %351 = tpu.matmul %349, %350, %cst_106 {dimension_numbers = #tpu.dot_dimension_numbers<[1], [0], [0], [1], [0, 0, 1, 1], [], []>} : vector<16x32xf32>, vector<32x32xf32>, vector<16x32xf32> -> vector<16x32xf32>
    %c905 = arith.constant 905 : index
    %c0_107 = arith.constant 0 : index
    %352 = vector.load %arg0[%c905, %c0_107] : memref<1104x128xf32, #tpu.memory_space<vmem>>, vector<1x32xf32>
    %353 = vector.broadcast %352 : vector<1x32xf32> to vector<16x32xf32>
    %354 = arith.addf %351, %353 : vector<16x32xf32>
    %355 = arith.addf %282, %354 : vector<16x32xf32>
    %c739 = arith.constant 739 : index
    %c0_108 = arith.constant 0 : index
    %356 = vector.load %arg0[%c739, %c0_108] : memref<1104x128xf32, #tpu.memory_space<vmem>>, vector<1x32xf32>
    %c740 = arith.constant 740 : index
    %c0_109 = arith.constant 0 : index
    %357 = vector.load %arg0[%c740, %c0_109] : memref<1104x128xf32, #tpu.memory_space<vmem>>, vector<1x32xf32>
    %cst_110 = arith.constant dense<0.000000e+00> : vector<16xf32>
    %358 = vector.multi_reduction <add>, %355, %cst_110 [1] : vector<16x32xf32> to vector<16xf32>
    %359 = vector.shape_cast %358 : vector<16xf32> to vector<16x1xf32>
    %cst_111 = arith.constant 3.200000e+01 : f32
    %360 = vector.broadcast %cst_111 : f32 to vector<16x1xf32>
    %361 = arith.divf %359, %360 : vector<16x1xf32>
    %362 = vector.broadcast %361 : vector<16x1xf32> to vector<16x32xf32>
    %363 = arith.subf %355, %362 : vector<16x32xf32>
    %364 = arith.mulf %363, %363 : vector<16x32xf32>
    %cst_112 = arith.constant dense<0.000000e+00> : vector<16xf32>
    %365 = vector.multi_reduction <add>, %364, %cst_112 [1] : vector<16x32xf32> to vector<16xf32>
    %366 = vector.shape_cast %365 : vector<16xf32> to vector<16x1xf32>
    %cst_113 = arith.constant 3.200000e+01 : f32
    %367 = vector.broadcast %cst_113 : f32 to vector<16x1xf32>
    %368 = arith.divf %366, %367 : vector<16x1xf32>
    %cst_114 = arith.constant 9.99999974E-6 : f32
    %369 = vector.broadcast %cst_114 : f32 to vector<16x1xf32>
    %370 = arith.addf %368, %369 : vector<16x1xf32>
    %371 = math.rsqrt %370 : vector<16x1xf32>
    %372 = vector.broadcast %371 : vector<16x1xf32> to vector<16x32xf32>
    %373 = arith.mulf %363, %372 : vector<16x32xf32>
    %374 = vector.broadcast %356 : vector<1x32xf32> to vector<16x32xf32>
    %375 = arith.mulf %373, %374 : vector<16x32xf32>
    %376 = vector.broadcast %357 : vector<1x32xf32> to vector<16x32xf32>
    %377 = arith.addf %375, %376 : vector<16x32xf32>
    %c906 = arith.constant 906 : index
    %c0_115 = arith.constant 0 : index
    %378 = vector.load %arg0[%c906, %c0_115] : memref<1104x128xf32, #tpu.memory_space<vmem>>, vector<32x128xf32>
    %cst_116 = arith.constant dense<0.000000e+00> : vector<16x128xf32>
    %379 = tpu.matmul %377, %378, %cst_116 {dimension_numbers = #tpu.dot_dimension_numbers<[1], [0], [0], [1], [0, 0, 1, 1], [], []>} : vector<16x32xf32>, vector<32x128xf32>, vector<16x128xf32> -> vector<16x128xf32>
    %c938 = arith.constant 938 : index
    %c0_117 = arith.constant 0 : index
    %380 = vector.load %arg0[%c938, %c0_117] : memref<1104x128xf32, #tpu.memory_space<vmem>>, vector<1x128xf32>
    %381 = vector.broadcast %380 : vector<1x128xf32> to vector<16x128xf32>
    %382 = arith.addf %379, %381 : vector<16x128xf32>
    %cst_118 = arith.constant 0.000000e+00 : f32
    %383 = vector.broadcast %cst_118 : f32 to vector<16x128xf32>
    %384 = arith.maximumf %382, %383 : vector<16x128xf32>
    %c939 = arith.constant 939 : index
    %c0_119 = arith.constant 0 : index
    %385 = vector.load %arg0[%c939, %c0_119] : memref<1104x128xf32, #tpu.memory_space<vmem>>, vector<128x32xf32>
    %cst_120 = arith.constant dense<0.000000e+00> : vector<16x32xf32>
    %386 = tpu.matmul %384, %385, %cst_120 {dimension_numbers = #tpu.dot_dimension_numbers<[1], [0], [0], [1], [0, 0, 1, 1], [], []>} : vector<16x128xf32>, vector<128x32xf32>, vector<16x32xf32> -> vector<16x32xf32>
    %387 = arith.addf %355, %386 : vector<16x32xf32>
    %c1067 = arith.constant 1067 : index
    %c0_121 = arith.constant 0 : index
    %388 = vector.load %arg0[%c1067, %c0_121] : memref<1104x128xf32, #tpu.memory_space<vmem>>, vector<1x32xf32>
    %389 = vector.broadcast %388 : vector<1x32xf32> to vector<16x32xf32>
    %390 = arith.addf %387, %389 : vector<16x32xf32>
    %c1068 = arith.constant 1068 : index
    %c0_122 = arith.constant 0 : index
    %391 = vector.load %arg0[%c1068, %c0_122] : memref<1104x128xf32, #tpu.memory_space<vmem>>, vector<1x32xf32>
    %c1069 = arith.constant 1069 : index
    %c0_123 = arith.constant 0 : index
    %392 = vector.load %arg0[%c1069, %c0_123] : memref<1104x128xf32, #tpu.memory_space<vmem>>, vector<1x32xf32>
    %cst_124 = arith.constant dense<0.000000e+00> : vector<16xf32>
    %393 = vector.multi_reduction <add>, %390, %cst_124 [1] : vector<16x32xf32> to vector<16xf32>
    %394 = vector.shape_cast %393 : vector<16xf32> to vector<16x1xf32>
    %cst_125 = arith.constant 3.200000e+01 : f32
    %395 = vector.broadcast %cst_125 : f32 to vector<16x1xf32>
    %396 = arith.divf %394, %395 : vector<16x1xf32>
    %397 = vector.broadcast %396 : vector<16x1xf32> to vector<16x32xf32>
    %398 = arith.subf %390, %397 : vector<16x32xf32>
    %399 = arith.mulf %398, %398 : vector<16x32xf32>
    %cst_126 = arith.constant dense<0.000000e+00> : vector<16xf32>
    %400 = vector.multi_reduction <add>, %399, %cst_126 [1] : vector<16x32xf32> to vector<16xf32>
    %401 = vector.shape_cast %400 : vector<16xf32> to vector<16x1xf32>
    %cst_127 = arith.constant 3.200000e+01 : f32
    %402 = vector.broadcast %cst_127 : f32 to vector<16x1xf32>
    %403 = arith.divf %401, %402 : vector<16x1xf32>
    %cst_128 = arith.constant 9.99999974E-6 : f32
    %404 = vector.broadcast %cst_128 : f32 to vector<16x1xf32>
    %405 = arith.addf %403, %404 : vector<16x1xf32>
    %406 = math.rsqrt %405 : vector<16x1xf32>
    %407 = vector.broadcast %406 : vector<16x1xf32> to vector<16x32xf32>
    %408 = arith.mulf %398, %407 : vector<16x32xf32>
    %409 = vector.broadcast %391 : vector<1x32xf32> to vector<16x32xf32>
    %410 = arith.mulf %408, %409 : vector<16x32xf32>
    %411 = vector.broadcast %392 : vector<1x32xf32> to vector<16x32xf32>
    %412 = arith.addf %410, %411 : vector<16x32xf32>
    %413 = vector.extract_strided_slice %412 {offsets = [0, 0], sizes = [8, 32], strides = [1, 1]} : vector<16x32xf32> to vector<8x32xf32>
    %cst_129 = arith.constant dense<0xFF800000> : vector<32xf32>
    %414 = vector.multi_reduction <maximumf>, %413, %cst_129 [0] : vector<8x32xf32> to vector<32xf32>
    %415 = vector.shape_cast %414 : vector<32xf32> to vector<1x32xf32>
    %416 = vector.extract_strided_slice %412 {offsets = [8, 0], sizes = [8, 32], strides = [1, 1]} : vector<16x32xf32> to vector<8x32xf32>
    %cst_130 = arith.constant dense<0xFF800000> : vector<32xf32>
    %417 = vector.multi_reduction <maximumf>, %416, %cst_130 [0] : vector<8x32xf32> to vector<32xf32>
    %418 = vector.shape_cast %417 : vector<32xf32> to vector<1x32xf32>
    %419 = tpu.concatenate %415, %418 in 0 : vector<1x32xf32>, vector<1x32xf32> -> vector<2x32xf32>
    %c1070 = arith.constant 1070 : index
    %c0_131 = arith.constant 0 : index
    %420 = vector.load %arg0[%c1070, %c0_131] : memref<1104x128xf32, #tpu.memory_space<vmem>>, vector<32x4xf32>
    %cst_132 = arith.constant dense<0.000000e+00> : vector<2x4xf32>
    %421 = tpu.matmul %419, %420, %cst_132 {dimension_numbers = #tpu.dot_dimension_numbers<[1], [0], [0], [1], [0, 0, 1, 1], [], []>} : vector<2x32xf32>, vector<32x4xf32>, vector<2x4xf32> -> vector<2x4xf32>
    %c1102 = arith.constant 1102 : index
    %c0_133 = arith.constant 0 : index
    %422 = vector.load %arg0[%c1102, %c0_133] : memref<1104x128xf32, #tpu.memory_space<vmem>>, vector<1x4xf32>
    %423 = vector.broadcast %422 : vector<1x4xf32> to vector<2x4xf32>
    %424 = arith.addf %421, %423 : vector<2x4xf32>
    %c0_134 = arith.constant 0 : index
    %c0_135 = arith.constant 0 : index
    %425 = vector.load %arg4[%c0_134, %c0_135] : memref<2x4xf32, #tpu.memory_space<vmem>>, vector<2x4xf32>
    tpu.vector_store %arg4[%c0_134, %c0_135], %424 {strides = array<i32>} : memref<2x4xf32, #tpu.memory_space<vmem>>, vector<2x4xf32>,
    return
  }
}

</mosaic_0001>

<bundles_post_ra>
// kernel: tenc_forward.1
= control target key start
LH: loop header
LB: loop body
LE: loop exit
PB: predicated region body
PF: predicated region fallthrough
CT: control target
= control target key end

     0   :  { %9 = vsyncpa [#allocation3], 0  ;;  %s7535_s0 = inlined_call_operand.hbm [shape: f32[1104,128], index: 0, kind: input, shape index: {}]   ;;  %s7536_s1 = inlined_call_operand.vmem [shape: f32[16,32], index: 1, kind: input, shape index: {}]   ;;  %s7537_s2 = inlined_call_operand.vmem [shape: f32[24,16], index: 2, kind: input, shape index: {}]   ;;  %s7538_s3 = inlined_call_operand.vmem [shape: f32[1,16], index: 3, kind: input, shape index: {}]   ;;  %s7539_s4 = inlined_call_operand.hbm [shape: f32[2,4], index: 4, kind: output, shape index: {}]  }
   0x1   :  { %10 = vsyncpa [#allocation4], 0  ;;  %s6143_s15 = smov [#allocation2]   ;;  %s6095_s19 = scalar_lea.hbm %s7535_s0, 17664 }
   0x2   :  { %s16_s16 = sshll.u32 %s6143_s15, 4  ;;  %p6096_p0 = scmp.ne.s32.totalorder %s7535_s0, %s6095_s19  ;;  %s17_s16 = int_to_ptr.vmem [resolvable:$true] %s16_s16 }
   0x3   :  { %p6099_p1 = scmp.lt.u32.totalorder %s6095_s19, %s7535_s0 }
   0x5   :  { %p6101_p2 = pnand %p6099_p1, %p6096_p0 }
   0x7   :  { %6104 = shalt.err (!%p6101_p2)
}
   0x8   :  { %s6105_s24 = scalar_lea.vmem %s17_s16, 17664  ;;  %p6110_p4 = scmp.lt.s32.totalorder %s17_s16, %s17_s16 }
   0x9   :  { %p6106_p3 = scmp.ne.s32.totalorder %s17_s16, %s6105_s24  ;;  %p6111_p5 = scmp.lt.s32.totalorder %s6105_s24, %s6105_s24 }
   0xb   :  { %p6112_p6 = por %p6111_p5, %p6110_p4 }
   0xd   :  { %p6113_p7 = pnand %p6112_p6, %p6106_p3 }
   0xf   :  { %6116 = shalt.err (!%p6113_p7)
}
  0x10   :  { %s6144_s25 = smov 128   ;;  %s6145_s26 = smov 8  }
  0x11   :  { %22 = dma.hbm_to_vmem [thread:$0]  %s7535_s0, 17664, %s17_s16, [#allocation3], %s6144_s25, %s6144_s25, %s6145_s26  }
  0x12   :  { %6139 = dma.done.wait [#allocation3], 17664  }
  0x13   :  { %6140 = vsyncadd [#allocation3], 4294949632  ;;  %vm180_vm0 = vcmask 261120   ;;  %v6192_v0 = vld [vmem:[%s7536_s1] sm:$0xff]  ;;  %v6197_v1 = vld [vmem:[%s7536_s1 + $0x8] sm:$0xff]  ;;  %v6146_v17 = vmov 0.0|0.0  }
  0x14   :  { %v275_v2 = vsel %vm180_vm0, %v6192_v0, 0.0  ;;  %v278_v3 = vsel %vm180_vm0, %v6197_v1, 0.0  ;;  %v86_v14 = vld [vmem:[#allocation2 + $0x180] sm:$0xff]  ;;  %v87_v15 = vld [vmem:[#allocation2 + $0x188] sm:$0xff]  ;;  %5480 = vmatprep.subr.bf16.mxu0 %v6146_v17  ;;  %v313_v18 = vld [vmem:[#allocation2 + $0x198] sm:$0xff]  ;;  %vm6147_vm1 = vmmov 0  }
  0x15   :  { %276 = vadd.xlane.f32.xlu0 %v275_v2  ;;  %v5481_v16 = vpack.c.bf16 %v87_v15, %v86_v14  ;;  %v314_v19 = vld [vmem:[#allocation2 + $0x1a0] sm:$0xff]  ;;  %v6148_v20 = vmov 0.0   ;;  %vm88_vm2 = vcmask 130048   ;;  %v315_v23 = vld [vmem:[#allocation2 + $0x1a8] sm:$0xff]  ;;  %v316_v24 = vld [vmem:[#allocation2 + $0x1b0] sm:$0xff]  ;;  %s6150_s13 = smov 64  }
  0x16   :  { %5014 = vmatprep.mubr.msk.f32.mxu0 %vm6147_vm1, %v6148_v20  ;;  %v34_v21 = vld [vmem:[%s7537_s2] sm:$0xff]  ;;  %v5483_v22 = vpack.c.bf16 %v314_v19, %v313_v18  ;;  %v5487_v25 = vpack.c.bf16 %v316_v24, %v315_v23  ;;  %v35_v26 = vld [vmem:[%s7537_s2 + $0x8] sm:$0xff]  ;;  %v36_v27 = vld [vmem:[%s7537_s2 + $0x10] sm:$0xff]  ;;  %s6149_s2 = smov 96   ;;  %vm1607_vm7 = vcmask 195584   ;;  %vm4441_vm8 = vcmask 1040384  }
  0x17   :  { %5482 = vmatpush3.bf16.msra.mxu0 %v5481_v16  ;;  %v4547_v35 = vld [vmem:[#allocation2 + $0x192] ss:$0 sm:$0xff]  ;;  %v4548_v37 = vld [vmem:[#allocation2 + $0x193] ss:$0 sm:$0xff]  ;;  %v4549_v50 = vld [vmem:[#allocation2 + $0x1b8] ss:$0 sm:$0xff] }
  0x18   :  { %5484 = vmatprep.subr.bf16.mxu0 %v5483_v22  ;;  %v6234_v54 = vld [vmem:[#allocation2] sm:$0xff]  ;;  %vm6244_vm3 = vmpackc.low %vm180_vm0, %vm180_vm0  ;;  %v6252_v63 = vld [vmem:[#allocation2 + $0x8] sm:$0xff]  ;;  %vm4525_vm9 = vcmask 25600  }
  0x19   :  { %279 = vadd.xlane.f32.xlu0 %v278_v3  ;;  %v6254_v2 = vld [vmem:[#allocation2 + $0x10] sm:$0xff]  ;;  %v6277_v14 = vld [vmem:[#allocation2 + $0x40] sm:$0xff]  ;;  %v6282_v18 = vld [vmem:[#allocation2 + $0x48] sm:$0xff] }
  0x1a   :  { %5015 = vmatmul.mubr.msk.f32.vlgmr.msra.gmra.mrb[0].mxu0 %vm88_vm2, %v34_v21  ;;  %v6285_v19 = vld [vmem:[#allocation2 + $0x50] sm:$0xff]  ;;  %v6290_v23 = vld [vmem:[#allocation2 + $0x58] sm:$0xff]  ;;  %v6293_v24 = vld [vmem:[#allocation2 + $0x60] sm:$0xff] }
  0x1b   :  { %5486 = vmatpush3.bf16.msra.mxu0 %v5483_v22  ;;  %5017 = vmatprep.mubr.msk.f32.mxu0 %vm6147_vm1, %v6148_v20 }
  0x1c   :  { %5488 = vmatprep.subr.bf16.mxu0 %v5487_v25 }
  0x1e   :  { %5018 = vmatmul.mubr.msk.f32.gmra.mrb[2].mxu0 %vm88_vm2, %v35_v26 }
  0x1f   :  { %5020 = vmatprep.mubr.msk.f32.mxu0 %vm6147_vm1, %v6148_v20  ;;  %5490 = vmatpush3.bf16.msra.mxu0 %v5487_v25 }
  0x22   :  { %5021 = vmatmul.mubr.msk.f32.gmra.mrb[4].mxu0 %vm88_vm2, %v36_v27  ;;  %v6298_v27 = vld [vmem:[#allocation2 + $0x68] sm:$0xff] }
  0xa2   :  { %v277_v4 = vpop.xlane.xlu0 %276 }
  0xa3   :  { %v281_v5 = vmul.f32 0.03125, %v277_v4 }
  0xa5   :  { %v283_v6 = vsub.f32 %v6192_v0, %v281_v5  ;;  %v6258_v5 = vld [vmem:[#allocation2 + $0x18] sm:$0xff] }
  0xa6   :  { %v280_v7 = vpop.xlane.xlu0 %279 }
  0xa7   :  { %v282_v8 = vmul.f32 0.03125, %v280_v7  ;;  %v285_v9 = vmul.f32 %v283_v6, %v283_v6 }
  0xa9   :  { %v284_v10 = vsub.f32 %v6197_v1, %v282_v8  ;;  %v287_v11 = vsel %vm180_vm0, %v285_v9, 0.0  ;;  %v6266_v9 = vld [vmem:[#allocation2 + $0x28] sm:$0xff] }
  0xaa   :  { %288 = vadd.xlane.f32.xlu1 %v287_v11 }
  0xab   :  { %v286_v12 = vmul.f32 %v284_v10, %v284_v10 }
  0xad   :  { %v290_v13 = vsel %vm180_vm0, %v286_v12, 0.0 }
  0xae   :  { %291 = vadd.xlane.f32.xlu1 %v290_v13  ;;  %v6274_v13 = vld [vmem:[#allocation2 + $0x38] sm:$0xff] }
  0xed   :  { %v6228_v44 = vpop.f32.mrb[0].mxu0 }
  0xee   :  { %v5016_v45 = vpop.f32.mrb[1].mxu0 }
  0xf1   :  { %v6230_v46 = vpop.f32.mrb[2].mxu0 }
  0xf2   :  { %v5019_v47 = vpop.f32.mrb[3].mxu0 }
  0xf5   :  { %v6232_v48 = vpop.f32.mrb[4].mxu0 }
  0xf6   :  { %v5022_v49 = vpop.f32.mrb[5].mxu0 }
 0x137   :  { %v289_v28 = vpop.xlane.xlu1 %288 }
 0x138   :  { %v293_v29 = vmul.f32 0.03125, %v289_v28  ;;  %v6301_v28 = vld [vmem:[#allocation2 + $0x70] sm:$0xff] }
 0x13a   :  { %v295_v30 = vadd.f32 1e-05, %v293_v29 }
 0x13b   :  { %v292_v31 = vpop.xlane.xlu1 %291 }
 0x13c   :  { %5724 = vrsqrt.f32 %v295_v30  ;;  %v294_v32 = vmul.f32 0.03125, %v292_v31  ;;  %v6306_v31 = vld [vmem:[#allocation2 + $0x78] sm:$0xff] }
 0x13e   :  { %v296_v33 = vadd.f32 1e-05, %v294_v32 }
 0x140   :  { %5726 = vrsqrt.f32 %v296_v33  ;;  %v55_v33 = vld [vmem:[#allocation2 + $0x88] sm:$0xff] }
 0x146   :  { %v5725_v34 = vpop.eup %5724 }
 0x147   :  { %v299_v36 = vmul.f32 %v5725_v34, %v283_v6  ;;  %v6261_v6 = vld [vmem:[#allocation2 + $0x20] sm:$0xff] }
 0x148   :  { %v54_v34 = vld [vmem:[#allocation2 + $0x80] sm:$0xff] }
 0x149   :  { %v305_v38 = vmul.f32 %v4547_v35, %v299_v36  ;;  %v6315_v36 = vld [vmem:[%s7538_s3] ss:$0 sm:$0xff] }
 0x14a   :  { %v5727_v39 = vpop.eup %5726 }
 0x14b   :  { %v300_v40 = vmul.f32 %v5727_v39, %v284_v10  ;;  %v311_v41 = vadd.f32 %v4548_v37, %v305_v38  ;;  %v6269_v10 = vld [vmem:[#allocation2 + $0x30] sm:$0xff] }
 0x14d   :  { %v306_v42 = vmul.f32 %v4547_v35, %v300_v40  ;;  %5031 = vmatprep.mubr.msk.f32.mxu0 %vm180_vm0, %v311_v41  ;;  %v57_v40 = vld [vmem:[#allocation2 + $0x98] sm:$0xff] }
 0x14f   :  { %v312_v43 = vadd.f32 %v4548_v37, %v306_v42 }
 0x151   :  { %5032 = vmatmul.mubr.msk.f32.vlgmr.msra.gmra.mrb[6].mxu0 %vm180_vm0, %v312_v43 }
 0x224   :  { %v5033_v51 = vpop.f32.mrb[6].mxu0 }
 0x225   :  { %v400_v52 = vadd.f32 %v5033_v51, %v4549_v50  ;;  %v394_v53 = vpop.f32.mrb[7].mxu0 }
 0x226   :  { %v395_v55 = vadd.f32 %v4549_v50, %v394_v53  ;;  %v56_v50 = vld [vmem:[#allocation2 + $0x90] sm:$0xff] }
 0x227   :  { %v404_v3 = vmul.f32 %v400_v52, %v6252_v63  ;;  %v406_v7 = vmul.f32 %v400_v52, %v6258_v5  ;;  %v408_v11 = vmul.f32 %v400_v52, %v6266_v9  ;;  %v410_v15 = vmul.f32 %v400_v52, %v6274_v13 }
 0x228   :  { %v6236_v56 = vpack.i.bf16 %v400_v52, %v395_v55  ;;  %v403_v57 = vmul.f32 %v395_v55, %v6234_v54  ;;  %v405_v4 = vmul.f32 %v395_v55, %v6254_v2  ;;  %v407_v8 = vmul.f32 %v395_v55, %v6261_v6 }
 0x229   :  { %v409_v12 = vmul.f32 %v395_v55, %v6269_v10  ;;  %v411_v16 = vmul.f32 %v395_v55, %v6277_v14  ;;  %v412_v21 = vmul.f32 %v400_v52, %v6282_v18  ;;  %v413_v22 = vmul.f32 %v395_v55, %v6285_v19 }
 0x22a   :  { %5695 = vrot.lane.b32.xlu0 %v6236_v56, %s6149_s2  ;;  %5038 = vmatprep.mubr.msk.f32.mxu0 %vm180_vm0, %v403_v57  ;;  %v414_v25 = vmul.f32 %v400_v52, %v6290_v23  ;;  %v415_v26 = vmul.f32 %v395_v55, %v6293_v24  ;;  %v416_v29 = vmul.f32 %v400_v52, %v6298_v27 }
 0x22b   :  { %v417_v30 = vmul.f32 %v395_v55, %v6301_v28  ;;  %v418_v32 = vmul.f32 %v400_v52, %v6306_v31 }
 0x29c   :  { %v5696_v58 = vpop.permute.xlu0 %5695 }
 0x29d   :  { %v5698_v59 = vunpack.i.h.bf16 %v5696_v58  ;;  %v5697_v60 = vunpack.i.l.bf16 %v5696_v58  ;;  %v59_v58 = vld [vmem:[#allocation2 + $0xa8] sm:$0xff] }
 0x29f   :  { %v5491_v62 = vpack.c.bf16 %v5698_v59, %v5697_v60  ;;  %v60_v59 = vld [vmem:[#allocation2 + $0xb0] sm:$0xff] }
 0x2a1   :  { %5493 = vmatprep.subr.msk.bf16.mxu0 %vm6244_vm3, %v5491_v62 }
 0x2a2   :  { %5496 = vmatpush3.bf16.xpose.msk.msra.mxu0 %vm6244_vm3, %v5491_v62 }
 0x2a9   :  { %5039 = vmatmul.mubr.msk.f32.vlgmr.msra.gmra.mrb[8].mxu0 %vm180_vm0, %v404_v3 }
 0x2aa   :  { %5041 = vmatprep.mubr.msk.f32.mxu0 %vm180_vm0, %v405_v4 }
 0x2ad   :  { %5042 = vmatmul.mubr.msk.f32.gmra.mrb[10].mxu0 %vm180_vm0, %v406_v7 }
 0x2ae   :  { %5044 = vmatprep.mubr.msk.f32.mxu0 %vm180_vm0, %v407_v8  ;;  %v58_v8 = vld [vmem:[#allocation2 + $0xa0] sm:$0xff] }
 0x2b1   :  { %5045 = vmatmul.mubr.msk.f32.gmra.mrb[12].mxu0 %vm180_vm0, %v408_v11 }
 0x2b2   :  { %5047 = vmatprep.mubr.msk.f32.mxu0 %vm180_vm0, %v409_v12 }
 0x2b5   :  { %5048 = vmatmul.mubr.msk.f32.gmra.mrb[14].mxu0 %vm180_vm0, %v410_v15 }
 0x2b6   :  { %5050 = vmatprep.mubr.msk.f32.mxu0 %vm180_vm0, %v411_v16 }
 0x2b9   :  { %5051 = vmatmul.mubr.msk.f32.gmra.mrb[16].mxu0 %vm180_vm0, %v412_v21 }
 0x2ba   :  { %5053 = vmatprep.mubr.msk.f32.mxu0 %vm180_vm0, %v413_v22 }
 0x2bd   :  { %5054 = vmatmul.mubr.msk.f32.gmra.mrb[18].mxu0 %vm180_vm0, %v414_v25 }
 0x2be   :  { %5056 = vmatprep.mubr.msk.f32.mxu0 %vm180_vm0, %v415_v26  ;;  %v61_v26 = vld [vmem:[#allocation2 + $0xb8] sm:$0xff] }
 0x2c1   :  { %5057 = vmatmul.mubr.msk.f32.gmra.mrb[20].mxu0 %vm180_vm0, %v416_v29 }
 0x2c2   :  { %5059 = vmatprep.mubr.msk.f32.mxu0 %vm180_vm0, %v417_v30 }
 0x2c5   :  { %5060 = vmatmul.mubr.msk.f32.gmra.mrb[22].mxu0 %vm180_vm0, %v418_v32 }
 0x37c   :  { %v5040_v35 = vpop.f32.mrb[8].mxu0 }
 0x37d   :  { %v549_v37 = vadd.f32 %v5040_v35, %v55_v33  ;;  %v543_v38 = vpop.f32.mrb[9].mxu0 }
 0x37e   :  { %v544_v39 = vadd.f32 %v543_v38, %v54_v34 }
 0x37f   :  { %v6318_v41 = vadd.f32 %v6315_v36, %v549_v37  ;;  %v63_v37 = vld [vmem:[#allocation2 + $0xc8] sm:$0xff] }
 0x380   :  { %v5043_v42 = vpop.f32.mrb[10].mxu0  ;;  %v6323_v49 = vadd.f32 %v6315_v36, %v544_v39 }
 0x381   :  { %v559_v43 = vadd.f32 %v5043_v42, %v57_v40  ;;  %v553_v45 = vpop.f32.mrb[11].mxu0  ;;  %v647_v47 = vsel %vm88_vm2, %v6318_v41, -inf }
 0x382   :  { %648 = vmax.xlane.f32.xlu1 %v647_v47  ;;  %v554_v52 = vadd.f32 %v553_v45, %v56_v50  ;;  %v644_v55 = vsel %vm88_vm2, %v6323_v49, -inf  ;;  %v62_v45 = vld [vmem:[#allocation2 + $0xc0] sm:$0xff]  ;;  %v69_v47 = vld [vmem:[#allocation2 + $0xf8] sm:$0xff] }
 0x383   :  { %v6328_v57 = vadd.f32 %v6315_v36, %v559_v43 }
 0x384   :  { %v5046_v51 = vpop.f32.mrb[12].mxu0  ;;  %v6333_v7 = vadd.f32 %v6315_v36, %v554_v52 }
 0x385   :  { %v563_v53 = vpop.f32.mrb[13].mxu0  ;;  %v569_v62 = vadd.f32 %v5046_v51, %v59_v58  ;;  %v653_v4 = vsel %vm88_vm2, %v6328_v57, -inf }
 0x386   :  { %645 = vmax.xlane.f32.xlu1 %v644_v55  ;;  %v564_v16 = vadd.f32 %v563_v53, %v58_v8  ;;  %v650_v22 = vsel %vm88_vm2, %v6333_v7, -inf }
 0x387   :  { %v6341_v25 = vadd.f32 %v6315_v36, %v569_v62 }
 0x388   :  { %v5049_v60 = vpop.f32.mrb[14].mxu0  ;;  %v6348_v35 = vadd.f32 %v6315_v36, %v564_v16 }
 0x389   :  { %v573_v3 = vpop.f32.mrb[15].mxu0  ;;  %v579_v32 = vadd.f32 %v5049_v60, %v61_v26  ;;  %v659_v34 = vsel %vm88_vm2, %v6341_v25, -inf }
 0x38a   :  { %v574_v11 = vadd.f32 %v573_v3, %v60_v59  ;;  %654 = vmax.xlane.f32.xlu1 %v653_v4  ;;  %v656_v42 = vsel %vm88_vm2, %v6348_v35, -inf  ;;  %v65_v59 = vld [vmem:[#allocation2 + $0xd8] sm:$0xff] }
 0x38b   :  { %v6353_v43 = vadd.f32 %v6315_v36, %v579_v32  ;;  %v66_v32 = vld [vmem:[#allocation2 + $0xe0] sm:$0xff] }
 0x38c   :  { %v5052_v12 = vpop.f32.mrb[16].mxu0  ;;  %v6336_v15 = vadd.f32 %v6315_v36, %v574_v11  ;;  %v64_v11 = vld [vmem:[#allocation2 + $0xd0] sm:$0xff] }
 0x38d   :  { %v583_v21 = vpop.f32.mrb[17].mxu0  ;;  %v589_v39 = vadd.f32 %v5052_v12, %v63_v37  ;;  %v665_v55 = vsel %vm88_vm2, %v6353_v43, -inf }
 0x38e   :  { %651 = vmax.xlane.f32.xlu1 %v650_v22  ;;  %v662_v29 = vsel %vm88_vm2, %v6336_v15, -inf  ;;  %v584_v51 = vadd.f32 %v583_v21, %v62_v45  ;;  %v67_v22 = vld [vmem:[#allocation2 + $0xe8] sm:$0xff] }
 0x38f   :  { %663 = vmax.xlane.f32.xlu0 %v662_v29  ;;  %v6358_v58 = vadd.f32 %v6315_v36, %v589_v39  ;;  %v68_v39 = vld [vmem:[#allocation2 + $0xf0] sm:$0xff] }
 0x390   :  { %v5055_v30 = vpop.f32.mrb[18].mxu0  ;;  %v6368_v8 = vadd.f32 %v6315_v36, %v584_v51 }
 0x391   :  { %v593_v33 = vpop.f32.mrb[19].mxu0  ;;  %v599_v62 = vadd.f32 %v5055_v30, %v65_v59  ;;  %v671_v4 = vsel %vm88_vm2, %v6358_v58, -inf }
 0x392   :  { %660 = vmax.xlane.f32.xlu1 %v659_v34  ;;  %v594_v12 = vadd.f32 %v593_v33, %v64_v11  ;;  %v668_v16 = vsel %vm88_vm2, %v6368_v8, -inf }
 0x393   :  { %v6373_v21 = vadd.f32 %v6315_v36, %v599_v62 }
 0x394   :  { %v5058_v38 = vpop.f32.mrb[20].mxu0  ;;  %v6378_v30 = vadd.f32 %v6315_v36, %v594_v12 }
 0x395   :  { %v603_v40 = vpop.f32.mrb[21].mxu0  ;;  %v609_v26 = vadd.f32 %v5058_v38, %v67_v22  ;;  %v677_v29 = vsel %vm88_vm2, %v6373_v21, -inf }
 0x396   :  { %657 = vmax.xlane.f32.xlu1 %v656_v42  ;;  %v604_v34 = vadd.f32 %v603_v40, %v66_v32  ;;  %v674_v33 = vsel %vm88_vm2, %v6378_v30, -inf }
 0x397   :  { %v6383_v37 = vadd.f32 %v6315_v36, %v609_v26 }
 0x398   :  { %v5061_v50 = vpop.f32.mrb[22].mxu0  ;;  %v6388_v45 = vadd.f32 %v6315_v36, %v604_v34 }
 0x399   :  { %v619_v52 = vadd.f32 %v5061_v50, %v69_v47  ;;  %v613_v53 = vpop.f32.mrb[23].mxu0  ;;  %v683_v38 = vsel %vm88_vm2, %v6383_v37, -inf }
 0x39a   :  { %666 = vmax.xlane.f32.xlu1 %v665_v55  ;;  %v614_v42 = vadd.f32 %v613_v53, %v68_v39  ;;  %v680_v47 = vsel %vm88_vm2, %v6388_v45, -inf }
 0x39b   :  { %v6361_v60 = vadd.f32 %v6315_v36, %v619_v52 }
 0x39c   :  { %v6393_v40 = vadd.f32 %v6315_v36, %v614_v42 }
 0x39d   :  { %v689_v3 = vsel %vm88_vm2, %v6361_v60, -inf }
 0x39e   :  { %690 = vmax.xlane.f32.xlu0 %v689_v3  ;;  %672 = vmax.xlane.f32.xlu1 %v671_v4  ;;  %v686_v50 = vsel %vm88_vm2, %v6393_v40, -inf }
 0x3a2   :  { %669 = vmax.xlane.f32.xlu1 %v668_v16 }
 0x3a6   :  { %678 = vmax.xlane.f32.xlu1 %v677_v29 }
 0x3aa   :  { %675 = vmax.xlane.f32.xlu1 %v674_v33 }
 0x3ae   :  { %684 = vmax.xlane.f32.xlu1 %v683_v38 }
 0x3b2   :  { %681 = vmax.xlane.f32.xlu1 %v680_v47 }
 0x3b6   :  { %687 = vmax.xlane.f32.xlu1 %v686_v50 }
 0x40f   :  { %v649_v51 = vpop.xlane.xlu1 %648 }
 0x410   :  { %v693_v52 = vsub.f32 %v6318_v41, %v649_v51 }
 0x412   :  { %v710_v53 = vmul.f32 1.442695, %v693_v52 }
 0x413   :  { %v646_v55 = vpop.xlane.xlu1 %645 }
 0x414   :  { %5728 = vpow2.f32 %v710_v53  ;;  %v692_v59 = vsub.f32 %v6323_v49, %v646_v55 }
 0x416   :  { %v708_v62 = vmul.f32 1.442695, %v692_v59 }
 0x417   :  { %v655_v3 = vpop.xlane.xlu1 %654 }
 0x418   :  { %5730 = vpow2.f32 %v708_v62  ;;  %v695_v4 = vsub.f32 %v6328_v57, %v655_v3 }
 0x41a   :  { %v714_v36 = vmul.f32 1.442695, %v695_v4 }
 0x41b   :  { %v652_v11 = vpop.xlane.xlu1 %651 }
 0x41c   :  { %5732 = vpow2.f32 %v714_v36  ;;  %v694_v12 = vsub.f32 %v6333_v7, %v652_v11  ;;  %v664_v26 = vpop.xlane.xlu0 %663 }
 0x41d   :  { %v698_v57 = vsub.f32 %v6336_v15, %v664_v26 }
 0x41e   :  { %v6401_v16 = vpop.eup %5728  ;;  %v712_v22 = vmul.f32 1.442695, %v694_v12 }
 0x41f   :  { %v661_v41 = vpop.xlane.xlu1 %660  ;;  %v743_v29 = vsel %vm88_vm2, %v6401_v16, 0.0  ;;  %v720_v38 = vmul.f32 1.442695, %v698_v57 }
 0x420   :  { %5734 = vpow2.f32 %v712_v22  ;;  %v697_v49 = vsub.f32 %v6341_v25, %v661_v41  ;;  %744 = vadd.xlane.f32.xlu0 %v743_v29 }
 0x422   :  { %v6406_v32 = vpop.eup %5730  ;;  %v718_v34 = vmul.f32 1.442695, %v697_v49 }
 0x423   :  { %v658_v33 = vpop.xlane.xlu1 %657  ;;  %v740_v7 = vsel %vm88_vm2, %v6406_v32, 0.0 }
 0x424   :  { %5736 = vpow2.f32 %v718_v34  ;;  %v696_v39 = vsub.f32 %v6348_v35, %v658_v33  ;;  %741 = vadd.xlane.f32.xlu1 %v740_v7 }
 0x426   :  { %v6412_v42 = vpop.eup %5732  ;;  %v716_v47 = vmul.f32 1.442695, %v696_v39 }
 0x427   :  { %v667_v50 = vpop.xlane.xlu1 %666  ;;  %v749_v25 = vsel %vm88_vm2, %v6412_v42, 0.0 }
 0x428   :  { %5738 = vpow2.f32 %v716_v47  ;;  %v699_v15 = vsub.f32 %v6353_v43, %v667_v50  ;;  %750 = vadd.xlane.f32.xlu0 %v749_v25 }
 0x429   :  { %5740 = vpow2.f32 %v720_v38 }
 0x42a   :  { %v6417_v51 = vpop.eup %5734  ;;  %v722_v52 = vmul.f32 1.442695, %v699_v15 }
 0x42b   :  { %v673_v53 = vpop.xlane.xlu1 %672  ;;  %v746_v35 = vsel %vm88_vm2, %v6417_v51, 0.0  ;;  %v691_v25 = vpop.xlane.xlu0 %690 }
 0x42c   :  { %5742 = vpow2.f32 %v722_v52  ;;  %v701_v55 = vsub.f32 %v6358_v58, %v673_v53  ;;  %747 = vadd.xlane.f32.xlu1 %v746_v35 }
 0x42e   :  { %v6422_v59 = vpop.eup %5736  ;;  %v726_v62 = vmul.f32 1.442695, %v701_v55 }
 0x42f   :  { %v670_v3 = vpop.xlane.xlu1 %669  ;;  %v755_v43 = vsel %vm88_vm2, %v6422_v59, 0.0 }
 0x430   :  { %v700_v4 = vsub.f32 %v6368_v8, %v670_v3  ;;  %756 = vadd.xlane.f32.xlu0 %v755_v43  ;;  %5744 = vpow2.f32 %v726_v62 }
 0x432   :  { %v6427_v36 = vpop.eup %5738  ;;  %v724_v11 = vmul.f32 1.442695, %v700_v4 }
 0x433   :  { %v679_v12 = vpop.xlane.xlu1 %678  ;;  %v752_v22 = vsel %vm88_vm2, %v6427_v36, 0.0  ;;  %v6431_v58 = vpop.eup %5740 }
 0x434   :  { %5746 = vpow2.f32 %v724_v11  ;;  %v703_v26 = vsub.f32 %v6373_v21, %v679_v12  ;;  %753 = vadd.xlane.f32.xlu1 %v752_v22  ;;  %v758_v8 = vsel %vm88_vm2, %v6431_v58, 0.0 }
 0x436   :  { %v6434_v41 = vpop.eup %5742  ;;  %v730_v29 = vmul.f32 1.442695, %v703_v26 }
 0x437   :  { %v676_v49 = vpop.xlane.xlu1 %675  ;;  %v761_v57 = vsel %vm88_vm2, %v6434_v41, 0.0 }
 0x438   :  { %5748 = vpow2.f32 %v730_v29  ;;  %v702_v34 = vsub.f32 %v6378_v30, %v676_v49  ;;  %759 = vadd.xlane.f32.xlu1 %v758_v8  ;;  %762 = vadd.xlane.f32.xlu0 %v761_v57  ;;  %v181_v57 = vsel %vm180_vm0, %v6228_v44, 0.0 }
 0x43a   :  { %v728_v33 = vmul.f32 1.442695, %v702_v34  ;;  %v6441_v7 = vpop.eup %5744  ;;  %v187_v34 = vsel %vm180_vm0, %v6232_v48, 0.0 }
 0x43b   :  { %v685_v21 = vpop.xlane.xlu1 %684  ;;  %v767_v38 = vsel %vm88_vm2, %v6441_v7, 0.0 }
 0x43c   :  { %5750 = vpow2.f32 %v728_v33  ;;  %v705_v39 = vsub.f32 %v6383_v37, %v685_v21  ;;  %768 = vadd.xlane.f32.xlu0 %v767_v38  ;;  %v707_v37 = vsub.f32 %v6361_v60, %v691_v25  ;;  %v184_v33 = vsel %vm180_vm0, %v6230_v46, 0.0 }
 0x43e   :  { %v6446_v47 = vpop.eup %5746  ;;  %v734_v50 = vmul.f32 1.442695, %v705_v39  ;;  %v738_v4 = vmul.f32 1.442695, %v707_v37 }
 0x43f   :  { %v682_v15 = vpop.xlane.xlu1 %681  ;;  %v764_v30 = vsel %vm88_vm2, %v6446_v47, 0.0 }
 0x440   :  { %5752 = vpow2.f32 %v734_v50  ;;  %v704_v52 = vsub.f32 %v6388_v45, %v682_v15  ;;  %765 = vadd.xlane.f32.xlu1 %v764_v30 }
 0x442   :  { %v6451_v53 = vpop.eup %5748  ;;  %v732_v35 = vmul.f32 1.442695, %v704_v52 }
 0x443   :  { %v688_v55 = vpop.xlane.xlu1 %687  ;;  %v773_v62 = vsel %vm88_vm2, %v6451_v53, 0.0 }
 0x444   :  { %5754 = vpow2.f32 %v732_v35  ;;  %v706_v3 = vsub.f32 %v6393_v40, %v688_v55  ;;  %774 = vadd.xlane.f32.xlu0 %v773_v62 }
 0x446   :  { %v6457_v43 = vpop.eup %5750  ;;  %v736_v11 = vmul.f32 1.442695, %v706_v3 }
 0x447   :  { %v770_v45 = vsel %vm88_vm2, %v6457_v43, 0.0 }
 0x448   :  { %5756 = vpow2.f32 %v736_v11  ;;  %771 = vadd.xlane.f32.xlu1 %v770_v45 }
 0x449   :  { %5758 = vpow2.f32 %v738_v4 }
 0x44a   :  { %v6461_v12 = vpop.eup %5752 }
 0x44b   :  { %v779_v60 = vsel %vm88_vm2, %v6461_v12, 0.0 }
 0x44c   :  { %780 = vadd.xlane.f32.xlu0 %v779_v60 }
 0x44e   :  { %v6465_v22 = vpop.eup %5754 }
 0x44f   :  { %v776_v40 = vsel %vm88_vm2, %v6465_v22, 0.0 }
 0x450   :  { %777 = vadd.xlane.f32.xlu0 %v776_v40 }
 0x452   :  { %v6469_v26 = vpop.eup %5756 }
 0x453   :  { %v782_v29 = vsel %vm88_vm2, %v6469_v26, 0.0  ;;  %v6473_v49 = vpop.eup %5758 }
 0x454   :  { %783 = vadd.xlane.f32.xlu0 %v782_v29  ;;  %v785_v8 = vsel %vm88_vm2, %v6473_v49, 0.0 }
 0x458   :  { %786 = vadd.xlane.f32.xlu0 %v785_v8 }
 0x459   :  { %5700 = vrot.lane.b32.xlu1 %v6236_v56, %s6150_s13 }
 0x45c   :  { %182 = vadd.xlane.f32.xlu0 %v181_v57 }
 0x460   :  { %188 = vadd.xlane.f32.xlu0 %v187_v34 }
 0x47d   :  { %185 = vadd.xlane.f32.xlu1 %v184_v33 }
 0x4ad   :  { %v745_v56 = vpop.xlane.xlu0 %744 }
 0x4b1   :  { %v742_v21 = vpop.xlane.xlu1 %741 }
 0x4b2   :  { %5760 = vrcp.f32 %v742_v21 }
 0x4b3   :  { %5762 = vrcp.f32 %v745_v56 }
 0x4b5   :  { %v751_v25 = vpop.xlane.xlu0 %750 }
 0x4b9   :  { %v748_v50 = vpop.xlane.xlu1 %747 }
 0x4ba   :  { %5764 = vrcp.f32 %v748_v50 }
 0x4bb   :  { %5766 = vrcp.f32 %v751_v25 }
 0x4bc   :  { %v5761_v39 = vpop.eup %5760 }
 0x4bd   :  { %v804_v38 = vmul.f32 %v5761_v39, %v6406_v32  ;;  %v757_v30 = vpop.xlane.xlu0 %756  ;;  %v5763_v40 = vpop.eup %5762 }
 0x4be   :  { %v805_v57 = vmul.f32 %v5763_v40, %v6401_v16  ;;  %v1052_v40 = vld [vmem:[#allocation2 + $0x1d1] sm:$0xff] }
 0x4bf   :  { %5066 = vmatprep.mubr.msk.f32.mxu1 %vm88_vm2, %v804_v38 }
 0x4c1   :  { %v754_v15 = vpop.xlane.xlu1 %753 }
 0x4c2   :  { %5768 = vrcp.f32 %v754_v15 }
 0x4c3   :  { %5770 = vrcp.f32 %v757_v30 }
 0x4c4   :  { %v5765_v29 = vpop.eup %5764 }
 0x4c5   :  { %v763_v52 = vpop.xlane.xlu0 %762  ;;  %v760_v37 = vpop.xlane.xlu1 %759  ;;  %v806_v33 = vmul.f32 %v5765_v29, %v6417_v51 }
 0x4c6   :  { %5772 = vrcp.f32 %v760_v37  ;;  %v5767_v34 = vpop.eup %5766 }
 0x4c7   :  { %5774 = vrcp.f32 %v763_v52  ;;  %v807_v39 = vmul.f32 %v5767_v34, %v6412_v42 }
 0x4c9   :  { %v769_v55 = vpop.xlane.xlu0 %768 }
 0x4cc   :  { %v5769_v21 = vpop.eup %5768 }
 0x4cd   :  { %v766_v35 = vpop.xlane.xlu1 %765  ;;  %v5771_v38 = vpop.eup %5770  ;;  %v808_v56 = vmul.f32 %v5769_v21, %v6427_v36 }
 0x4ce   :  { %5776 = vrcp.f32 %v766_v35  ;;  %v809_v16 = vmul.f32 %v5771_v38, %v6422_v59 }
 0x4cf   :  { %5778 = vrcp.f32 %v769_v55 }
 0x4d0   :  { %v5773_v50 = vpop.eup %5772 }
 0x4d1   :  { %v775_v3 = vpop.xlane.xlu0 %774  ;;  %v5775_v51 = vpop.eup %5774  ;;  %v810_v15 = vmul.f32 %v5773_v50, %v6431_v58 }
 0x4d2   :  { %v811_v36 = vmul.f32 %v5775_v51, %v6434_v41 }
 0x4d5   :  { %v772_v62 = vpop.xlane.xlu1 %771 }
 0x4d6   :  { %5780 = vrcp.f32 %v772_v62 }
 0x4d7   :  { %5782 = vrcp.f32 %v775_v3 }
 0x4d8   :  { %v5777_v30 = vpop.eup %5776 }
 0x4d9   :  { %v5701_v4 = vpop.permute.xlu1 %5700  ;;  %v781_v11 = vpop.xlane.xlu0 %780  ;;  %v812_v37 = vmul.f32 %v5777_v30, %v6446_v47 }
 0x4da   :  { %v5703_v32 = vunpack.i.h.bf16 %v5701_v4  ;;  %v5702_v45 = vunpack.i.l.bf16 %v5701_v4  ;;  %v5779_v52 = vpop.eup %5778 }
 0x4db   :  { %v813_v59 = vmul.f32 %v5779_v52, %v6441_v7 }
 0x4dc   :  { %v5497_v60 = vpack.c.bf16 %v5703_v32, %v5702_v45 }
 0x4dd   :  { %v778_v8 = vpop.xlane.xlu0 %777 }
 0x4de   :  { %5498 = vmatprep.subr.bf16.mxu1 %v5497_v60  ;;  %5784 = vrcp.f32 %v778_v8 }
 0x4df   :  { %5500 = vmatpush3.bf16.msra.mxu1 %v5497_v60  ;;  %5786 = vrcp.f32 %v781_v11  ;;  %v1051_v60 = vld [vmem:[#allocation2 + $0x1c9] sm:$0xff] }
 0x4e0   :  { %v5781_v35 = vpop.eup %5780  ;;  %v5505_v29 = vpack.c.bf16 %v1052_v40, %v1051_v60 }
 0x4e1   :  { %v784_v25 = vpop.xlane.xlu0 %783  ;;  %v5783_v58 = vpop.eup %5782  ;;  %v814_v55 = vmul.f32 %v5781_v35, %v6457_v43 }
 0x4e2   :  { %5067 = vmatmul.mubr.msk.f32.vlgmr.msra.gmra.mrb[0].mxu1 %vm88_vm2, %v805_v57  ;;  %5788 = vrcp.f32 %v784_v25  ;;  %v815_v41 = vmul.f32 %v5783_v58, %v6451_v53  ;;  %v1049_v53 = vld [vmem:[#allocation2 + $0x1b9] sm:$0xff] }
 0x4e3   :  { %5069 = vmatprep.mubr.msk.f32.mxu1 %vm88_vm2, %v806_v33 }
 0x4e5   :  { %v787_v42 = vpop.xlane.xlu0 %786 }
 0x4e6   :  { %5070 = vmatmul.mubr.msk.f32.gmra.mrb[2].mxu1 %vm88_vm2, %v807_v39  ;;  %5790 = vrcp.f32 %v787_v42 }
 0x4e7   :  { %5072 = vmatprep.mubr.msk.f32.mxu1 %vm88_vm2, %v808_v56 }
 0x4e8   :  { %v5785_v62 = vpop.eup %5784 }
 0x4e9   :  { %v5787_v3 = vpop.eup %5786  ;;  %v816_v47 = vmul.f32 %v5785_v62, %v6465_v22  ;;  %v1050_v22 = vld [vmem:[#allocation2 + $0x1c1] sm:$0xff] }
 0x4ea   :  { %5073 = vmatmul.mubr.msk.f32.gmra.mrb[4].mxu1 %vm88_vm2, %v809_v16  ;;  %v817_v7 = vmul.f32 %v5787_v3, %v6461_v12  ;;  %v5501_v45 = vpack.c.bf16 %v1050_v22, %v1049_v53 }
 0x4eb   :  { %5075 = vmatprep.mubr.msk.f32.mxu1 %vm88_vm2, %v810_v15 }
 0x4ec   :  { %v5789_v4 = vpop.eup %5788  ;;  %5502 = vmatprep.subr.bf16.mxu1 %v5501_v45 }
 0x4ed   :  { %v818_v43 = vmul.f32 %v5789_v4, %v6469_v26  ;;  %5504 = vmatpush3.bf16.msra.mxu1 %v5501_v45 }
 0x4ee   :  { %5076 = vmatmul.mubr.msk.f32.gmra.mrb[6].mxu1 %vm88_vm2, %v811_v36  ;;  %5506 = vmatprep.subr.bf16.mxu1 %v5505_v29 }
 0x4ef   :  { %5078 = vmatprep.mubr.msk.f32.mxu1 %vm88_vm2, %v812_v37 }
 0x4f0   :  { %v5791_v11 = vpop.eup %5790 }
 0x4f1   :  { %v819_v32 = vmul.f32 %v5791_v11, %v6473_v49  ;;  %5508 = vmatpush3.bf16.msra.mxu1 %v5505_v29 }
 0x4f2   :  { %5079 = vmatmul.mubr.msk.f32.gmra.mrb[8].mxu1 %vm88_vm2, %v813_v59  ;;  %5517 = vmatprep.subr.bf16.mxu1 %v6146_v17 }
 0x4f3   :  { %5081 = vmatprep.mubr.msk.f32.mxu1 %vm88_vm2, %v814_v55 }
 0x4f6   :  { %5082 = vmatmul.mubr.msk.f32.gmra.mrb[10].mxu1 %vm88_vm2, %v815_v41 }
 0x4f7   :  { %5084 = vmatprep.mubr.msk.f32.mxu1 %vm88_vm2, %v816_v47 }
 0x4fa   :  { %5085 = vmatmul.mubr.msk.f32.gmra.mrb[12].mxu1 %vm88_vm2, %v817_v7 }
 0x4fb   :  { %5087 = vmatprep.mubr.msk.f32.mxu1 %vm88_vm2, %v818_v43 }
 0x4fe   :  { %5088 = vmatmul.mubr.msk.f32.gmra.mrb[14].mxu1 %vm88_vm2, %v819_v32 }
 0x5b5   :  { %v5068_v12 = vpop.f32.mrb[0].mxu1 }
 0x5b6   :  { %v940_v26 = vpop.f32.mrb[1].mxu1  ;;  %v1020_v57 = vmul.f32 %v5068_v12, %v6252_v63 }
 0x5b7   :  { %v1019_v33 = vmul.f32 %v940_v26, %v6234_v54 }
 0x5b9   :  { %v5071_v8 = vpop.f32.mrb[2].mxu1 }
 0x5ba   :  { %v1022_v49 = vmul.f32 %v5071_v8, %v6258_v5  ;;  %v950_v34 = vpop.f32.mrb[3].mxu1 }
 0x5bb   :  { %v1021_v21 = vmul.f32 %v950_v34, %v6254_v2 }
 0x5bc   :  { %v1036_v39 = vadd.f32 %v1022_v49, %v1020_v57 }
 0x5bd   :  { %v1035_v38 = vadd.f32 %v1021_v21, %v1019_v33  ;;  %v5074_v56 = vpop.f32.mrb[4].mxu1 }
 0x5be   :  { %v1024_v50 = vmul.f32 %v5074_v56, %v6266_v9  ;;  %v960_v25 = vpop.f32.mrb[5].mxu1 }
 0x5bf   :  { %v1023_v16 = vmul.f32 %v960_v25, %v6261_v6  ;;  %v1273_v25 = vld [vmem:[#allocation2 + $0x20b] sm:$0xff] }
 0x5c0   :  { %v1038_v51 = vadd.f32 %v1036_v39, %v1024_v50  ;;  %v1271_v50 = vld [vmem:[#allocation2 + $0x1fb] sm:$0xff] }
 0x5c1   :  { %v1037_v15 = vadd.f32 %v1035_v38, %v1023_v16  ;;  %v5077_v30 = vpop.f32.mrb[6].mxu1 }
 0x5c2   :  { %v1026_v63 = vmul.f32 %v5077_v30, %v6274_v13  ;;  %v970_v42 = vpop.f32.mrb[7].mxu1  ;;  %v1182_v30 = vld [vmem:[#allocation2 + $0x1e2] sm:$0xff] }
 0x5c3   :  { %v1025_v5 = vmul.f32 %v970_v42, %v6269_v10 }
 0x5c4   :  { %v1040_v36 = vadd.f32 %v1038_v51, %v1026_v63  ;;  %v1274_v51 = vld [vmem:[#allocation2 + $0x213] sm:$0xff] }
 0x5c5   :  { %v1039_v54 = vadd.f32 %v1037_v15, %v1025_v5  ;;  %v5080_v52 = vpop.f32.mrb[8].mxu1  ;;  %v5521_v15 = vpack.c.bf16 %v1274_v51, %v1273_v25 }
 0x5c6   :  { %v1028_v2 = vmul.f32 %v5080_v52, %v6282_v18  ;;  %v980_v37 = vpop.f32.mrb[9].mxu1 }
 0x5c7   :  { %v1027_v35 = vmul.f32 %v980_v37, %v6277_v14 }
 0x5c8   :  { %v1042_v9 = vadd.f32 %v1040_v36, %v1028_v2 }
 0x5c9   :  { %v1041_v59 = vadd.f32 %v1039_v54, %v1027_v35  ;;  %v5083_v58 = vpop.f32.mrb[10].mxu1 }
 0x5ca   :  { %v1030_v6 = vmul.f32 %v5083_v58, %v6290_v23  ;;  %v990_v55 = vpop.f32.mrb[11].mxu1 }
 0x5cb   :  { %v1029_v62 = vmul.f32 %v990_v55, %v6285_v19  ;;  %v183_v19 = vpop.xlane.xlu0 %182 }
 0x5cc   :  { %v1044_v13 = vadd.f32 %v1042_v9, %v1030_v6  ;;  %v191_v45 = vmul.f32 0.03125, %v183_v19 }
 0x5cd   :  { %v1043_v41 = vadd.f32 %v1041_v59, %v1029_v62  ;;  %v5086_v3 = vpop.f32.mrb[12].mxu1 }
 0x5ce   :  { %v1032_v10 = vmul.f32 %v5086_v3, %v6298_v27  ;;  %v1000_v47 = vpop.f32.mrb[13].mxu1  ;;  %v4587_v27 = vld [vmem:[#allocation2 + $0x1d9] ss:$0 sm:$0xff] }
 0x5cf   :  { %v1031_v4 = vmul.f32 %v1000_v47, %v6293_v24  ;;  %v189_v57 = vpop.xlane.xlu0 %188 }
 0x5d0   :  { %v1046_v18 = vadd.f32 %v1044_v13, %v1032_v10  ;;  %v193_v49 = vmul.f32 0.03125, %v189_v57 }
 0x5d1   :  { %v1045_v7 = vadd.f32 %v1043_v41, %v1031_v4  ;;  %v5089_v11 = vpop.f32.mrb[14].mxu1 }
 0x5d2   :  { %v1034_v14 = vmul.f32 %v5089_v11, %v6306_v31  ;;  %v1010_v43 = vpop.f32.mrb[15].mxu1  ;;  %v186_v31 = vpop.xlane.xlu1 %185  ;;  %v4546_v11 = vld [vmem:[#allocation2 + $0x191] ss:$0 sm:$0xff] }
 0x5d3   :  { %v1033_v32 = vmul.f32 %v1010_v43, %v6301_v28  ;;  %v194_v28 = vsub.f32 %v6228_v44, %v191_v45  ;;  %v192_v12 = vmul.f32 0.03125, %v186_v31 }
 0x5d4   :  { %v1048_v23 = vadd.f32 %v1046_v18, %v1034_v14  ;;  %v4545_v18 = vld [vmem:[#allocation2 + $0x190] ss:$0 sm:$0xff] }
 0x5d5   :  { %v1047_v53 = vadd.f32 %v1045_v7, %v1033_v32  ;;  %v195_v34 = vsub.f32 %v6230_v46, %v192_v12  ;;  %v197_v21 = vmul.f32 %v194_v28, %v194_v28  ;;  %v1272_v46 = vld [vmem:[#allocation2 + $0x203] sm:$0xff] }
 0x5d6   :  { %v5518_v16 = vpack.c.bf16 %v1272_v46, %v1271_v50 }
 0x5d7   :  { %5098 = vmatprep.mubr.msk.f32.mxu1 %vm180_vm0, %v1047_v53  ;;  %v200_v44 = vsel %vm180_vm0, %v197_v21, 0.0  ;;  %v198_v39 = vmul.f32 %v195_v34, %v195_v34 }
 0x5d8   :  { %5099 = vmatmul.mubr.msk.f32.vlgmr.msra.gmra.mrb[16].mxu1 %vm180_vm0, %v1048_v23 }
 0x5d9   :  { %5120 = vmatprep.mubr.msk.f32.mxu1 %vm6147_vm1, %v6148_v20  ;;  %5519 = vmatpush3.bf16.msra.mxu1 %v5518_v16 }
 0x5da   :  { %5520 = vmatprep.subr.bf16.mxu1 %v6146_v17 }
 0x5dd   :  { %5522 = vmatpush3.bf16.msra.mxu1 %v5521_v15 }
 0x6ab   :  { %v5100_v24 = vpop.f32.mrb[16].mxu1 }
 0x6ac   :  { %v1130_v22 = vpop.f32.mrb[17].mxu1  ;;  %v1136_v60 = vadd.f32 %v5100_v24, %v4587_v27 }
 0x6ad   :  { %v1131_v40 = vadd.f32 %v4587_v27, %v1130_v22 }
 0x6ae   :  { %v6543_v26 = vadd.f32 %v1136_v60, %v6197_v1  ;;  %v203_v1 = vsel %vm180_vm0, %v198_v39, 0.0  ;;  %v1183_v60 = vld [vmem:[#allocation2 + $0x1ea] sm:$0xff]  ;;  %v4590_v39 = vld [vmem:[#allocation2 + $0x194] ss:$0 sm:$0xff] }
 0x6af   :  { %v6539_v29 = vadd.f32 %v1131_v40, %v6192_v0  ;;  %v196_v0 = vsub.f32 %v6232_v48, %v193_v49  ;;  %v1181_v48 = vld [vmem:[#allocation2 + $0x1da] sm:$0xff]  ;;  %v1184_v40 = vld [vmem:[#allocation2 + $0x1f2] sm:$0xff] }
 0x6b0   :  { %v1146_v33 = vsel %vm180_vm0, %v6543_v26, 0.0  ;;  %v5509_v63 = vpack.c.bf16 %v1182_v30, %v1181_v48  ;;  %v5513_v31 = vpack.c.bf16 %v1184_v40, %v1183_v60  ;;  %v4595_v30 = vld [vmem:[#allocation2 + $0x21b] ss:$0 sm:$0xff]  ;;  %v6647_v40 = vld [vmem:[#allocation2 + $0x48] sm:$0xff] }
 0x6b1   :  { %v1143_v8 = vsel %vm180_vm0, %v6539_v29, 0.0  ;;  %v199_v38 = vmul.f32 %v196_v0, %v196_v0 }
 0x6b2   :  { %1144 = vadd.xlane.f32.xlu0 %v1143_v8  ;;  %5510 = vmatprep.subr.bf16.mxu0 %v5509_v63 }
 0x6b3   :  { %v206_v56 = vsel %vm180_vm0, %v199_v38, 0.0  ;;  %5512 = vmatpush3.bf16.msra.mxu0 %v5509_v63  ;;  %v4591_v38 = vld [vmem:[#allocation2 + $0x195] ss:$0 sm:$0xff] }
 0x6b4   :  { %5514 = vmatprep.subr.bf16.mxu0 %v5513_v31 }
 0x6b6   :  { %1147 = vadd.xlane.f32.xlu0 %v1146_v33 }
 0x6b7   :  { %5516 = vmatpush3.bf16.msra.mxu0 %v5513_v31 }
 0x6ba   :  { %201 = vadd.xlane.f32.xlu0 %v200_v44 }
 0x6be   :  { %204 = vadd.xlane.f32.xlu0 %v203_v1 }
 0x6c2   :  { %207 = vadd.xlane.f32.xlu0 %v206_v56 }
 0x73f   :  { %v1145_v42 = vpop.xlane.xlu0 %1144 }
 0x740   :  { %v1149_v5 = vmul.f32 0.03125, %v1145_v42 }
 0x742   :  { %v6556_v36 = vsub.f32 %v6539_v29, %v1149_v5 }
 0x743   :  { %v1148_v54 = vpop.xlane.xlu0 %1147 }
 0x744   :  { %v1150_v52 = vmul.f32 0.03125, %v1148_v54  ;;  %v1153_v2 = vmul.f32 %v6556_v36, %v6556_v36 }
 0x746   :  { %v6561_v37 = vsub.f32 %v6543_v26, %v1150_v52  ;;  %v1155_v35 = vsel %vm180_vm0, %v1153_v2, 0.0 }
 0x747   :  { %1156 = vadd.xlane.f32.xlu0 %v1155_v35  ;;  %v202_v9 = vpop.xlane.xlu0 %201 }
 0x748   :  { %v209_v59 = vmul.f32 0.03125, %v202_v9  ;;  %v1154_v58 = vmul.f32 %v6561_v37, %v6561_v37  ;;  %v4592_v9 = vld [vmem:[#allocation2 + $0x1fa] ss:$0 sm:$0xff] }
 0x74a   :  { %v212_v6 = vadd.f32 1e-05, %v209_v59  ;;  %v1158_v55 = vsel %vm180_vm0, %v1154_v58, 0.0 }
 0x74b   :  { %1159 = vadd.xlane.f32.xlu0 %v1158_v55  ;;  %v205_v62 = vpop.xlane.xlu0 %204 }
 0x74c   :  { %5792 = vrsqrt.f32 %v212_v6  ;;  %v210_v13 = vmul.f32 0.03125, %v205_v62  ;;  %v6611_v62 = vld [vmem:[#allocation2] sm:$0xff] }
 0x74e   :  { %v213_v41 = vadd.f32 1e-05, %v210_v13 }
 0x74f   :  { %v208_v3 = vpop.xlane.xlu0 %207 }
 0x750   :  { %5794 = vrsqrt.f32 %v213_v41  ;;  %v211_v10 = vmul.f32 0.03125, %v208_v3  ;;  %v6614_v41 = vld [vmem:[#allocation2 + $0x8] sm:$0xff] }
 0x752   :  { %v214_v47 = vadd.f32 1e-05, %v211_v10  ;;  %v6618_v10 = vld [vmem:[#allocation2 + $0x10] sm:$0xff] }
 0x754   :  { %5796 = vrsqrt.f32 %v214_v47 }
 0x756   :  { %v5793_v4 = vpop.eup %5792 }
 0x757   :  { %v218_v7 = vmul.f32 %v5793_v4, %v194_v28  ;;  %v6623_v4 = vld [vmem:[#allocation2 + $0x18] sm:$0xff] }
 0x759   :  { %v225_v14 = vmul.f32 %v4545_v18, %v218_v7  ;;  %v6626_v7 = vld [vmem:[#allocation2 + $0x20] sm:$0xff] }
 0x75a   :  { %v5795_v43 = vpop.eup %5794 }
 0x75b   :  { %v6567_v32 = vadd.f32 %v4546_v11, %v225_v14  ;;  %v219_v23 = vmul.f32 %v5795_v43, %v195_v34  ;;  %v6631_v14 = vld [vmem:[#allocation2 + $0x28] sm:$0xff] }
 0x75d   :  { %5121 = vmatmul.mubr.msk.f32.vlgmr.msra.gmra.mrb[18].mxu1 %vm180_vm0, %v6567_v32  ;;  %v226_v53 = vmul.f32 %v4545_v18, %v219_v23  ;;  %vm235_vm4 = vcmp.eq.f32.partialorder %v6567_v32, 0.0  ;;  %v6634_v23 = vld [vmem:[#allocation2 + $0x30] sm:$0xff] }
 0x75e   :  { %v5797_v19 = vpop.eup %5796  ;;  %5123 = vmatprep.mubr.msk.f32.mxu1 %vm6147_vm1, %v6148_v20  ;;  %v238_v28 = vsel %vm235_vm4, -1e+09, %v6148_v20 }
 0x75f   :  { %v6573_v27 = vadd.f32 %v4546_v11, %v226_v53  ;;  %v220_v24 = vmul.f32 %v5797_v19, %v196_v0  ;;  %v6639_v19 = vld [vmem:[#allocation2 + $0x38] sm:$0xff] }
 0x761   :  { %5124 = vmatmul.mubr.msk.f32.gmra.mrb[20].mxu1 %vm180_vm0, %v6573_v27  ;;  %v227_v22 = vmul.f32 %v4545_v18, %v220_v24  ;;  %vm236_vm5 = vcmp.eq.f32.partialorder %v6573_v27, 0.0 }
 0x762   :  { %5126 = vmatprep.mubr.msk.f32.mxu1 %vm6147_vm1, %v6148_v20  ;;  %v239_v12 = vsel %vm236_vm5, -1e+09, %v6148_v20 }
 0x763   :  { %v6579_v45 = vadd.f32 %v4546_v11, %v227_v22  ;;  %v6642_v22 = vld [vmem:[#allocation2 + $0x40] sm:$0xff] }
 0x765   :  { %5127 = vmatmul.mubr.msk.f32.gmra.mrb[22].mxu1 %vm180_vm0, %v6579_v45  ;;  %vm237_vm6 = vcmp.eq.f32.partialorder %v6579_v45, 0.0 }
 0x766   :  { %v240_v8 = vsel %vm237_vm6, -1e+09, %v6148_v20 }
 0x778   :  { %241 = vxpose.xlu0.b32.start [1/3] (short) (narrow) %v238_v28, 8  ;;  %v6650_v28 = vld [vmem:[#allocation2 + $0x50] sm:$0xff] }
 0x77c   :  { %242 = vxpose.xlu0.b32.cont [2/3] (short) (narrow) %v239_v12, 8 }
 0x780   :  { %243 = vxpose.xlu0.b32.end [3/3] (short) (narrow) %v240_v8, 8  ;;  %v6655_v8 = vld [vmem:[#allocation2 + $0x58] sm:$0xff] }
 0x7d4   :  { %v1157_v57 = vpop.xlane.xlu0 %1156 }
 0x7d5   :  { %v1161_v49 = vmul.f32 0.03125, %v1157_v57 }
 0x7d7   :  { %v1163_v34 = vadd.f32 1e-05, %v1161_v49  ;;  %v6658_v49 = vld [vmem:[#allocation2 + $0x60] sm:$0xff] }
 0x7d8   :  { %v1160_v33 = vpop.xlane.xlu0 %1159 }
 0x7d9   :  { %5798 = vrsqrt.f32 %v1163_v34  ;;  %v1162_v21 = vmul.f32 0.03125, %v1160_v33  ;;  %v6663_v33 = vld [vmem:[#allocation2 + $0x68] sm:$0xff] }
 0x7db   :  { %v1164_v0 = vadd.f32 1e-05, %v1162_v21 }
 0x7dd   :  { %5800 = vrsqrt.f32 %v1164_v0  ;;  %v6666_v0 = vld [vmem:[#allocation2 + $0x70] sm:$0xff] }
 0x7e3   :  { %v5799_v44 = vpop.eup %5798 }
 0x7e4   :  { %v1167_v1 = vmul.f32 %v5799_v44, %v6556_v36 }
 0x7e6   :  { %v1173_v56 = vmul.f32 %v4590_v39, %v1167_v1 }
 0x7e7   :  { %v5801_v50 = vpop.eup %5800 }
 0x7e8   :  { %v1168_v46 = vmul.f32 %v5801_v50, %v6561_v37  ;;  %v1179_v25 = vadd.f32 %v4591_v38, %v1173_v56 }
 0x7ea   :  { %v1174_v16 = vmul.f32 %v4590_v39, %v1168_v46  ;;  %5109 = vmatprep.mubr.msk.f32.mxu0 %vm180_vm0, %v1179_v25  ;;  %v6671_v39 = vld [vmem:[#allocation2 + $0x78] sm:$0xff]  ;;  %v71_v25 = vld [vmem:[#allocation2 + $0x108] sm:$0xff] }
 0x7ec   :  { %v1180_v51 = vadd.f32 %v4591_v38, %v1174_v16  ;;  %v1587_v38 = vlaneseq }
 0x7ee   :  { %5110 = vmatmul.mubr.msk.f32.vlgmr.msra.gmra.mrb[24].mxu0 %vm180_vm0, %v1180_v51  ;;  %v1588_v56 = vshrl.u32 %v1587_v38, 7  ;;  %v70_v51 = vld [vmem:[#allocation2 + $0x100] sm:$0xff]  ;;  %v77_v38 = vld [vmem:[#allocation2 + $0x138] sm:$0xff] }
 0x7f0   :  { %v1589_v50 = vsub.s32 0, %v1588_v56 }
 0x7f8   :  { %v257_v46 = vpop.trf.xlu0 }
 0x7f9   :  { %v6675_v16 = vrot.slane %v257_v46, %v1589_v50 }
 0x830   :  { %v1355_v15 = vpop.f32.mrb[18].mxu1 }
 0x831   :  { %v5122_v48 = vpop.f32.mrb[19].mxu1  ;;  %v6593_v42 = vadd.f32 %v4595_v30, %v1355_v15 }
 0x834   :  { %v1360_v63 = vpop.f32.mrb[20].mxu1 }
 0x835   :  { %v6595_v5 = vadd.f32 %v4595_v30, %v1360_v63  ;;  %v5125_v36 = vpop.f32.mrb[21].mxu1 }
 0x836   :  { %v73_v36 = vld [vmem:[#allocation2 + $0x118] sm:$0xff] }
 0x837   :  { %v5704_v54 = vpack.i.bf16 %v6595_v5, %v6593_v42  ;;  %v5523_v52 = vpack.c.bf16 %v6595_v5, %v6593_v42 }
 0x838   :  { %v1365_v2 = vpop.f32.mrb[22].mxu1 }
 0x839   :  { %v6601_v37 = vadd.f32 %v4595_v30, %v1365_v2  ;;  %v5128_v35 = vpop.f32.mrb[23].mxu1  ;;  %5525 = vmatprep.subr.msk.bf16.mxu0 %vm6244_vm3, %v5523_v52 }
 0x83a   :  { %5528 = vmatpush3.bf16.xpose.msk.msra.mxu0 %vm6244_vm3, %v5523_v52 }
 0x83b   :  { %5133 = vmatprep.subr.msk.mxu0 %vm180_vm0, %v6601_v37 }
 0x842   :  { %5134 = vmatpush3.xpose.msk.msra.mxu0 %vm180_vm0, %v6601_v37 }
 0x8c1   :  { %v5111_v59 = vpop.f32.mrb[24].mxu0 }
 0x8c2   :  { %v1268_v58 = vadd.f32 %v5111_v59, %v4592_v9  ;;  %v1262_v6 = vpop.f32.mrb[25].mxu0 }
 0x8c3   :  { %v1263_v55 = vadd.f32 %v4592_v9, %v1262_v6  ;;  %v72_v6 = vld [vmem:[#allocation2 + $0x110] sm:$0xff] }
 0x8c4   :  { %v1370_v3 = vmul.f32 %v6614_v41, %v1268_v58  ;;  %v1372_v18 = vmul.f32 %v6623_v4, %v1268_v58  ;;  %v1374_v43 = vmul.f32 %v6631_v14, %v1268_v58  ;;  %v1376_v24 = vmul.f32 %v6639_v19, %v1268_v58 }
 0x8c5   :  { %v1369_v13 = vmul.f32 %v6611_v62, %v1263_v55  ;;  %v1371_v47 = vmul.f32 %v6618_v10, %v1263_v55  ;;  %v1373_v11 = vmul.f32 %v6626_v7, %v1263_v55  ;;  %v1375_v53 = vmul.f32 %v6634_v23, %v1263_v55 }
 0x8c6   :  { %v1377_v60 = vmul.f32 %v6642_v22, %v1263_v55  ;;  %v1378_v31 = vmul.f32 %v6647_v40, %v1268_v58  ;;  %v1379_v12 = vmul.f32 %v6650_v28, %v1263_v55  ;;  %v1380_v57 = vmul.f32 %v6655_v8, %v1268_v58 }
 0x8c7   :  { %5135 = vmatprep.mubr.msk.f32.mxu0 %vm180_vm0, %v1369_v13  ;;  %v1381_v34 = vmul.f32 %v6658_v49, %v1263_v55  ;;  %v1382_v21 = vmul.f32 %v6663_v33, %v1268_v58  ;;  %v1383_v44 = vmul.f32 %v6666_v0, %v1263_v55  ;;  %v1384_v1 = vmul.f32 %v6671_v39, %v1268_v58 }
 0x8c8   :  { %5136 = vmatmul.mubr.msk.f32.vlgmr.msra.gmra.mrb[26].mxu0 %vm180_vm0, %v1370_v3 }
 0x8c9   :  { %5138 = vmatprep.mubr.msk.f32.mxu0 %vm180_vm0, %v1371_v47 }
 0x8cc   :  { %5139 = vmatmul.mubr.msk.f32.gmra.mrb[28].mxu0 %vm180_vm0, %v1372_v18 }
 0x8cd   :  { %5141 = vmatprep.mubr.msk.f32.mxu0 %vm180_vm0, %v1373_v11  ;;  %v75_v11 = vld [vmem:[#allocation2 + $0x128] sm:$0xff] }
 0x8d0   :  { %5142 = vmatmul.mubr.msk.f32.gmra.mrb[30].mxu0 %vm180_vm0, %v1374_v43 }
 0x8d1   :  { %5144 = vmatprep.mubr.msk.f32.mxu0 %vm180_vm0, %v1375_v53 }
 0x8d4   :  { %5145 = vmatmul.mubr.msk.f32.gmra.mrb[32].mxu0 %vm180_vm0, %v1376_v24 }
 0x8d5   :  { %5147 = vmatprep.mubr.msk.f32.mxu0 %vm180_vm0, %v1377_v60 }
 0x8d8   :  { %5148 = vmatmul.mubr.msk.f32.gmra.mrb[34].mxu0 %vm180_vm0, %v1378_v31 }
 0x8d9   :  { %5150 = vmatprep.mubr.msk.f32.mxu0 %vm180_vm0, %v1379_v12  ;;  %v74_v12 = vld [vmem:[#allocation2 + $0x120] sm:$0xff] }
 0x8dc   :  { %5151 = vmatmul.mubr.msk.f32.gmra.mrb[36].mxu0 %vm180_vm0, %v1380_v57 }
 0x8dd   :  { %5153 = vmatprep.mubr.msk.f32.mxu0 %vm180_vm0, %v1381_v34 }
 0x8e0   :  { %5154 = vmatmul.mubr.msk.f32.gmra.mrb[38].mxu0 %vm180_vm0, %v1382_v21 }
 0x8e1   :  { %5156 = vmatprep.mubr.msk.f32.mxu0 %vm180_vm0, %v1383_v44 }
 0x8e4   :  { %5157 = vmatmul.mubr.msk.f32.gmra.mrb[40].mxu0 %vm180_vm0, %v1384_v1 }
 0x99b   :  { %v5137_v15 = vpop.f32.mrb[26].mxu0 }
 0x99c   :  { %v1514_v48 = vadd.f32 %v5137_v15, %v71_v25  ;;  %v1508_v30 = vpop.f32.mrb[27].mxu0  ;;  %v76_v15 = vld [vmem:[#allocation2 + $0x130] sm:$0xff] }
 0x99d   :  { %v1509_v63 = vadd.f32 %v1508_v30, %v70_v51 }
 0x99e   :  { %v6678_v52 = vadd.f32 %v6675_v16, %v1514_v48 }
 0x99f   :  { %v5140_v2 = vpop.f32.mrb[28].mxu0  ;;  %v6683_v58 = vadd.f32 %v6675_v16, %v1509_v63 }
 0x9a0   :  { %v1524_v35 = vadd.f32 %v5140_v2, %v73_v36  ;;  %v1518_v9 = vpop.f32.mrb[29].mxu0  ;;  %v1611_v59 = vsel %vm1607_vm7, %v6678_v52, -inf }
 0x9a1   :  { %1612 = vmax.xlane.f32.xlu1 %v1611_v59  ;;  %v1519_v13 = vadd.f32 %v1518_v9, %v72_v6  ;;  %v1608_v47 = vsel %vm1607_vm7, %v6683_v58, -inf  ;;  %v84_v9 = vld [vmem:[#allocation2 + $0x170] sm:$0xff] }
 0x9a2   :  { %v6688_v18 = vadd.f32 %v6675_v16, %v1524_v35  ;;  %v79_v35 = vld [vmem:[#allocation2 + $0x148] sm:$0xff] }
 0x9a3   :  { %v5143_v55 = vpop.f32.mrb[30].mxu0  ;;  %v6693_v31 = vadd.f32 %v6675_v16, %v1519_v13 }
 0x9a4   :  { %v1528_v3 = vpop.f32.mrb[31].mxu0  ;;  %v1534_v53 = vadd.f32 %v5143_v55, %v75_v11  ;;  %v1617_v60 = vsel %vm1607_vm7, %v6688_v18, -inf }
 0x9a5   :  { %1609 = vmax.xlane.f32.xlu1 %v1608_v47  ;;  %v1529_v34 = vadd.f32 %v1528_v3, %v74_v12  ;;  %v1614_v44 = vsel %vm1607_vm7, %v6693_v31, -inf  ;;  %v78_v47 = vld [vmem:[#allocation2 + $0x140] sm:$0xff]  ;;  %v81_v12 = vld [vmem:[#allocation2 + $0x158] sm:$0xff] }
 0x9a6   :  { %v6698_v1 = vadd.f32 %v6675_v16, %v1534_v53 }
 0x9a7   :  { %v5146_v43 = vpop.f32.mrb[32].mxu0  ;;  %v6703_v51 = vadd.f32 %v6675_v16, %v1529_v34 }
 0x9a8   :  { %v1538_v24 = vpop.f32.mrb[33].mxu0  ;;  %v1544_v50 = vadd.f32 %v5146_v43, %v77_v38  ;;  %v1623_v25 = vsel %vm1607_vm7, %v6698_v1, -inf }
 0x9a9   :  { %1618 = vmax.xlane.f32.xlu1 %v1617_v60  ;;  %v1539_v30 = vadd.f32 %v1538_v24, %v76_v15  ;;  %v1620_v36 = vsel %vm1607_vm7, %v6703_v51, -inf }
 0x9aa   :  { %v6708_v2 = vadd.f32 %v6675_v16, %v1544_v50 }
 0x9ab   :  { %v5149_v57 = vpop.f32.mrb[34].mxu0  ;;  %v6713_v3 = vadd.f32 %v6675_v16, %v1539_v30  ;;  %v83_v30 = vld [vmem:[#allocation2 + $0x168] sm:$0xff] }
 0x9ac   :  { %v1548_v21 = vpop.f32.mrb[35].mxu0  ;;  %v1554_v6 = vadd.f32 %v5149_v57, %v79_v35  ;;  %v1629_v13 = vsel %vm1607_vm7, %v6708_v2, -inf }
 0x9ad   :  { %1615 = vmax.xlane.f32.xlu1 %v1614_v44  ;;  %v1549_v53 = vadd.f32 %v1548_v21, %v78_v47  ;;  %v1626_v24 = vsel %vm1607_vm7, %v6713_v3, -inf  ;;  %v80_v21 = vld [vmem:[#allocation2 + $0x150] sm:$0xff] }
 0x9ae   :  { %v6721_v60 = vadd.f32 %v6675_v16, %v1554_v6 }
 0x9af   :  { %v5152_v56 = vpop.f32.mrb[36].mxu0  ;;  %v6728_v38 = vadd.f32 %v6675_v16, %v1549_v53 }
 0x9b0   :  { %v1558_v46 = vpop.f32.mrb[37].mxu0  ;;  %v1564_v34 = vadd.f32 %v5152_v56, %v81_v12  ;;  %v1635_v44 = vsel %vm1607_vm7, %v6721_v60, -inf }
 0x9b1   :  { %1624 = vmax.xlane.f32.xlu1 %v1623_v25  ;;  %v1559_v50 = vadd.f32 %v1558_v46, %v80_v21  ;;  %v1632_v25 = vsel %vm1607_vm7, %v6728_v38, -inf }
 0x9b2   :  { %v6733_v15 = vadd.f32 %v6675_v16, %v1564_v34 }
 0x9b3   :  { %v5155_v48 = vpop.f32.mrb[38].mxu0  ;;  %v6738_v35 = vadd.f32 %v6675_v16, %v1559_v50 }
 0x9b4   :  { %v1568_v63 = vpop.f32.mrb[39].mxu0  ;;  %v1641_v56 = vsel %vm1607_vm7, %v6733_v15, -inf }
 0x9b5   :  { %1621 = vmax.xlane.f32.xlu1 %v1620_v36  ;;  %v1574_v36 = vadd.f32 %v5155_v48, %v83_v30  ;;  %v1638_v46 = vsel %vm1607_vm7, %v6738_v35, -inf }
 0x9b7   :  { %v5158_v59 = vpop.f32.mrb[40].mxu0 }
 0x9b8   :  { %v1578_v55 = vpop.f32.mrb[41].mxu0 }
 0x9b9   :  { %v1579_v11 = vadd.f32 %v1578_v55, %v84_v9  ;;  %1630 = vmax.xlane.f32.xlu1 %v1629_v13  ;;  %v82_v9 = vld [vmem:[#allocation2 + $0x160] sm:$0xff]  ;;  %v6743_v55 = vadd.f32 %v6675_v16, %v1574_v36  ;;  %v85_v13 = vld [vmem:[#allocation2 + $0x178] sm:$0xff] }
 0x9ba   :  { %v1569_v6 = vadd.f32 %v1568_v63, %v82_v9  ;;  %v1584_v47 = vadd.f32 %v5158_v59, %v85_v13 }
 0x9bb   :  { %v6716_v43 = vadd.f32 %v6675_v16, %v1579_v11  ;;  %v1647_v48 = vsel %vm1607_vm7, %v6743_v55, -inf }
 0x9bc   :  { %v6748_v11 = vadd.f32 %v6675_v16, %v1569_v6  ;;  %v6753_v63 = vadd.f32 %v6675_v16, %v1584_v47 }
 0x9bd   :  { %1627 = vmax.xlane.f32.xlu1 %v1626_v24  ;;  %v1650_v57 = vsel %vm1607_vm7, %v6716_v43, -inf }
 0x9be   :  { %1651 = vmax.xlane.f32.xlu0 %v1650_v57  ;;  %v1644_v53 = vsel %vm1607_vm7, %v6748_v11, -inf  ;;  %v1653_v24 = vsel %vm1607_vm7, %v6753_v63, -inf }
 0x9c1   :  { %1636 = vmax.xlane.f32.xlu1 %v1635_v44 }
 0x9c5   :  { %1633 = vmax.xlane.f32.xlu1 %v1632_v25 }
 0x9c9   :  { %1642 = vmax.xlane.f32.xlu1 %v1641_v56 }
 0x9cd   :  { %1639 = vmax.xlane.f32.xlu1 %v1638_v46 }
 0x9d1   :  { %1648 = vmax.xlane.f32.xlu1 %v1647_v48 }
 0x9d5   :  { %1645 = vmax.xlane.f32.xlu1 %v1644_v53 }
 0x9d9   :  { %1654 = vmax.xlane.f32.xlu1 %v1653_v24 }
 0xa2e   :  { %v1613_v12 = vpop.xlane.xlu1 %1612 }
 0xa2f   :  { %v1657_v59 = vsub.f32 %v6678_v52, %v1613_v12 }
 0xa31   :  { %v1674_v57 = vmul.f32 1.442695, %v1657_v59 }
 0xa32   :  { %v1610_v34 = vpop.xlane.xlu1 %1609 }
 0xa33   :  { %5802 = vpow2.f32 %v1674_v57  ;;  %v1656_v44 = vsub.f32 %v6683_v58, %v1610_v34 }
 0xa35   :  { %v1672_v21 = vmul.f32 1.442695, %v1656_v44 }
 0xa36   :  { %v1619_v50 = vpop.xlane.xlu1 %1618 }
 0xa37   :  { %5804 = vpow2.f32 %v1672_v21  ;;  %v1659_v25 = vsub.f32 %v6688_v18, %v1619_v50 }
 0xa39   :  { %v1678_v30 = vmul.f32 1.442695, %v1659_v25 }
 0xa3a   :  { %v1616_v36 = vpop.xlane.xlu1 %1615 }
 0xa3b   :  { %5806 = vpow2.f32 %v1678_v30  ;;  %v1658_v56 = vsub.f32 %v6693_v31, %v1616_v36 }
 0xa3d   :  { %v6761_v9 = vpop.eup %5802  ;;  %v1676_v6 = vmul.f32 1.442695, %v1658_v56 }
 0xa3e   :  { %v1625_v46 = vpop.xlane.xlu1 %1624  ;;  %v1707_v52 = vsel %vm1607_vm7, %v6761_v9, 0.0 }
 0xa3f   :  { %5808 = vpow2.f32 %v1676_v6  ;;  %v1661_v58 = vsub.f32 %v6698_v1, %v1625_v46  ;;  %1708 = vadd.xlane.f32.xlu1 %v1707_v52 }
 0xa41   :  { %v6766_v13 = vpop.eup %5804  ;;  %v1682_v47 = vmul.f32 1.442695, %v1661_v58 }
 0xa42   :  { %v1622_v18 = vpop.xlane.xlu1 %1621  ;;  %v1704_v48 = vsel %vm1607_vm7, %v6766_v13, 0.0 }
 0xa43   :  { %5810 = vpow2.f32 %v1682_v47  ;;  %v1660_v31 = vsub.f32 %v6703_v51, %v1622_v18  ;;  %1705 = vadd.xlane.f32.xlu1 %v1704_v48 }
 0xa45   :  { %v6771_v53 = vpop.eup %5806  ;;  %v1680_v24 = vmul.f32 1.442695, %v1660_v31 }
 0xa46   :  { %v1631_v12 = vpop.xlane.xlu1 %1630  ;;  %v1713_v59 = vsel %vm1607_vm7, %v6771_v53, 0.0 }
 0xa47   :  { %5812 = vpow2.f32 %v1680_v24  ;;  %v1663_v1 = vsub.f32 %v6708_v2, %v1631_v12  ;;  %1714 = vadd.xlane.f32.xlu1 %v1713_v59 }
 0xa49   :  { %v6776_v57 = vpop.eup %5808  ;;  %v1686_v34 = vmul.f32 1.442695, %v1663_v1 }
 0xa4a   :  { %v1628_v44 = vpop.xlane.xlu1 %1627  ;;  %v1710_v21 = vsel %vm1607_vm7, %v6776_v57, 0.0 }
 0xa4b   :  { %5814 = vpow2.f32 %v1686_v34  ;;  %v1662_v51 = vsub.f32 %v6713_v3, %v1628_v44  ;;  %1711 = vadd.xlane.f32.xlu1 %v1710_v21 }
 0xa4d   :  { %v6781_v50 = vpop.eup %5810  ;;  %v1684_v25 = vmul.f32 1.442695, %v1662_v51 }
 0xa4e   :  { %v1637_v30 = vpop.xlane.xlu1 %1636  ;;  %v1719_v36 = vsel %vm1607_vm7, %v6781_v50, 0.0 }
 0xa4f   :  { %5816 = vpow2.f32 %v1684_v25  ;;  %v1665_v2 = vsub.f32 %v6721_v60, %v1637_v30  ;;  %1720 = vadd.xlane.f32.xlu1 %v1719_v36 }
 0xa51   :  { %v6786_v56 = vpop.eup %5812  ;;  %v1690_v6 = vmul.f32 1.442695, %v1665_v2 }
 0xa52   :  { %v1634_v46 = vpop.xlane.xlu1 %1633  ;;  %v1716_v52 = vsel %vm1607_vm7, %v6786_v56, 0.0 }
 0xa53   :  { %5818 = vpow2.f32 %v1690_v6  ;;  %v1664_v3 = vsub.f32 %v6728_v38, %v1634_v46  ;;  %1717 = vadd.xlane.f32.xlu1 %v1716_v52 }
 0xa55   :  { %v6791_v58 = vpop.eup %5814  ;;  %v1688_v47 = vmul.f32 1.442695, %v1664_v3 }
 0xa56   :  { %v1643_v18 = vpop.xlane.xlu1 %1642  ;;  %v1725_v48 = vsel %vm1607_vm7, %v6791_v58, 0.0 }
 0xa57   :  { %5820 = vpow2.f32 %v1688_v47  ;;  %v1667_v60 = vsub.f32 %v6733_v15, %v1643_v18  ;;  %1726 = vadd.xlane.f32.xlu1 %v1725_v48  ;;  %v1652_v48 = vpop.xlane.xlu0 %1651 }
 0xa59   :  { %v6796_v31 = vpop.eup %5816  ;;  %v1694_v24 = vmul.f32 1.442695, %v1667_v60  ;;  %v1670_v60 = vsub.f32 %v6716_v43, %v1652_v48 }
 0xa5a   :  { %v1640_v12 = vpop.xlane.xlu1 %1639  ;;  %v1722_v59 = vsel %vm1607_vm7, %v6796_v31, 0.0 }
 0xa5b   :  { %5822 = vpow2.f32 %v1694_v24  ;;  %v1666_v38 = vsub.f32 %v6738_v35, %v1640_v12  ;;  %1723 = vadd.xlane.f32.xlu1 %v1722_v59  ;;  %v1700_v24 = vmul.f32 1.442695, %v1670_v60 }
 0xa5d   :  { %v6801_v1 = vpop.eup %5818  ;;  %v1692_v34 = vmul.f32 1.442695, %v1666_v38 }
 0xa5e   :  { %v1649_v44 = vpop.xlane.xlu1 %1648  ;;  %v1731_v21 = vsel %vm1607_vm7, %v6801_v1, 0.0 }
 0xa5f   :  { %5824 = vpow2.f32 %v1692_v34  ;;  %v1669_v15 = vsub.f32 %v6743_v55, %v1649_v44  ;;  %1732 = vadd.xlane.f32.xlu1 %v1731_v21 }
 0xa61   :  { %v6806_v51 = vpop.eup %5820  ;;  %v1698_v25 = vmul.f32 1.442695, %v1669_v15 }
 0xa62   :  { %v1646_v30 = vpop.xlane.xlu1 %1645  ;;  %v1728_v36 = vsel %vm1607_vm7, %v6806_v51, 0.0 }
 0xa63   :  { %5826 = vpow2.f32 %v1698_v25  ;;  %v1668_v35 = vsub.f32 %v6748_v11, %v1646_v30  ;;  %1729 = vadd.xlane.f32.xlu1 %v1728_v36 }
 0xa65   :  { %v6811_v2 = vpop.eup %5822  ;;  %v1696_v6 = vmul.f32 1.442695, %v1668_v35 }
 0xa66   :  { %v1737_v46 = vsel %vm1607_vm7, %v6811_v2, 0.0  ;;  %v1655_v12 = vpop.xlane.xlu1 %1654 }
 0xa67   :  { %5828 = vpow2.f32 %v1696_v6  ;;  %1738 = vadd.xlane.f32.xlu0 %v1737_v46  ;;  %v1671_v59 = vsub.f32 %v6753_v63, %v1655_v12 }
 0xa68   :  { %5830 = vpow2.f32 %v1700_v24 }
 0xa69   :  { %v6815_v55 = vpop.eup %5824  ;;  %v1702_v34 = vmul.f32 1.442695, %v1671_v59 }
 0xa6a   :  { %v1734_v52 = vsel %vm1607_vm7, %v6815_v55, 0.0 }
 0xa6b   :  { %1735 = vadd.xlane.f32.xlu0 %v1734_v52  ;;  %5832 = vpow2.f32 %v1702_v34 }
 0xa6d   :  { %v6819_v3 = vpop.eup %5826 }
 0xa6e   :  { %v1743_v11 = vsel %vm1607_vm7, %v6819_v3, 0.0 }
 0xa6f   :  { %1744 = vadd.xlane.f32.xlu0 %v1743_v11 }
 0xa71   :  { %v6823_v47 = vpop.eup %5828 }
 0xa72   :  { %v1740_v18 = vsel %vm1607_vm7, %v6823_v47, 0.0  ;;  %v6835_v38 = vpop.eup %5830 }
 0xa73   :  { %1741 = vadd.xlane.f32.xlu0 %v1740_v18  ;;  %v1746_v44 = vsel %vm1607_vm7, %v6835_v38, 0.0 }
 0xa74   :  { %5705 = vrot.lane.b32.xlu1 %v5704_v54, %s6149_s2 }
 0xa75   :  { %v6839_v42 = vpop.eup %5832 }
 0xa76   :  { %v1749_v5 = vsel %vm1607_vm7, %v6839_v42, 0.0 }
 0xa89   :  { %1788 = vrot.lane.b32.xlu0 %v6601_v37, %s6149_s2 }
 0xa98   :  { %1747 = vadd.xlane.f32.xlu1 %v1746_v44 }
 0xaa8   :  { %1750 = vadd.xlane.f32.xlu0 %v1749_v5 }
 0xacc   :  { %v1709_v54 = vpop.xlane.xlu1 %1708 }
 0xad0   :  { %v1706_v37 = vpop.xlane.xlu1 %1705 }
 0xad1   :  { %5834 = vrcp.f32 %v1706_v37 }
 0xad2   :  { %5836 = vrcp.f32 %v1709_v54 }
 0xad4   :  { %v1715_v43 = vpop.xlane.xlu1 %1714 }
 0xad8   :  { %v1712_v21 = vpop.xlane.xlu1 %1711 }
 0xad9   :  { %5838 = vrcp.f32 %v1712_v21 }
 0xada   :  { %5840 = vrcp.f32 %v1715_v43 }
 0xadb   :  { %v5835_v63 = vpop.eup %5834 }
 0xadc   :  { %v1721_v15 = vpop.xlane.xlu1 %1720  ;;  %v1768_v25 = vmul.f32 %v5835_v63, %v6766_v13  ;;  %v5837_v59 = vpop.eup %5836 }
 0xadd   :  { %v1769_v5 = vmul.f32 %v5837_v59, %v6761_v9  ;;  %v2019_v59 = vld [vmem:[#allocation2 + $0x234] sm:$0xff] }
 0xade   :  { %5165 = vmatprep.mubr.msk.f32.mxu1 %vm1607_vm7, %v1768_v25 }
 0xae0   :  { %v1718_v30 = vpop.xlane.xlu1 %1717 }
 0xae1   :  { %5842 = vrcp.f32 %v1718_v30 }
 0xae2   :  { %5844 = vrcp.f32 %v1721_v15 }
 0xae3   :  { %v5839_v34 = vpop.eup %5838 }
 0xae4   :  { %v1727_v36 = vpop.xlane.xlu1 %1726  ;;  %v5841_v37 = vpop.eup %5840  ;;  %v1770_v54 = vmul.f32 %v5839_v34, %v6776_v57 }
 0xae5   :  { %v1771_v43 = vmul.f32 %v5841_v37, %v6771_v53 }
 0xae8   :  { %v1724_v35 = vpop.xlane.xlu1 %1723 }
 0xae9   :  { %5846 = vrcp.f32 %v1724_v35 }
 0xaea   :  { %5848 = vrcp.f32 %v1727_v36 }
 0xaeb   :  { %v5843_v21 = vpop.eup %5842 }
 0xaec   :  { %v1733_v6 = vpop.xlane.xlu1 %1732  ;;  %v5845_v63 = vpop.eup %5844  ;;  %v1772_v15 = vmul.f32 %v5843_v21, %v6786_v56 }
 0xaed   :  { %v1773_v9 = vmul.f32 %v5845_v63, %v6781_v50 }
 0xaf0   :  { %v1730_v46 = vpop.xlane.xlu1 %1729 }
 0xaf1   :  { %5850 = vrcp.f32 %v1730_v46 }
 0xaf2   :  { %5852 = vrcp.f32 %v1733_v6 }
 0xaf3   :  { %v5847_v25 = vpop.eup %5846 }
 0xaf4   :  { %v1739_v52 = vpop.xlane.xlu0 %1738  ;;  %v5706_v11 = vpop.permute.xlu1 %5705  ;;  %v1774_v30 = vmul.f32 %v5847_v25, %v6796_v31 }
 0xaf5   :  { %v5708_v18 = vunpack.i.h.bf16 %v5706_v11  ;;  %v5707_v48 = vunpack.i.l.bf16 %v5706_v11  ;;  %v5849_v57 = vpop.eup %5848 }
 0xaf6   :  { %v1775_v53 = vmul.f32 %v5849_v57, %v6791_v58 }
 0xaf7   :  { %v5529_v60 = vpack.c.bf16 %v5708_v18, %v5707_v48 }
 0xaf8   :  { %v1736_v24 = vpop.xlane.xlu0 %1735 }
 0xaf9   :  { %5530 = vmatprep.subr.bf16.mxu1 %v5529_v60  ;;  %5854 = vrcp.f32 %v1736_v24  ;;  %v2016_v24 = vld [vmem:[#allocation2 + $0x21c] sm:$0xff] }
 0xafa   :  { %5532 = vmatpush3.bf16.msra.mxu1 %v5529_v60  ;;  %5856 = vrcp.f32 %v1739_v52 }
 0xafb   :  { %v5851_v36 = vpop.eup %5850 }
 0xafc   :  { %v1745_v12 = vpop.xlane.xlu0 %1744  ;;  %v5853_v56 = vpop.eup %5852  ;;  %v1776_v35 = vmul.f32 %v5851_v36, %v6806_v51 }
 0xafd   :  { %v1777_v50 = vmul.f32 %v5853_v56, %v6801_v1 }
 0xb00   :  { %v1742_v13 = vpop.xlane.xlu0 %1741 }
 0xb01   :  { %5858 = vrcp.f32 %v1742_v13  ;;  %v2018_v13 = vld [vmem:[#allocation2 + $0x22c] sm:$0xff] }
 0xb02   :  { %5860 = vrcp.f32 %v1745_v12  ;;  %v2017_v12 = vld [vmem:[#allocation2 + $0x224] sm:$0xff]  ;;  %v5537_v34 = vpack.c.bf16 %v2019_v59, %v2018_v13 }
 0xb03   :  { %v5855_v6 = vpop.eup %5854 }
 0xb04   :  { %v1789_v44 = vpop.permute.xlu0 %1788  ;;  %v5857_v46 = vpop.eup %5856  ;;  %v1778_v31 = vmul.f32 %v5855_v6, %v6815_v55 }
 0xb05   :  { %5163 = vmatprep.subr.mxu1 %v1789_v44  ;;  %v1779_v58 = vmul.f32 %v5857_v46, %v6811_v2 }
 0xb06   :  { %5164 = vmatpush3.msra.mxu1 %v1789_v44 }
 0xb07   :  { %5166 = vmatmul.mubr.msk.f32.vlgmr.msra.gmra.mrb[24].mxu1 %vm1607_vm7, %v1769_v5 }
 0xb08   :  { %5168 = vmatprep.mubr.msk.f32.mxu1 %vm1607_vm7, %v1770_v54 }
 0xb0b   :  { %5169 = vmatmul.mubr.msk.f32.gmra.mrb[26].mxu1 %vm1607_vm7, %v1771_v43  ;;  %v5859_v52 = vpop.eup %5858 }
 0xb0c   :  { %5171 = vmatprep.mubr.msk.f32.mxu1 %vm1607_vm7, %v1772_v15  ;;  %v5861_v11 = vpop.eup %5860  ;;  %v1780_v51 = vmul.f32 %v5859_v52, %v6823_v47 }
 0xb0d   :  { %v1781_v18 = vmul.f32 %v5861_v11, %v6819_v3  ;;  %v5533_v3 = vpack.c.bf16 %v2017_v12, %v2016_v24 }
 0xb0f   :  { %5172 = vmatmul.mubr.msk.f32.gmra.mrb[28].mxu1 %vm1607_vm7, %v1773_v9  ;;  %5534 = vmatprep.subr.bf16.mxu0 %v5533_v3 }
 0xb10   :  { %5174 = vmatprep.mubr.msk.f32.mxu1 %vm1607_vm7, %v1774_v30  ;;  %5536 = vmatpush3.bf16.msra.mxu0 %v5533_v3 }
 0xb11   :  { %5538 = vmatprep.subr.bf16.mxu0 %v5537_v34 }
 0xb13   :  { %5175 = vmatmul.mubr.msk.f32.gmra.mrb[30].mxu1 %vm1607_vm7, %v1775_v53 }
 0xb14   :  { %5177 = vmatprep.mubr.msk.f32.mxu1 %vm1607_vm7, %v1776_v35  ;;  %5540 = vmatpush3.bf16.msra.mxu0 %v5537_v34 }
 0xb17   :  { %5178 = vmatmul.mubr.msk.f32.gmra.mrb[32].mxu1 %vm1607_vm7, %v1777_v50 }
 0xb18   :  { %5180 = vmatprep.mubr.msk.f32.mxu1 %vm1607_vm7, %v1778_v31 }
 0xb1b   :  { %5181 = vmatmul.mubr.msk.f32.gmra.mrb[34].mxu1 %vm1607_vm7, %v1779_v58 }
 0xb1c   :  { %5183 = vmatprep.mubr.msk.f32.mxu1 %vm1607_vm7, %v1780_v51 }
 0xb1f   :  { %5184 = vmatmul.mubr.msk.f32.gmra.mrb[36].mxu1 %vm1607_vm7, %v1781_v18 }
 0xb25   :  { %v1748_v1 = vpop.xlane.xlu1 %1747 }
 0xb26   :  { %5862 = vrcp.f32 %v1748_v1 }
 0xb30   :  { %v5863_v55 = vpop.eup %5862 }
 0xb31   :  { %v1782_v48 = vmul.f32 %v5863_v55, %v6835_v38 }
 0xb33   :  { %5186 = vmatprep.mubr.msk.f32.mxu1 %vm1607_vm7, %v1782_v48 }
 0xb35   :  { %v1751_v60 = vpop.xlane.xlu0 %1750 }
 0xb36   :  { %5864 = vrcp.f32 %v1751_v60 }
 0xb40   :  { %v5865_v2 = vpop.eup %5864 }
 0xb41   :  { %v1783_v47 = vmul.f32 %v5865_v2, %v6839_v42 }
 0xb43   :  { %5187 = vmatmul.mubr.msk.f32.gmra.mrb[38].mxu1 %vm1607_vm7, %v1783_v47 }
 0xbda   :  { %v5167_v38 = vpop.f32.mrb[24].mxu1 }
 0xbdb   :  { %v1907_v44 = vpop.f32.mrb[25].mxu1  ;;  %v1987_v37 = vmul.f32 %v6614_v41, %v5167_v38  ;;  %v2148_v38 = vld [vmem:[#allocation2 + $0x23d] sm:$0xff] }
 0xbdc   :  { %v1986_v21 = vmul.f32 %v6611_v62, %v1907_v44  ;;  %v2149_v44 = vld [vmem:[#allocation2 + $0x245] sm:$0xff] }
 0xbde   :  { %v5170_v5 = vpop.f32.mrb[26].mxu1 }
 0xbdf   :  { %v1989_v54 = vmul.f32 %v6623_v4, %v5170_v5  ;;  %v1917_v42 = vpop.f32.mrb[27].mxu1  ;;  %v5541_v5 = vpack.c.bf16 %v2149_v44, %v2148_v38  ;;  %v4639_v44 = vld [vmem:[#allocation2 + $0x25d] ss:$0 sm:$0xff] }
 0xbe0   :  { %v1988_v43 = vmul.f32 %v6618_v10, %v1917_v42 }
 0xbe1   :  { %v2003_v63 = vadd.f32 %v1989_v54, %v1987_v37  ;;  %5542 = vmatprep.subr.bf16.mxu1 %v5541_v5 }
 0xbe2   :  { %v2002_v15 = vadd.f32 %v1988_v43, %v1986_v21  ;;  %v5173_v25 = vpop.f32.mrb[28].mxu1  ;;  %5544 = vmatpush3.bf16.msra.mxu1 %v5541_v5 }
 0xbe3   :  { %v1991_v9 = vmul.f32 %v6631_v14, %v5173_v25  ;;  %v1927_v57 = vpop.f32.mrb[29].mxu1 }
 0xbe4   :  { %v1990_v30 = vmul.f32 %v6626_v7, %v1927_v57  ;;  %v2151_v57 = vld [vmem:[#allocation2 + $0x255] sm:$0xff] }
 0xbe5   :  { %v2005_v36 = vadd.f32 %v2003_v63, %v1991_v9  ;;  %v2150_v9 = vld [vmem:[#allocation2 + $0x24d] sm:$0xff] }
 0xbe6   :  { %v2004_v53 = vadd.f32 %v2002_v15, %v1990_v30  ;;  %v5176_v56 = vpop.f32.mrb[30].mxu1  ;;  %v5545_v30 = vpack.c.bf16 %v2151_v57, %v2150_v9 }
 0xbe7   :  { %v1993_v41 = vmul.f32 %v6639_v19, %v5176_v56  ;;  %v1937_v35 = vpop.f32.mrb[31].mxu1  ;;  %v2242_v56 = vld [vmem:[#allocation2 + $0x26e] sm:$0xff] }
 0xbe8   :  { %v1992_v4 = vmul.f32 %v6634_v23, %v1937_v35  ;;  %5546 = vmatprep.subr.bf16.mxu1 %v5545_v30  ;;  %v2243_v35 = vld [vmem:[#allocation2 + $0x276] sm:$0xff] }
 0xbe9   :  { %v2007_v6 = vadd.f32 %v2005_v36, %v1993_v41  ;;  %5548 = vmatpush3.bf16.msra.mxu1 %v5545_v30  ;;  %v2240_v36 = vld [vmem:[#allocation2 + $0x25e] sm:$0xff] }
 0xbea   :  { %v2006_v62 = vadd.f32 %v2004_v53, %v1992_v4  ;;  %v5179_v50 = vpop.f32.mrb[32].mxu1  ;;  %v2241_v53 = vld [vmem:[#allocation2 + $0x266] sm:$0xff]  ;;  %v5553_v4 = vpack.c.bf16 %v2243_v35, %v2242_v56 }
 0xbeb   :  { %v1995_v10 = vmul.f32 %v6647_v40, %v5179_v50  ;;  %v1947_v46 = vpop.f32.mrb[33].mxu1  ;;  %v5549_v41 = vpack.c.bf16 %v2241_v53, %v2240_v36 }
 0xbec   :  { %v1994_v31 = vmul.f32 %v6642_v22, %v1947_v46  ;;  %v2247_v46 = vld [vmem:[#allocation2 + $0x296] sm:$0xff] }
 0xbed   :  { %v2009_v14 = vadd.f32 %v2007_v6, %v1995_v10  ;;  %v2244_v6 = vld [vmem:[#allocation2 + $0x27e] sm:$0xff]  ;;  %5550 = vmatprep.subr.bf16.mxu0 %v5549_v41  ;;  %v2246_v10 = vld [vmem:[#allocation2 + $0x28e] sm:$0xff] }
 0xbee   :  { %v2008_v52 = vadd.f32 %v2006_v62, %v1994_v31  ;;  %v5182_v58 = vpop.f32.mrb[34].mxu1  ;;  %v2245_v62 = vld [vmem:[#allocation2 + $0x286] sm:$0xff]  ;;  %v5561_v31 = vpack.c.bf16 %v2247_v46, %v2246_v10 }
 0xbef   :  { %v1997_v7 = vmul.f32 %v6655_v8, %v5182_v58  ;;  %v1957_v11 = vpop.f32.mrb[35].mxu1  ;;  %v5557_v50 = vpack.c.bf16 %v2245_v62, %v2244_v6  ;;  %v2380_v10 = vld [vmem:[#allocation2 + $0x2e5] sm:$0xff]  ;;  %v2381_v46 = vld [vmem:[#allocation2 + $0x2ed] sm:$0xff] }
 0xbf0   :  { %v1996_v51 = vmul.f32 %v6650_v28, %v1957_v11  ;;  %v4634_v28 = vld [vmem:[#allocation2 + $0x23c] ss:$0 sm:$0xff] }
 0xbf1   :  { %v2011_v19 = vadd.f32 %v2009_v14, %v1997_v7  ;;  %v2248_v14 = vld [vmem:[#allocation2 + $0x29e] sm:$0xff]  ;;  %v2250_v7 = vld [vmem:[#allocation2 + $0x2ae] sm:$0xff]  ;;  %v2251_v11 = vld [vmem:[#allocation2 + $0x2b6] sm:$0xff] }
 0xbf2   :  { %v2010_v18 = vadd.f32 %v2008_v52, %v1996_v51  ;;  %v5185_v1 = vpop.f32.mrb[36].mxu1  ;;  %v2249_v52 = vld [vmem:[#allocation2 + $0x2a6] sm:$0xff]  ;;  %v5569_v51 = vpack.c.bf16 %v2251_v11, %v2250_v7 }
 0xbf3   :  { %v1999_v23 = vmul.f32 %v6663_v33, %v5185_v1  ;;  %v1967_v55 = vpop.f32.mrb[37].mxu1  ;;  %v5565_v58 = vpack.c.bf16 %v2249_v52, %v2248_v14  ;;  %v5581_v14 = vpack.c.bf16 %v2381_v46, %v2380_v10  ;;  %v2383_v52 = vld [vmem:[#allocation2 + $0x2fd] sm:$0xff] }
 0xbf4   :  { %v1998_v48 = vmul.f32 %v6658_v49, %v1967_v55  ;;  %v6980_v46 = vld [vmem:[#allocation2 + $0x60] sm:$0xff] }
 0xbf5   :  { %v2013_v40 = vadd.f32 %v2011_v19, %v1999_v23  ;;  %v2252_v19 = vld [vmem:[#allocation2 + $0x2be] sm:$0xff]  ;;  %5582 = vmatprep.subr.bf16.mxu1 %v5581_v14 }
 0xbf6   :  { %v2012_v60 = vadd.f32 %v2010_v18, %v1998_v48  ;;  %v2253_v18 = vld [vmem:[#allocation2 + $0x2c6] sm:$0xff] }
 0xbf7   :  { %v5573_v1 = vpack.c.bf16 %v2253_v18, %v2252_v19 }
 0xc16   :  { %v5188_v2 = vpop.f32.mrb[38].mxu1 }
 0xc17   :  { %v2001_v22 = vmul.f32 %v6671_v39, %v5188_v2  ;;  %v1977_v47 = vpop.f32.mrb[39].mxu1 }
 0xc18   :  { %v2000_v24 = vmul.f32 %v6666_v0, %v1977_v47  ;;  %v4637_v47 = vld [vmem:[#allocation2 + $0x196] ss:$0 sm:$0xff] }
 0xc19   :  { %v2015_v8 = vadd.f32 %v2013_v40, %v2001_v22 }
 0xc1a   :  { %v2014_v12 = vadd.f32 %v2012_v60, %v2000_v24 }
 0xc1c   :  { %5197 = vmatprep.mubr.msk.f32.mxu0 %vm180_vm0, %v2014_v12 }
 0xc1d   :  { %5198 = vmatmul.mubr.msk.f32.vlgmr.msra.gmra.mrb[42].mxu0 %vm180_vm0, %v2015_v8  ;;  %v4638_v8 = vld [vmem:[#allocation2 + $0x197] ss:$0 sm:$0xff] }
 0xc1e   :  { %5552 = vmatpush3.bf16.msra.mxu0 %v5549_v41 }
 0xc1f   :  { %5554 = vmatprep.subr.bf16.mxu0 %v5553_v4 }
 0xc22   :  { %5556 = vmatpush3.bf16.msra.mxu0 %v5553_v4 }
 0xc23   :  { %5558 = vmatprep.subr.bf16.mxu0 %v5557_v50 }
 0xc26   :  { %5560 = vmatpush3.bf16.msra.mxu0 %v5557_v50 }
 0xc27   :  { %5562 = vmatprep.subr.bf16.mxu0 %v5561_v31 }
 0xc2a   :  { %5564 = vmatpush3.bf16.msra.mxu0 %v5561_v31  ;;  %v2382_v31 = vld [vmem:[#allocation2 + $0x2f5] sm:$0xff] }
 0xc2b   :  { %5566 = vmatprep.subr.bf16.mxu0 %v5565_v58 }
 0xc2e   :  { %5568 = vmatpush3.bf16.msra.mxu0 %v5565_v58  ;;  %v5585_v58 = vpack.c.bf16 %v2383_v52, %v2382_v31 }
 0xc2f   :  { %5570 = vmatprep.subr.bf16.mxu0 %v5569_v51 }
 0xc32   :  { %5572 = vmatpush3.bf16.msra.mxu0 %v5569_v51 }
 0xc33   :  { %5574 = vmatprep.subr.bf16.mxu0 %v5573_v1 }
 0xc36   :  { %5576 = vmatpush3.bf16.msra.mxu0 %v5573_v1 }
 0xcf0   :  { %v5199_v13 = vpop.f32.mrb[42].mxu0 }
 0xcf1   :  { %v2097_v33 = vpop.f32.mrb[43].mxu0  ;;  %v2103_v3 = vadd.f32 %v5199_v13, %v4634_v28 }
 0xcf2   :  { %v2098_v59 = vadd.f32 %v4634_v28, %v2097_v33 }
 0xcf3   :  { %v6897_v34 = vadd.f32 %v2103_v3, %v6543_v26 }
 0xcf4   :  { %v6894_v49 = vadd.f32 %v2098_v59, %v6539_v29 }
 0xcf5   :  { %v2113_v39 = vsel %vm180_vm0, %v6897_v34, 0.0 }
 0xcf6   :  { %v2110_v0 = vsel %vm180_vm0, %v6894_v49, 0.0 }
 0xcf7   :  { %2111 = vadd.xlane.f32.xlu1 %v2110_v0  ;;  %v2254_v0 = vld [vmem:[#allocation2 + $0x2ce] sm:$0xff] }
 0xcfb   :  { %2114 = vadd.xlane.f32.xlu1 %v2113_v39  ;;  %v2255_v39 = vld [vmem:[#allocation2 + $0x2d6] sm:$0xff] }
 0xcfc   :  { %v5577_v38 = vpack.c.bf16 %v2255_v39, %v2254_v0  ;;  %v6927_v0 = vld [vmem:[#allocation2] sm:$0xff] }
 0xcfe   :  { %5578 = vmatprep.subr.bf16.mxu0 %v5577_v38 }
 0xcff   :  { %5580 = vmatpush3.bf16.msra.mxu0 %v5577_v38 }
 0xd84   :  { %v2112_v37 = vpop.xlane.xlu1 %2111 }
 0xd85   :  { %v2116_v54 = vmul.f32 0.03125, %v2112_v37 }
 0xd87   :  { %v2118_v29 = vsub.f32 %v6894_v49, %v2116_v54 }
 0xd88   :  { %v2115_v42 = vpop.xlane.xlu1 %2114 }
 0xd89   :  { %v2117_v26 = vmul.f32 0.03125, %v2115_v42  ;;  %v2120_v21 = vmul.f32 %v2118_v29, %v2118_v29 }
 0xd8b   :  { %v2119_v43 = vsub.f32 %v6897_v34, %v2117_v26  ;;  %v2122_v63 = vsel %vm180_vm0, %v2120_v21, 0.0 }
 0xd8c   :  { %2123 = vadd.xlane.f32.xlu1 %v2122_v63 }
 0xd8d   :  { %v2121_v15 = vmul.f32 %v2119_v43, %v2119_v43 }
 0xd8f   :  { %v2125_v25 = vsel %vm180_vm0, %v2121_v15, 0.0 }
 0xd90   :  { %2126 = vadd.xlane.f32.xlu1 %v2125_v25 }
 0xe19   :  { %v2124_v23 = vpop.xlane.xlu1 %2123 }
 0xe1a   :  { %v2128_v55 = vmul.f32 0.03125, %v2124_v23 }
 0xe1c   :  { %v2130_v48 = vadd.f32 1e-05, %v2128_v55  ;;  %v4643_v55 = vld [vmem:[#allocation2 + $0x2df] ss:$0 sm:$0xff] }
 0xe1d   :  { %v2127_v40 = vpop.xlane.xlu1 %2126 }
 0xe1e   :  { %5866 = vrsqrt.f32 %v2130_v48  ;;  %v2129_v60 = vmul.f32 0.03125, %v2127_v40 }
 0xe20   :  { %v2131_v2 = vadd.f32 1e-05, %v2129_v60 }
 0xe22   :  { %5868 = vrsqrt.f32 %v2131_v2  ;;  %v4644_v2 = vld [vmem:[#allocation2 + $0x2e0] ss:$0 sm:$0xff] }
 0xe28   :  { %v5867_v22 = vpop.eup %5866 }
 0xe29   :  { %v2134_v24 = vmul.f32 %v5867_v22, %v2118_v29 }
 0xe2b   :  { %v2140_v12 = vmul.f32 %v4637_v47, %v2134_v24 }
 0xe2c   :  { %v5869_v28 = vpop.eup %5868 }
 0xe2d   :  { %v2135_v13 = vmul.f32 %v5869_v28, %v2119_v43  ;;  %v2146_v33 = vadd.f32 %v4638_v8, %v2140_v12  ;;  %v4642_v43 = vld [vmem:[#allocation2 + $0x2de] ss:$0 sm:$0xff]  ;;  %v4645_v12 = vld [vmem:[#allocation2 + $0x305] ss:$0 sm:$0xff] }
 0xe2f   :  { %v2141_v3 = vmul.f32 %v4637_v47, %v2135_v13  ;;  %5208 = vmatprep.mubr.msk.f32.mxu1 %vm180_vm0, %v2146_v33 }
 0xe31   :  { %v2147_v59 = vadd.f32 %v4638_v8, %v2141_v3 }
 0xe33   :  { %5209 = vmatmul.mubr.msk.f32.vlgmr.msra.gmra.mrb[40].mxu1 %vm180_vm0, %v2147_v59 }
 0xe34   :  { %5584 = vmatpush3.bf16.msra.mxu1 %v5581_v14  ;;  %v6985_v14 = vld [vmem:[#allocation2 + $0x68] sm:$0xff] }
 0xe35   :  { %5586 = vmatprep.subr.bf16.mxu1 %v5585_v58 }
 0xe38   :  { %5588 = vmatpush3.bf16.msra.mxu1 %v5585_v58  ;;  %v6988_v58 = vld [vmem:[#allocation2 + $0x70] sm:$0xff] }
 0xf06   :  { %v5210_v5 = vpop.f32.mrb[40].mxu1 }
 0xf07   :  { %v2235_v37 = vadd.f32 %v5210_v5, %v4639_v44  ;;  %v2229_v54 = vpop.f32.mrb[41].mxu1 }
 0xf08   :  { %v2230_v29 = vadd.f32 %v4639_v44, %v2229_v54  ;;  %v6937_v54 = vld [vmem:[#allocation2 + $0x8] sm:$0xff] }
 0xf09   :  { %v2239_v26 = vmax.f32 %v2235_v37, 0.0 }
 0xf0a   :  { %v2238_v42 = vmax.f32 %v2230_v29, 0.0 }
 0xf0c   :  { %5243 = vmatprep.mubr.f32.mxu0 %v2238_v42  ;;  %v6940_v42 = vld [vmem:[#allocation2 + $0x10] sm:$0xff] }
 0xf0d   :  { %5244 = vmatmul.mubr.f32.vlgmr.msra.gmra.mrb[44].mxu0 %v2239_v26 }
 0xfe0   :  { %v5245_v21 = vpop.f32.mrb[44].mxu0 }
 0xfe1   :  { %v2332_v63 = vadd.f32 %v5245_v21, %v6897_v34  ;;  %v2322_v15 = vpop.f32.mrb[45].mxu0  ;;  %v6945_v21 = vld [vmem:[#allocation2 + $0x18] sm:$0xff] }
 0xfe2   :  { %v2331_v25 = vadd.f32 %v2322_v15, %v6894_v49 }
 0xfe3   :  { %v6911_v9 = vadd.f32 %v4642_v43, %v2332_v63  ;;  %v6948_v63 = vld [vmem:[#allocation2 + $0x20] sm:$0xff] }
 0xfe4   :  { %v6913_v57 = vadd.f32 %v4642_v43, %v2331_v25  ;;  %v6953_v25 = vld [vmem:[#allocation2 + $0x28] sm:$0xff] }
 0xfe5   :  { %v2345_v30 = vsel %vm180_vm0, %v6911_v9, 0.0 }
 0xfe6   :  { %2346 = vadd.xlane.f32.xlu1 %v2345_v30  ;;  %v2342_v36 = vsel %vm180_vm0, %v6913_v57, 0.0 }
 0xfe7   :  { %2343 = vadd.xlane.f32.xlu0 %v2342_v36  ;;  %v6956_v36 = vld [vmem:[#allocation2 + $0x30] sm:$0xff] }
0x1073   :  { %v2347_v53 = vpop.xlane.xlu1 %2346 }
0x1074   :  { %v2349_v56 = vmul.f32 0.03125, %v2347_v53  ;;  %v2344_v41 = vpop.xlane.xlu0 %2343 }
0x1075   :  { %v2348_v35 = vmul.f32 0.03125, %v2344_v41 }
0x1076   :  { %v2351_v34 = vsub.f32 %v6911_v9, %v2349_v56  ;;  %v6961_v56 = vld [vmem:[#allocation2 + $0x38] sm:$0xff] }
0x1077   :  { %v2350_v49 = vsub.f32 %v6913_v57, %v2348_v35  ;;  %v6964_v35 = vld [vmem:[#allocation2 + $0x40] sm:$0xff] }
0x1078   :  { %v2353_v4 = vmul.f32 %v2351_v34, %v2351_v34 }
0x1079   :  { %v2352_v6 = vmul.f32 %v2350_v49, %v2350_v49 }
0x107a   :  { %v2357_v62 = vsel %vm180_vm0, %v2353_v4, 0.0 }
0x107b   :  { %2358 = vadd.xlane.f32.xlu1 %v2357_v62  ;;  %v2354_v50 = vsel %vm180_vm0, %v2352_v6, 0.0  ;;  %v6972_v6 = vld [vmem:[#allocation2 + $0x50] sm:$0xff] }
0x107c   :  { %2355 = vadd.xlane.f32.xlu0 %v2354_v50  ;;  %v6977_v50 = vld [vmem:[#allocation2 + $0x58] sm:$0xff] }
0x1108   :  { %v2359_v7 = vpop.xlane.xlu1 %2358 }
0x1109   :  { %v2361_v11 = vmul.f32 0.03125, %v2359_v7  ;;  %v2356_v51 = vpop.xlane.xlu0 %2355 }
0x110a   :  { %v2360_v19 = vmul.f32 0.03125, %v2356_v51 }
0x110b   :  { %v2363_v18 = vadd.f32 1e-05, %v2361_v11  ;;  %v6993_v11 = vld [vmem:[#allocation2 + $0x78] sm:$0xff] }
0x110c   :  { %v2362_v1 = vadd.f32 1e-05, %v2360_v19 }
0x110d   :  { %5870 = vrsqrt.f32 %v2363_v18  ;;  %v6046_v18 = vld [vmem:[#allocation2 + $0x88] sm:$0xff] }
0x110e   :  { %5872 = vrsqrt.f32 %v2362_v1 }
0x1117   :  { %v5871_v23 = vpop.eup %5870 }
0x1118   :  { %v5873_v48 = vpop.eup %5872  ;;  %v2367_v40 = vmul.f32 %v5871_v23, %v2351_v34 }
0x1119   :  { %v2366_v60 = vmul.f32 %v5873_v48, %v2350_v49  ;;  %v6969_v49 = vld [vmem:[#allocation2 + $0x48] sm:$0xff] }
0x111a   :  { %v2373_v22 = vmul.f32 %v4643_v55, %v2367_v40  ;;  %v7000_v40 = vld [vmem:[%s7538_s3] ss:$0 sm:$0xff]  ;;  %s6151_s3 = smov [#allocation5]  }
0x111b   :  { %v2372_v47 = vmul.f32 %v4643_v55, %v2366_v60  ;;  %v6047_v55 = vld [vmem:[#allocation2 + $0x80] sm:$0xff]  ;;  %s4533_s16 = sshll.u32 %s6151_s3, 4  ;;  %s4534_s16 = int_to_ptr.vmem [resolvable:$true] %s4533_s16 }
0x111c   :  { %v2379_v8 = vadd.f32 %v4644_v2, %v2373_v22  ;;  %s6117_s17 = scalar_lea.vmem %s4534_s16, 32  ;;  %p6122_p9 = scmp.lt.s32.totalorder %s4534_s16, %s4534_s16 }
0x111d   :  { %v2378_v24 = vadd.f32 %v4644_v2, %v2372_v47  ;;  %v6049_v47 = vld [vmem:[#allocation2 + $0x98] sm:$0xff]  ;;  %p6118_p8 = scmp.ne.s32.totalorder %s4534_s16, %s6117_s17  ;;  %p6123_p10 = scmp.lt.s32.totalorder %s6117_s17, %s6117_s17 }
0x111f   :  { %5254 = vmatprep.mubr.msk.f32.mxu1 %vm180_vm0, %v2378_v24  ;;  %p6124_p11 = por %p6123_p10, %p6122_p9 }
0x1120   :  { %5255 = vmatmul.mubr.msk.f32.vlgmr.msra.gmra.mrb[42].mxu1 %vm180_vm0, %v2379_v8 }
0x1121   :  { %p6125_p12 = pnand %p6124_p11, %p6118_p8 }
0x11f3   :  { %v5256_v28 = vpop.f32.mrb[42].mxu1 }
0x11f4   :  { %v2467_v13 = vadd.f32 %v5256_v28, %v4645_v12  ;;  %v2461_v33 = vpop.f32.mrb[43].mxu1 }
0x11f5   :  { %v2462_v3 = vadd.f32 %v4645_v12, %v2461_v33  ;;  %v6050_v33 = vld [vmem:[#allocation2 + $0x90] sm:$0xff] }
0x11f6   :  { %v2471_v29 = vmul.f32 %v6937_v54, %v2467_v13  ;;  %v2473_v43 = vmul.f32 %v6945_v21, %v2467_v13  ;;  %v2475_v30 = vmul.f32 %v6953_v25, %v2467_v13  ;;  %v2477_v41 = vmul.f32 %v6961_v56, %v2467_v13 }
0x11f7   :  { %v6925_v59 = vpack.i.bf16 %v2467_v13, %v2462_v3  ;;  %v2470_v39 = vmul.f32 %v6927_v0, %v2462_v3  ;;  %v2472_v26 = vmul.f32 %v6940_v42, %v2462_v3  ;;  %v2474_v15 = vmul.f32 %v6948_v63, %v2462_v3 }
0x11f8   :  { %v2476_v53 = vmul.f32 %v6956_v36, %v2462_v3  ;;  %v2478_v34 = vmul.f32 %v6964_v35, %v2462_v3  ;;  %v2479_v4 = vmul.f32 %v6969_v49, %v2467_v13  ;;  %v2480_v62 = vmul.f32 %v6972_v6, %v2462_v3 }
0x11f9   :  { %5710 = vrot.lane.b32.xlu0 %v6925_v59, %s6149_s2  ;;  %5261 = vmatprep.mubr.msk.f32.mxu1 %vm180_vm0, %v2470_v39  ;;  %v2481_v10 = vmul.f32 %v6977_v50, %v2467_v13  ;;  %v2482_v31 = vmul.f32 %v6980_v46, %v2462_v3  ;;  %v2483_v52 = vmul.f32 %v6985_v14, %v2467_v13  ;;  %v6051_v39 = vld [vmem:[#allocation2 + $0xa8] sm:$0xff] }
0x11fa   :  { %v2484_v7 = vmul.f32 %v6988_v58, %v2462_v3  ;;  %v2485_v51 = vmul.f32 %v6993_v11, %v2467_v13 }
0x126b   :  { %v5711_v38 = vpop.permute.xlu0 %5710 }
0x126c   :  { %v5713_v44 = vunpack.i.h.bf16 %v5711_v38  ;;  %v5712_v5 = vunpack.i.l.bf16 %v5711_v38 }
0x126e   :  { %v5589_v37 = vpack.c.bf16 %v5713_v44, %v5712_v5 }
0x1270   :  { %5591 = vmatprep.subr.msk.bf16.mxu1 %vm6244_vm3, %v5589_v37 }
0x1271   :  { %5594 = vmatpush3.bf16.xpose.msk.msra.mxu1 %vm6244_vm3, %v5589_v37 }
0x1278   :  { %5262 = vmatmul.mubr.msk.f32.vlgmr.msra.gmra.mrb[44].mxu1 %vm180_vm0, %v2471_v29 }
0x1279   :  { %5264 = vmatprep.mubr.msk.f32.mxu1 %vm180_vm0, %v2472_v26 }
0x127c   :  { %5265 = vmatmul.mubr.msk.f32.gmra.mrb[46].mxu1 %vm180_vm0, %v2473_v43  ;;  %v6052_v43 = vld [vmem:[#allocation2 + $0xa0] sm:$0xff] }
0x127d   :  { %5267 = vmatprep.mubr.msk.f32.mxu1 %vm180_vm0, %v2474_v15 }
0x1280   :  { %5268 = vmatmul.mubr.msk.f32.gmra.mrb[48].mxu1 %vm180_vm0, %v2475_v30 }
0x1281   :  { %5270 = vmatprep.mubr.msk.f32.mxu1 %vm180_vm0, %v2476_v53 }
0x1284   :  { %5271 = vmatmul.mubr.msk.f32.gmra.mrb[50].mxu1 %vm180_vm0, %v2477_v41 }
0x1285   :  { %5273 = vmatprep.mubr.msk.f32.mxu1 %vm180_vm0, %v2478_v34 }
0x1288   :  { %5274 = vmatmul.mubr.msk.f32.gmra.mrb[52].mxu1 %vm180_vm0, %v2479_v4 }
0x1289   :  { %5276 = vmatprep.mubr.msk.f32.mxu1 %vm180_vm0, %v2480_v62  ;;  %v6053_v62 = vld [vmem:[#allocation2 + $0xb8] sm:$0xff] }
0x128c   :  { %5277 = vmatmul.mubr.msk.f32.gmra.mrb[54].mxu1 %vm180_vm0, %v2481_v10 }
0x128d   :  { %5279 = vmatprep.mubr.msk.f32.mxu1 %vm180_vm0, %v2482_v31 }
0x1290   :  { %5280 = vmatmul.mubr.msk.f32.gmra.mrb[56].mxu1 %vm180_vm0, %v2483_v52 }
0x1291   :  { %5282 = vmatprep.mubr.msk.f32.mxu1 %vm180_vm0, %v2484_v7 }
0x1294   :  { %5283 = vmatmul.mubr.msk.f32.gmra.mrb[58].mxu1 %vm180_vm0, %v2485_v51 }
0x134b   :  { %v5263_v19 = vpop.f32.mrb[44].mxu1 }
0x134c   :  { %v2616_v1 = vadd.f32 %v6046_v18, %v5263_v19  ;;  %v2610_v23 = vpop.f32.mrb[45].mxu1  ;;  %v6054_v19 = vld [vmem:[#allocation2 + $0xb0] sm:$0xff] }
0x134d   :  { %v2611_v48 = vadd.f32 %v6047_v55, %v2610_v23 }
0x134e   :  { %v7003_v60 = vadd.f32 %v7000_v40, %v2616_v1 }
0x134f   :  { %v5266_v2 = vpop.f32.mrb[46].mxu1  ;;  %v7006_v22 = vadd.f32 %v7000_v40, %v2611_v48 }
0x1350   :  { %v2626_v24 = vadd.f32 %v6049_v47, %v5266_v2  ;;  %v2620_v8 = vpop.f32.mrb[47].mxu1  ;;  %v2708_v12 = vsel %vm88_vm2, %v7003_v60, -inf  ;;  %v6055_v2 = vld [vmem:[#allocation2 + $0xc8] sm:$0xff] }
0x1351   :  { %2709 = vmax.xlane.f32.xlu1 %v2708_v12  ;;  %v2621_v3 = vadd.f32 %v6050_v33, %v2620_v8  ;;  %v2705_v5 = vsel %vm88_vm2, %v7006_v22, -inf  ;;  %v6056_v33 = vld [vmem:[#allocation2 + $0xc0] sm:$0xff] }
0x1352   :  { %v7011_v13 = vadd.f32 %v7000_v40, %v2626_v24 }
0x1353   :  { %v5269_v28 = vpop.f32.mrb[48].mxu1  ;;  %v7019_v26 = vadd.f32 %v7000_v40, %v2621_v3 }
0x1354   :  { %v2636_v38 = vadd.f32 %v6051_v39, %v5269_v28  ;;  %v2630_v44 = vpop.f32.mrb[49].mxu1  ;;  %v2714_v41 = vsel %vm88_vm2, %v7011_v13, -inf }
0x1355   :  { %2706 = vmax.xlane.f32.xlu1 %v2705_v5  ;;  %v2631_v15 = vadd.f32 %v6052_v43, %v2630_v44  ;;  %v2711_v52 = vsel %vm88_vm2, %v7019_v26, -inf  ;;  %v6057_v44 = vld [vmem:[#allocation2 + $0xf0] sm:$0xff] }
0x1356   :  { %v7016_v37 = vadd.f32 %v7000_v40, %v2636_v38 }
0x1357   :  { %v5272_v29 = vpop.f32.mrb[50].mxu1  ;;  %v7026_v4 = vadd.f32 %v7000_v40, %v2631_v15  ;;  %v6058_v15 = vld [vmem:[#allocation2 + $0xd8] sm:$0xff] }
0x1358   :  { %v2640_v30 = vpop.f32.mrb[51].mxu1  ;;  %v2720_v53 = vsel %vm88_vm2, %v7016_v37, -inf  ;;  %v2646_v10 = vadd.f32 %v6053_v62, %v5272_v29  ;;  %v6059_v62 = vld [vmem:[#allocation2 + $0xd0] sm:$0xff] }
0x1359   :  { %2721 = vmax.xlane.f32.xlu0 %v2720_v53  ;;  %2715 = vmax.xlane.f32.xlu1 %v2714_v41  ;;  %v2641_v18 = vadd.f32 %v6054_v19, %v2640_v30  ;;  %v2717_v23 = vsel %vm88_vm2, %v7026_v4, -inf }
0x135a   :  { %v7031_v51 = vadd.f32 %v7000_v40, %v2646_v10 }
0x135b   :  { %v5275_v34 = vpop.f32.mrb[52].mxu1  ;;  %v7036_v48 = vadd.f32 %v7000_v40, %v2641_v18 }
0x135c   :  { %v2650_v31 = vpop.f32.mrb[53].mxu1  ;;  %v2656_v47 = vadd.f32 %v6055_v2, %v5275_v34  ;;  %v2726_v8 = vsel %vm88_vm2, %v7031_v51, -inf }
0x135d   :  { %2712 = vmax.xlane.f32.xlu1 %v2711_v52  ;;  %v2651_v3 = vadd.f32 %v6056_v33, %v2650_v31  ;;  %v2723_v38 = vsel %vm88_vm2, %v7036_v48, -inf  ;;  %v6062_v33 = vld [vmem:[#allocation2 + $0xf8] sm:$0xff] }
0x135e   :  { %v7041_v28 = vadd.f32 %v7000_v40, %v2656_v47 }
0x135f   :  { %v5278_v7 = vpop.f32.mrb[54].mxu1  ;;  %v7049_v43 = vadd.f32 %v7000_v40, %v2651_v3 }
0x1360   :  { %v2660_v1 = vpop.f32.mrb[55].mxu1  ;;  %v2666_v30 = vadd.f32 %v6058_v15, %v5278_v7  ;;  %v2732_v53 = vsel %vm88_vm2, %v7041_v28, -inf  ;;  %v6060_v7 = vld [vmem:[#allocation2 + $0xe0] sm:$0xff] }
0x1361   :  { %2718 = vmax.xlane.f32.xlu1 %v2717_v23  ;;  %v2661_v10 = vadd.f32 %v6059_v62, %v2660_v1  ;;  %v2729_v31 = vsel %vm88_vm2, %v7049_v43, -inf  ;;  %v6061_v23 = vld [vmem:[#allocation2 + $0xe8] sm:$0xff] }
0x1362   :  { %v7056_v34 = vadd.f32 %v7000_v40, %v2666_v30 }
0x1363   :  { %v5281_v55 = vpop.f32.mrb[56].mxu1  ;;  %v7061_v52 = vadd.f32 %v7000_v40, %v2661_v10 }
0x1364   :  { %v2670_v24 = vpop.f32.mrb[57].mxu1  ;;  %v2738_v18 = vsel %vm88_vm2, %v7056_v34, -inf  ;;  %v2676_v2 = vadd.f32 %v6061_v23, %v5281_v55 }
0x1365   :  { %2727 = vmax.xlane.f32.xlu1 %v2726_v8  ;;  %v2671_v19 = vadd.f32 %v6060_v7, %v2670_v24  ;;  %v2735_v1 = vsel %vm88_vm2, %v7061_v52, -inf }
0x1366   :  { %v7071_v8 = vadd.f32 %v7000_v40, %v2676_v2 }
0x1367   :  { %v5284_v12 = vpop.f32.mrb[58].mxu1  ;;  %v7066_v47 = vadd.f32 %v7000_v40, %v2671_v19 }
0x1368   :  { %v2680_v39 = vpop.f32.mrb[59].mxu1  ;;  %v2686_v3 = vadd.f32 %v6062_v33, %v5284_v12  ;;  %v2744_v55 = vsel %vm88_vm2, %v7071_v8, -inf }
0x1369   :  { %v2681_v5 = vadd.f32 %v6057_v44, %v2680_v39  ;;  %2724 = vmax.xlane.f32.xlu1 %v2723_v38  ;;  %v2741_v24 = vsel %vm88_vm2, %v7066_v47, -inf }
0x136a   :  { %v7076_v39 = vadd.f32 %v7000_v40, %v2686_v3 }
0x136b   :  { %v7046_v29 = vadd.f32 %v7000_v40, %v2681_v5 }
0x136c   :  { %v2750_v38 = vsel %vm88_vm2, %v7076_v39, -inf }
0x136d   :  { %2733 = vmax.xlane.f32.xlu1 %v2732_v53  ;;  %v2747_v41 = vsel %vm88_vm2, %v7046_v29, -inf }
0x136e   :  { %2748 = vmax.xlane.f32.xlu0 %v2747_v41 }
0x1371   :  { %2730 = vmax.xlane.f32.xlu1 %v2729_v31 }
0x1375   :  { %2739 = vmax.xlane.f32.xlu1 %v2738_v18 }
0x1379   :  { %2736 = vmax.xlane.f32.xlu1 %v2735_v1 }
0x137d   :  { %2742 = vmax.xlane.f32.xlu1 %v2741_v24 }
0x1381   :  { %2745 = vmax.xlane.f32.xlu1 %v2744_v55 }
0x1385   :  { %2751 = vmax.xlane.f32.xlu1 %v2750_v38 }
0x13de   :  { %v2710_v44 = vpop.xlane.xlu1 %2709 }
0x13df   :  { %v2754_v5 = vsub.f32 %v7003_v60, %v2710_v44 }
0x13e1   :  { %v2771_v15 = vmul.f32 1.442695, %v2754_v5 }
0x13e2   :  { %v2707_v12 = vpop.xlane.xlu1 %2706 }
0x13e3   :  { %5874 = vpow2.f32 %v2771_v15  ;;  %v2753_v30 = vsub.f32 %v7006_v22, %v2707_v12 }
0x13e5   :  { %v2769_v53 = vmul.f32 1.442695, %v2753_v30 }
0x13e6   :  { %v2722_v41 = vpop.xlane.xlu0 %2721  ;;  %v2716_v40 = vpop.xlane.xlu1 %2715 }
0x13e7   :  { %5876 = vpow2.f32 %v2769_v53  ;;  %v2758_v62 = vsub.f32 %v7016_v37, %v2722_v41  ;;  %v2756_v10 = vsub.f32 %v7011_v13, %v2716_v40 }
0x13e9   :  { %v2775_v31 = vmul.f32 1.442695, %v2756_v10  ;;  %v2779_v7 = vmul.f32 1.442695, %v2758_v62 }
0x13ea   :  { %v2713_v19 = vpop.xlane.xlu1 %2712 }
0x13eb   :  { %v2755_v18 = vsub.f32 %v7019_v26, %v2713_v19  ;;  %5878 = vpow2.f32 %v2775_v31 }
0x13ec   :  { %5880 = vpow2.f32 %v2779_v7 }
0x13ed   :  { %v7087_v60 = vpop.eup %5874  ;;  %v2773_v23 = vmul.f32 1.442695, %v2755_v18 }
0x13ee   :  { %v2719_v2 = vpop.xlane.xlu1 %2718  ;;  %v2804_v22 = vsel %vm88_vm2, %v7087_v60, 0.0 }
0x13ef   :  { %5882 = vpow2.f32 %v2773_v23  ;;  %v2757_v1 = vsub.f32 %v7026_v4, %v2719_v2  ;;  %2805 = vadd.xlane.f32.xlu1 %v2804_v22 }
0x13f1   :  { %v7092_v37 = vpop.eup %5876  ;;  %v2777_v13 = vmul.f32 1.442695, %v2757_v1 }
0x13f2   :  { %v2728_v33 = vpop.xlane.xlu1 %2727  ;;  %v2801_v26 = vsel %vm88_vm2, %v7092_v37, 0.0 }
0x13f3   :  { %5884 = vpow2.f32 %v2777_v13  ;;  %v2760_v3 = vsub.f32 %v7031_v51, %v2728_v33  ;;  %2802 = vadd.xlane.f32.xlu0 %v2801_v26 }
0x13f5   :  { %v2783_v24 = vmul.f32 1.442695, %v2760_v3  ;;  %v7097_v55 = vpop.eup %5878 }
0x13f6   :  { %v2725_v38 = vpop.xlane.xlu1 %2724  ;;  %v2810_v4 = vsel %vm88_vm2, %v7097_v55, 0.0  ;;  %v7102_v5 = vpop.eup %5880 }
0x13f7   :  { %5886 = vpow2.f32 %v2783_v24  ;;  %v2759_v44 = vsub.f32 %v7036_v48, %v2725_v38  ;;  %2811 = vadd.xlane.f32.xlu1 %v2810_v4  ;;  %v2816_v41 = vsel %vm88_vm2, %v7102_v5, 0.0 }
0x13f9   :  { %v7104_v15 = vpop.eup %5882  ;;  %v2781_v12 = vmul.f32 1.442695, %v2759_v44 }
0x13fa   :  { %v2734_v30 = vpop.xlane.xlu1 %2733  ;;  %v2807_v51 = vsel %vm88_vm2, %v7104_v15, 0.0 }
0x13fb   :  { %5888 = vpow2.f32 %v2781_v12  ;;  %v2762_v53 = vsub.f32 %v7041_v28, %v2734_v30  ;;  %2808 = vadd.xlane.f32.xlu0 %v2807_v51  ;;  %2817 = vadd.xlane.f32.xlu1 %v2816_v41  ;;  %v2749_v44 = vpop.xlane.xlu0 %2748 }
0x13fc   :  { %v2767_v51 = vsub.f32 %v7046_v29, %v2749_v44 }
0x13fd   :  { %v7111_v48 = vpop.eup %5884  ;;  %v2787_v40 = vmul.f32 1.442695, %v2762_v53 }
0x13fe   :  { %v2731_v62 = vpop.xlane.xlu1 %2730  ;;  %v2813_v10 = vsel %vm88_vm2, %v7111_v48, 0.0 }
0x13ff   :  { %5890 = vpow2.f32 %v2787_v40  ;;  %v2761_v31 = vsub.f32 %v7049_v43, %v2731_v62  ;;  %2814 = vadd.xlane.f32.xlu0 %v2813_v10  ;;  %v2797_v10 = vmul.f32 1.442695, %v2767_v51 }
0x1401   :  { %v7116_v7 = vpop.eup %5886  ;;  %v2785_v19 = vmul.f32 1.442695, %v2761_v31 }
0x1402   :  { %v2740_v28 = vpop.xlane.xlu1 %2739  ;;  %v2822_v18 = vsel %vm88_vm2, %v7116_v7, 0.0 }
0x1403   :  { %5892 = vpow2.f32 %v2785_v19  ;;  %v2764_v23 = vsub.f32 %v7056_v34, %v2740_v28  ;;  %2823 = vadd.xlane.f32.xlu1 %v2822_v18 }
0x1405   :  { %v7121_v2 = vpop.eup %5888  ;;  %v2791_v22 = vmul.f32 1.442695, %v2764_v23 }
0x1406   :  { %v2737_v1 = vpop.xlane.xlu1 %2736  ;;  %v2819_v13 = vsel %vm88_vm2, %v7121_v2, 0.0 }
0x1407   :  { %5894 = vpow2.f32 %v2791_v22  ;;  %v2763_v43 = vsub.f32 %v7061_v52, %v2737_v1  ;;  %2820 = vadd.xlane.f32.xlu0 %v2819_v13 }
0x1409   :  { %v7126_v33 = vpop.eup %5890  ;;  %v2789_v26 = vmul.f32 1.442695, %v2763_v43 }
0x140a   :  { %v2743_v3 = vpop.xlane.xlu1 %2742  ;;  %v2828_v24 = vsel %vm88_vm2, %v7126_v33, 0.0 }
0x140b   :  { %5896 = vpow2.f32 %v2789_v26  ;;  %2829 = vadd.xlane.f32.xlu1 %v2828_v24  ;;  %v2765_v38 = vsub.f32 %v7066_v47, %v2743_v3 }
0x140d   :  { %v7130_v34 = vpop.eup %5892  ;;  %v2793_v53 = vmul.f32 1.442695, %v2765_v38 }
0x140e   :  { %v2746_v4 = vpop.xlane.xlu1 %2745  ;;  %v2825_v12 = vsel %vm88_vm2, %v7130_v34, 0.0 }
0x140f   :  { %v2766_v52 = vsub.f32 %v7071_v8, %v2746_v4  ;;  %2826 = vadd.xlane.f32.xlu0 %v2825_v12 }
0x1411   :  { %v7136_v30 = vpop.eup %5894  ;;  %v2795_v41 = vmul.f32 1.442695, %v2766_v52 }
0x1412   :  { %v2752_v40 = vpop.xlane.xlu1 %2751  ;;  %v2834_v62 = vsel %vm88_vm2, %v7136_v30, 0.0 }
0x1413   :  { %5898 = vpow2.f32 %v2795_v41  ;;  %2835 = vadd.xlane.f32.xlu1 %v2834_v62  ;;  %v2768_v31 = vsub.f32 %v7076_v39, %v2752_v40 }
0x1414   :  { %5900 = vpow2.f32 %v2793_v53 }
0x1415   :  { %v7141_v47 = vpop.eup %5896  ;;  %5902 = vpow2.f32 %v2797_v10  ;;  %v2799_v29 = vmul.f32 1.442695, %v2768_v31 }
0x1416   :  { %v2831_v8 = vsel %vm88_vm2, %v7141_v47, 0.0 }
0x1417   :  { %2832 = vadd.xlane.f32.xlu0 %v2831_v8  ;;  %5904 = vpow2.f32 %v2799_v29  ;;  %v3332_v8 = vld [vmem:[#allocation2 + $0x348] sm:$0xff]  ;;  %v3333_v29 = vld [vmem:[#allocation2 + $0x350] sm:$0xff] }
0x141d   :  { %v7146_v19 = vpop.eup %5898 }
0x141e   :  { %v2840_v28 = vsel %vm88_vm2, %v7146_v19, 0.0  ;;  %v7150_v18 = vpop.eup %5900 }
0x141f   :  { %2841 = vadd.xlane.f32.xlu1 %v2840_v28  ;;  %v2837_v23 = vsel %vm88_vm2, %v7150_v18, 0.0  ;;  %v7154_v22 = vpop.eup %5902 }
0x1420   :  { %v2843_v39 = vsel %vm88_vm2, %v7154_v22, 0.0 }
0x1421   :  { %v7158_v1 = vpop.eup %5904 }
0x1422   :  { %v2846_v13 = vsel %vm88_vm2, %v7158_v1, 0.0 }
0x1423   :  { %2838 = vadd.xlane.f32.xlu1 %v2837_v23 }
0x1427   :  { %2844 = vadd.xlane.f32.xlu1 %v2843_v39 }
0x142b   :  { %2847 = vadd.xlane.f32.xlu1 %v2846_v13  ;;  %v5616_v13 = vpack.c.bf16 %v3333_v29, %v3332_v8 }
0x142d   :  { %5715 = vrot.lane.b32.xlu0 %v6925_v59, %s6150_s13 }
0x147c   :  { %v2806_v24 = vpop.xlane.xlu1 %2805 }
0x1480   :  { %v2803_v43 = vpop.xlane.xlu0 %2802 }
0x1481   :  { %5906 = vrcp.f32 %v2803_v43 }
0x1482   :  { %5908 = vrcp.f32 %v2806_v24 }
0x1484   :  { %v2812_v44 = vpop.xlane.xlu1 %2811 }
0x1488   :  { %v2809_v38 = vpop.xlane.xlu0 %2808  ;;  %v2818_v12 = vpop.xlane.xlu1 %2817 }
0x1489   :  { %5910 = vrcp.f32 %v2809_v38 }
0x148a   :  { %5912 = vrcp.f32 %v2812_v44 }
0x148b   :  { %v5907_v26 = vpop.eup %5906 }
0x148c   :  { %v2865_v3 = vmul.f32 %v5907_v26, %v7092_v37  ;;  %v2815_v4 = vpop.xlane.xlu0 %2814  ;;  %v5909_v28 = vpop.eup %5908  ;;  %v3334_v26 = vld [vmem:[#allocation2 + $0x358] sm:$0xff] }
0x148d   :  { %5914 = vrcp.f32 %v2815_v4  ;;  %v2866_v43 = vmul.f32 %v5909_v28, %v7087_v60 }
0x148e   :  { %5289 = vmatprep.mubr.msk.f32.mxu0 %vm88_vm2, %v2865_v3  ;;  %5916 = vrcp.f32 %v2818_v12  ;;  %v3335_v3 = vld [vmem:[#allocation2 + $0x360] sm:$0xff] }
0x148f   :  { %v5619_v12 = vpack.c.bf16 %v3335_v3, %v3334_v26  ;;  %v3243_v26 = vld [vmem:[#allocation2 + $0x32f] sm:$0xff] }
0x1490   :  { %v2824_v51 = vpop.xlane.xlu1 %2823 }
0x1493   :  { %v5911_v39 = vpop.eup %5910 }
0x1494   :  { %v2821_v52 = vpop.xlane.xlu0 %2820  ;;  %v5913_v24 = vpop.eup %5912  ;;  %v2867_v44 = vmul.f32 %v5911_v39, %v7104_v15 }
0x1495   :  { %5918 = vrcp.f32 %v2821_v52  ;;  %v2868_v60 = vmul.f32 %v5913_v24, %v7097_v55 }
0x1496   :  { %5920 = vrcp.f32 %v2824_v51 }
0x1497   :  { %v5915_v4 = vpop.eup %5914 }
0x1498   :  { %v2830_v41 = vpop.xlane.xlu1 %2829  ;;  %v5917_v52 = vpop.eup %5916  ;;  %v2869_v51 = vmul.f32 %v5915_v4, %v7111_v48 }
0x1499   :  { %v2870_v15 = vmul.f32 %v5917_v52, %v7102_v5 }
0x149c   :  { %v2827_v53 = vpop.xlane.xlu0 %2826 }
0x149d   :  { %5922 = vrcp.f32 %v2827_v53 }
0x149e   :  { %5924 = vrcp.f32 %v2830_v41 }
0x149f   :  { %v5919_v53 = vpop.eup %5918 }
0x14a0   :  { %v2836_v59 = vpop.xlane.xlu1 %2835  ;;  %v5921_v41 = vpop.eup %5920 }
0x14a4   :  { %v2833_v40 = vpop.xlane.xlu0 %2832 }
0x14a5   :  { %5926 = vrcp.f32 %v2833_v40  ;;  %v2871_v40 = vmul.f32 %v5919_v53, %v7121_v2 }
0x14a6   :  { %5928 = vrcp.f32 %v2836_v59 }
0x14a7   :  { %v5923_v55 = vpop.eup %5922 }
0x14a8   :  { %v5716_v62 = vpop.permute.xlu0 %5715  ;;  %v5925_v59 = vpop.eup %5924 }
0x14a9   :  { %v5718_v10 = vunpack.i.h.bf16 %v5716_v62  ;;  %v5717_v37 = vunpack.i.l.bf16 %v5716_v62  ;;  %v2874_v5 = vmul.f32 %v5925_v59, %v7126_v33 }
0x14ab   :  { %v5595_v31 = vpack.c.bf16 %v5718_v10, %v5717_v37  ;;  %v2872_v10 = vmul.f32 %v5921_v41, %v7116_v7  ;;  %v2873_v37 = vmul.f32 %v5923_v55, %v7130_v34 }
0x14ac   :  { %v2842_v23 = vpop.xlane.xlu1 %2841 }
0x14ad   :  { %5596 = vmatprep.subr.bf16.mxu0 %v5595_v31 }
0x14ae   :  { %5598 = vmatpush3.bf16.msra.mxu0 %v5595_v31 }
0x14af   :  { %5615 = vmatprep.subr.bf16.mxu0 %v6146_v17  ;;  %v5927_v31 = vpop.eup %5926 }
0x14b0   :  { %v2839_v38 = vpop.xlane.xlu1 %2838  ;;  %v5929_v2 = vpop.eup %5928  ;;  %v2875_v8 = vmul.f32 %v5927_v31, %v7141_v47 }
0x14b1   :  { %5290 = vmatmul.mubr.msk.f32.vlgmr.msra.gmra.mrb[46].mxu0 %vm88_vm2, %v2866_v43  ;;  %5930 = vrcp.f32 %v2839_v38  ;;  %v2876_v7 = vmul.f32 %v5929_v2, %v7136_v30  ;;  %v3110_v30 = vld [vmem:[#allocation2 + $0x306] sm:$0xff] }
0x14b2   :  { %5292 = vmatprep.mubr.msk.f32.mxu0 %vm88_vm2, %v2867_v44  ;;  %5617 = vmatpush3.bf16.msra.mxu0 %v5616_v13  ;;  %5932 = vrcp.f32 %v2842_v23  ;;  %v3242_v43 = vld [vmem:[#allocation2 + $0x327] sm:$0xff] }
0x14b3   :  { %5618 = vmatprep.subr.bf16.mxu0 %v6146_v17  ;;  %v5607_v3 = vpack.c.bf16 %v3243_v26, %v3242_v43 }
0x14b4   :  { %v2845_v62 = vpop.xlane.xlu1 %2844 }
0x14b5   :  { %5293 = vmatmul.mubr.msk.f32.gmra.mrb[48].mxu0 %vm88_vm2, %v2868_v60  ;;  %5934 = vrcp.f32 %v2845_v62 }
0x14b6   :  { %5295 = vmatprep.mubr.msk.f32.mxu0 %vm88_vm2, %v2869_v51  ;;  %5620 = vmatpush3.bf16.msra.mxu0 %v5619_v12 }
0x14b8   :  { %v2848_v48 = vpop.xlane.xlu1 %2847 }
0x14b9   :  { %5296 = vmatmul.mubr.msk.f32.gmra.mrb[50].mxu0 %vm88_vm2, %v2870_v15  ;;  %5936 = vrcp.f32 %v2848_v48 }
0x14ba   :  { %5298 = vmatprep.mubr.msk.f32.mxu0 %vm88_vm2, %v2871_v40 }
0x14bb   :  { %v5931_v29 = vpop.eup %5930 }
0x14bc   :  { %v5933_v28 = vpop.eup %5932  ;;  %v2877_v34 = vmul.f32 %v5931_v29, %v7150_v18 }
0x14bd   :  { %5299 = vmatmul.mubr.msk.f32.gmra.mrb[52].mxu0 %vm88_vm2, %v2872_v10  ;;  %v2878_v33 = vmul.f32 %v5933_v28, %v7146_v19  ;;  %v3111_v19 = vld [vmem:[#allocation2 + $0x30e] sm:$0xff] }
0x14be   :  { %5301 = vmatprep.mubr.msk.f32.mxu0 %vm88_vm2, %v2873_v37  ;;  %v5599_v18 = vpack.c.bf16 %v3111_v19, %v3110_v30 }
0x14bf   :  { %v5935_v23 = vpop.eup %5934 }
0x14c0   :  { %v2879_v47 = vmul.f32 %v5935_v23, %v7154_v22  ;;  %5600 = vmatprep.subr.bf16.mxu1 %v5599_v18  ;;  %v3112_v22 = vld [vmem:[#allocation2 + $0x316] sm:$0xff] }
0x14c1   :  { %5302 = vmatmul.mubr.msk.f32.gmra.mrb[54].mxu0 %vm88_vm2, %v2874_v5  ;;  %5602 = vmatpush3.bf16.msra.mxu1 %v5599_v18 }
0x14c2   :  { %5304 = vmatprep.mubr.msk.f32.mxu0 %vm88_vm2, %v2875_v8 }
0x14c3   :  { %v5937_v39 = vpop.eup %5936 }
0x14c4   :  { %v2880_v13 = vmul.f32 %v5937_v39, %v7158_v1  ;;  %v3113_v1 = vld [vmem:[#allocation2 + $0x31e] sm:$0xff] }
0x14c5   :  { %5305 = vmatmul.mubr.msk.f32.gmra.mrb[56].mxu0 %vm88_vm2, %v2876_v7 }
0x14c6   :  { %5307 = vmatprep.mubr.msk.f32.mxu0 %vm88_vm2, %v2877_v34 }
0x14c9   :  { %5308 = vmatmul.mubr.msk.f32.gmra.mrb[58].mxu0 %vm88_vm2, %v2878_v33 }
0x14ca   :  { %5310 = vmatprep.mubr.msk.f32.mxu0 %vm88_vm2, %v2879_v47 }
0x14cd   :  { %5311 = vmatmul.mubr.msk.f32.gmra.mrb[60].mxu0 %vm88_vm2, %v2880_v13 }
0x14ce   :  { %5343 = vmatprep.mubr.msk.f32.mxu0 %vm6147_vm1, %v6148_v20 }
0x14d1   :  { %5344 = vmatmul.mubr.msk.f32.vlgmr.msra.gmra.mrb[62].mxu0 %vm180_vm0, %v6567_v32  ;;  %v5603_v32 = vpack.c.bf16 %v3113_v1, %v3112_v22 }
0x14d2   :  { %5346 = vmatprep.mubr.msk.f32.mxu0 %vm6147_vm1, %v6148_v20 }
0x14d3   :  { %5604 = vmatprep.subr.bf16.mxu1 %v5603_v32 }
0x14d4   :  { %5606 = vmatpush3.bf16.msra.mxu1 %v5603_v32 }
0x14d5   :  { %5347 = vmatmul.mubr.msk.f32.gmra.mrb[64].mxu0 %vm180_vm0, %v6573_v27  ;;  %5608 = vmatprep.subr.bf16.mxu1 %v5607_v3 }
0x14d6   :  { %5349 = vmatprep.mubr.msk.f32.mxu0 %vm6147_vm1, %v6148_v20 }
0x14d9   :  { %5350 = vmatmul.mubr.msk.f32.gmra.mrb[66].mxu0 %vm180_vm0, %v6579_v45 }
0x1584   :  { %v5291_v27 = vpop.f32.mrb[46].mxu0 }
0x1585   :  { %v3001_v24 = vpop.f32.mrb[47].mxu0  ;;  %v3081_v44 = vmul.f32 %v6937_v54, %v5291_v27 }
0x1586   :  { %v3080_v12 = vmul.f32 %v6927_v0, %v3001_v24 }
0x1588   :  { %v5294_v38 = vpop.f32.mrb[48].mxu0 }
0x1589   :  { %v3083_v45 = vmul.f32 %v6945_v21, %v5294_v38  ;;  %v3011_v4 = vpop.f32.mrb[49].mxu0 }
0x158a   :  { %v3082_v60 = vmul.f32 %v6940_v42, %v3011_v4 }
0x158b   :  { %v3097_v52 = vadd.f32 %v3083_v45, %v3081_v44  ;;  %v3244_v44 = vld [vmem:[#allocation2 + $0x337] sm:$0xff]  ;;  %v3245_v45 = vld [vmem:[#allocation2 + $0x33f] sm:$0xff] }
0x158c   :  { %v3096_v51 = vadd.f32 %v3082_v60, %v3080_v12  ;;  %v5297_v53 = vpop.f32.mrb[50].mxu0 }
0x158d   :  { %v3085_v62 = vmul.f32 %v6953_v25, %v5297_v53  ;;  %v3021_v15 = vpop.f32.mrb[51].mxu0  ;;  %v4690_v53 = vld [vmem:[#allocation2 + $0x368] ss:$0 sm:$0xff] }
0x158e   :  { %v3084_v41 = vmul.f32 %v6948_v63, %v3021_v15 }
0x158f   :  { %v3099_v40 = vadd.f32 %v3097_v52, %v3085_v62 }
0x1590   :  { %v3098_v55 = vadd.f32 %v3096_v51, %v3084_v41  ;;  %v5300_v48 = vpop.f32.mrb[52].mxu0  ;;  %v5611_v51 = vpack.c.bf16 %v3245_v45, %v3244_v44  ;;  %v4686_v45 = vld [vmem:[#allocation2 + $0x2e2] ss:$0 sm:$0xff] }
0x1591   :  { %v3087_v10 = vmul.f32 %v6961_v56, %v5300_v48  ;;  %v3031_v59 = vpop.f32.mrb[53].mxu0 }
0x1592   :  { %v3086_v37 = vmul.f32 %v6956_v36, %v3031_v59 }
0x1593   :  { %v3101_v31 = vadd.f32 %v3099_v40, %v3087_v10 }
0x1594   :  { %v3100_v5 = vadd.f32 %v3098_v55, %v3086_v37  ;;  %v5303_v2 = vpop.f32.mrb[54].mxu0 }
0x1595   :  { %v3089_v8 = vmul.f32 %v6969_v49, %v5303_v2  ;;  %v3041_v29 = vpop.f32.mrb[55].mxu0 }
0x1596   :  { %v3088_v7 = vmul.f32 %v6964_v35, %v3041_v29 }
0x1597   :  { %v3103_v28 = vadd.f32 %v3101_v31, %v3089_v8 }
0x1598   :  { %v3102_v34 = vadd.f32 %v3100_v5, %v3088_v7  ;;  %v5306_v23 = vpop.f32.mrb[56].mxu0 }
0x1599   :  { %v3091_v33 = vmul.f32 %v6977_v50, %v5306_v23  ;;  %v3051_v39 = vpop.f32.mrb[57].mxu0 }
0x159a   :  { %v3090_v47 = vmul.f32 %v6972_v6, %v3051_v39 }
0x159b   :  { %v3105_v13 = vadd.f32 %v3103_v28, %v3091_v33 }
0x159c   :  { %v3104_v30 = vadd.f32 %v3102_v34, %v3090_v47  ;;  %v5309_v19 = vpop.f32.mrb[58].mxu0 }
0x159d   :  { %v3093_v18 = vmul.f32 %v6985_v14, %v5309_v19  ;;  %v3061_v22 = vpop.f32.mrb[59].mxu0 }
0x159e   :  { %v3092_v1 = vmul.f32 %v6980_v46, %v3061_v22 }
0x159f   :  { %v3107_v32 = vadd.f32 %v3105_v13, %v3093_v18 }
0x15a0   :  { %v3106_v43 = vadd.f32 %v3104_v30, %v3092_v1  ;;  %v5312_v26 = vpop.f32.mrb[60].mxu0 }
0x15a1   :  { %v3095_v27 = vmul.f32 %v6993_v11, %v5312_v26  ;;  %v3071_v24 = vpop.f32.mrb[61].mxu0 }
0x15a2   :  { %v3094_v38 = vmul.f32 %v6988_v58, %v3071_v24 }
0x15a3   :  { %v3109_v4 = vadd.f32 %v3107_v32, %v3095_v27 }
0x15a4   :  { %v3108_v12 = vadd.f32 %v3106_v43, %v3094_v38  ;;  %v3407_v60 = vpop.f32.mrb[62].mxu0  ;;  %v4685_v38 = vld [vmem:[#allocation2 + $0x2e1] ss:$0 sm:$0xff] }
0x15a5   :  { %v5345_v52 = vpop.f32.mrb[63].mxu0  ;;  %v7228_v15 = vadd.f32 %v4690_v53, %v3407_v60 }
0x15a6   :  { %5321 = vmatprep.mubr.msk.f32.mxu1 %vm180_vm0, %v3108_v12 }
0x15a7   :  { %5322 = vmatmul.mubr.msk.f32.vlgmr.msra.gmra.mrb[60].mxu1 %vm180_vm0, %v3109_v4 }
0x15a8   :  { %5610 = vmatpush3.bf16.msra.mxu1 %v5607_v3  ;;  %v3412_v62 = vpop.f32.mrb[64].mxu0  ;;  %v4682_v3 = vld [vmem:[#allocation2 + $0x326] ss:$0 sm:$0xff] }
0x15a9   :  { %v7230_v41 = vadd.f32 %v4690_v53, %v3412_v62  ;;  %v5348_v40 = vpop.f32.mrb[65].mxu0  ;;  %5612 = vmatprep.subr.bf16.mxu1 %v5611_v51  ;;  %v4687_v62 = vld [vmem:[#allocation2 + $0x347] ss:$0 sm:$0xff] }
0x15ab   :  { %v5719_v55 = vpack.i.bf16 %v7230_v41, %v7228_v15  ;;  %v5621_v48 = vpack.c.bf16 %v7230_v41, %v7228_v15 }
0x15ac   :  { %5614 = vmatpush3.bf16.msra.mxu1 %v5611_v51  ;;  %v3417_v10 = vpop.f32.mrb[66].mxu0 }
0x15ad   :  { %v7236_v59 = vadd.f32 %v4690_v53, %v3417_v10  ;;  %v5351_v37 = vpop.f32.mrb[67].mxu0  ;;  %5623 = vmatprep.subr.msk.bf16.mxu1 %vm6244_vm3, %v5621_v48 }
0x167a   :  { %v5323_v31 = vpop.f32.mrb[60].mxu1 }
0x167b   :  { %v3191_v5 = vpop.f32.mrb[61].mxu1  ;;  %v3197_v2 = vadd.f32 %v5323_v31, %v4682_v3 }
0x167c   :  { %v3192_v8 = vadd.f32 %v4682_v3, %v3191_v5 }
0x167d   :  { %v7244_v7 = vadd.f32 %v3197_v2, %v6911_v9 }
0x167e   :  { %v7241_v29 = vadd.f32 %v3192_v8, %v6913_v57 }
0x167f   :  { %v3207_v34 = vsel %vm180_vm0, %v7244_v7, 0.0 }
0x1680   :  { %v3204_v28 = vsel %vm180_vm0, %v7241_v29, 0.0 }
0x1681   :  { %3205 = vadd.xlane.f32.xlu1 %v3204_v28 }
0x1685   :  { %3208 = vadd.xlane.f32.xlu1 %v3207_v34  ;;  %v6064_v34 = vld [vmem:[#allocation2 + $0x100] sm:$0xff] }
0x170e   :  { %v3206_v23 = vpop.xlane.xlu1 %3205 }
0x170f   :  { %v3210_v33 = vmul.f32 0.03125, %v3206_v23 }
0x1711   :  { %v3212_v39 = vsub.f32 %v7241_v29, %v3210_v33 }
0x1712   :  { %v3209_v47 = vpop.xlane.xlu1 %3208 }
0x1713   :  { %v3211_v13 = vmul.f32 0.03125, %v3209_v47  ;;  %v3214_v30 = vmul.f32 %v3212_v39, %v3212_v39 }
0x1715   :  { %v3213_v57 = vsub.f32 %v7244_v7, %v3211_v13  ;;  %v3216_v9 = vsel %vm180_vm0, %v3214_v30, 0.0 }
0x1716   :  { %3217 = vadd.xlane.f32.xlu0 %v3216_v9  ;;  %v6066_v9 = vld [vmem:[#allocation2 + $0x110] sm:$0xff] }
0x1717   :  { %v3215_v19 = vmul.f32 %v3213_v57, %v3213_v57 }
0x1719   :  { %v3219_v18 = vsel %vm180_vm0, %v3215_v19, 0.0 }
0x171a   :  { %3220 = vadd.xlane.f32.xlu1 %v3219_v18 }
0x17a3   :  { %v3218_v22 = vpop.xlane.xlu0 %3217 }
0x17a4   :  { %v3222_v1 = vmul.f32 0.03125, %v3218_v22 }
0x17a6   :  { %v3224_v32 = vadd.f32 1e-05, %v3222_v1 }
0x17a7   :  { %v3221_v43 = vpop.xlane.xlu1 %3220 }
0x17a8   :  { %5938 = vrsqrt.f32 %v3224_v32  ;;  %v3223_v26 = vmul.f32 0.03125, %v3221_v43  ;;  %v6067_v43 = vld [vmem:[#allocation2 + $0x120] sm:$0xff] }
0x17aa   :  { %v3225_v27 = vadd.f32 1e-05, %v3223_v26 }
0x17ac   :  { %5940 = vrsqrt.f32 %v3225_v27 }
0x17b2   :  { %v5939_v24 = vpop.eup %5938 }
0x17b3   :  { %v3228_v44 = vmul.f32 %v5939_v24, %v3212_v39  ;;  %v6065_v39 = vld [vmem:[#allocation2 + $0x118] sm:$0xff] }
0x17b5   :  { %v3234_v4 = vmul.f32 %v4685_v38, %v3228_v44 }
0x17b6   :  { %v5941_v12 = vpop.eup %5940 }
0x17b7   :  { %v3229_v60 = vmul.f32 %v5941_v12, %v3213_v57  ;;  %v3240_v52 = vadd.f32 %v4686_v45, %v3234_v4  ;;  %v6069_v12 = vld [vmem:[#allocation2 + $0x128] sm:$0xff] }
0x17b9   :  { %v3235_v51 = vmul.f32 %v4685_v38, %v3229_v60  ;;  %5332 = vmatprep.mubr.msk.f32.mxu1 %vm180_vm0, %v3240_v52  ;;  %v6068_v38 = vld [vmem:[#allocation2 + $0x130] sm:$0xff] }
0x17bb   :  { %v3241_v53 = vadd.f32 %v4686_v45, %v3235_v51 }
0x17bd   :  { %5333 = vmatmul.mubr.msk.f32.vlgmr.msra.gmra.mrb[62].mxu1 %vm180_vm0, %v3241_v53 }
0x17be   :  { %5626 = vmatpush3.bf16.xpose.msk.msra.mxu1 %vm6244_vm3, %v5621_v48 }
0x17bf   :  { %5356 = vmatprep.subr.msk.mxu1 %vm180_vm0, %v7236_v59 }
0x17c6   :  { %5357 = vmatpush3.xpose.msk.msra.mxu1 %vm180_vm0, %v7236_v59 }
0x1890   :  { %v5334_v40 = vpop.f32.mrb[62].mxu1 }
0x1891   :  { %v3329_v10 = vadd.f32 %v5334_v40, %v4687_v62  ;;  %v3323_v37 = vpop.f32.mrb[63].mxu1 }
0x1892   :  { %v3324_v3 = vadd.f32 %v4687_v62, %v3323_v37  ;;  %v6070_v62 = vld [vmem:[#allocation2 + $0x140] sm:$0xff] }
0x1893   :  { %v3422_v5 = vmul.f32 %v6937_v54, %v3329_v10  ;;  %v3424_v48 = vmul.f32 %v6945_v21, %v3329_v10  ;;  %v3430_v21 = vmul.f32 %v6969_v49, %v3329_v10  ;;  %v3436_v49 = vmul.f32 %v6993_v11, %v3329_v10 }
0x1894   :  { %v3421_v31 = vmul.f32 %v6927_v0, %v3324_v3  ;;  %v3423_v61 = vmul.f32 %v6940_v42, %v3324_v3  ;;  %v3425_v2 = vmul.f32 %v6948_v63, %v3324_v3  ;;  %v3426_v0 = vmul.f32 %v6953_v25, %v3329_v10 }
0x1895   :  { %v3427_v54 = vmul.f32 %v6956_v36, %v3324_v3  ;;  %v3428_v42 = vmul.f32 %v6961_v56, %v3329_v10  ;;  %v3429_v8 = vmul.f32 %v6964_v35, %v3324_v3  ;;  %v3431_v63 = vmul.f32 %v6972_v6, %v3324_v3 }
0x1896   :  { %5358 = vmatprep.mubr.msk.f32.mxu1 %vm180_vm0, %v3421_v31  ;;  %v3432_v25 = vmul.f32 %v6977_v50, %v3329_v10  ;;  %v3433_v36 = vmul.f32 %v6980_v46, %v3324_v3  ;;  %v3434_v56 = vmul.f32 %v6985_v14, %v3329_v10  ;;  %v3435_v35 = vmul.f32 %v6988_v58, %v3324_v3  ;;  %v6063_v50 = vld [vmem:[#allocation2 + $0x108] sm:$0xff] }
0x1897   :  { %5359 = vmatmul.mubr.msk.f32.vlgmr.msra.gmra.mrb[64].mxu1 %vm180_vm0, %v3422_v5  ;;  %v6071_v5 = vld [vmem:[#allocation2 + $0x138] sm:$0xff] }
0x1898   :  { %5361 = vmatprep.mubr.msk.f32.mxu1 %vm180_vm0, %v3423_v61 }
0x189b   :  { %5362 = vmatmul.mubr.msk.f32.gmra.mrb[66].mxu1 %vm180_vm0, %v3424_v48 }
0x189c   :  { %5364 = vmatprep.mubr.msk.f32.mxu1 %vm180_vm0, %v3425_v2 }
0x189f   :  { %5365 = vmatmul.mubr.msk.f32.gmra.mrb[68].mxu1 %vm180_vm0, %v3426_v0  ;;  %v6072_v0 = vld [vmem:[#allocation2 + $0x150] sm:$0xff] }
0x18a0   :  { %5367 = vmatprep.mubr.msk.f32.mxu1 %vm180_vm0, %v3427_v54 }
0x18a3   :  { %5368 = vmatmul.mubr.msk.f32.gmra.mrb[70].mxu1 %vm180_vm0, %v3428_v42 }
0x18a4   :  { %5370 = vmatprep.mubr.msk.f32.mxu1 %vm180_vm0, %v3429_v8 }
0x18a7   :  { %5371 = vmatmul.mubr.msk.f32.gmra.mrb[72].mxu1 %vm180_vm0, %v3430_v21 }
0x18a8   :  { %5373 = vmatprep.mubr.msk.f32.mxu1 %vm180_vm0, %v3431_v63 }
0x18ab   :  { %5374 = vmatmul.mubr.msk.f32.gmra.mrb[74].mxu1 %vm180_vm0, %v3432_v25  ;;  %v6073_v25 = vld [vmem:[#allocation2 + $0x148] sm:$0xff] }
0x18ac   :  { %5376 = vmatprep.mubr.msk.f32.mxu1 %vm180_vm0, %v3433_v36 }
0x18af   :  { %5377 = vmatmul.mubr.msk.f32.gmra.mrb[76].mxu1 %vm180_vm0, %v3434_v56 }
0x18b0   :  { %5379 = vmatprep.mubr.msk.f32.mxu1 %vm180_vm0, %v3435_v35 }
0x18b3   :  { %5380 = vmatmul.mubr.msk.f32.gmra.mrb[78].mxu1 %vm180_vm0, %v3436_v49  ;;  %v6074_v49 = vld [vmem:[#allocation2 + $0x160] sm:$0xff] }
0x196a   :  { %v5360_v6 = vpop.f32.mrb[64].mxu1 }
0x196b   :  { %v3566_v28 = vadd.f32 %v6063_v50, %v5360_v6  ;;  %v3560_v46 = vpop.f32.mrb[65].mxu1 }
0x196c   :  { %v3561_v23 = vadd.f32 %v6064_v34, %v3560_v46 }
0x196d   :  { %v7295_v33 = vadd.f32 %v3566_v28, %v6675_v16 }
0x196e   :  { %v5363_v14 = vpop.f32.mrb[66].mxu1  ;;  %v7298_v58 = vadd.f32 %v3561_v23, %v6675_v16  ;;  %v6075_v23 = vld [vmem:[#allocation2 + $0x158] sm:$0xff] }
0x196f   :  { %v3576_v47 = vadd.f32 %v6065_v39, %v5363_v14  ;;  %v3570_v13 = vpop.f32.mrb[67].mxu1  ;;  %v3658_v11 = vsel %vm1607_vm7, %v7295_v33, -inf }
0x1970   :  { %3659 = vmax.xlane.f32.xlu1 %v3658_v11  ;;  %v3571_v19 = vadd.f32 %v6066_v9, %v3570_v13  ;;  %v3655_v22 = vsel %vm1607_vm7, %v7298_v58, -inf  ;;  %v6076_v13 = vld [vmem:[#allocation2 + $0x170] sm:$0xff] }
0x1971   :  { %v7303_v57 = vadd.f32 %v3576_v47, %v6675_v16 }
0x1972   :  { %v5366_v30 = vpop.f32.mrb[68].mxu1  ;;  %v7308_v32 = vadd.f32 %v3571_v19, %v6675_v16 }
0x1973   :  { %v3580_v18 = vpop.f32.mrb[69].mxu1  ;;  %v3664_v24 = vsel %vm1607_vm7, %v7303_v57, -inf  ;;  %v3586_v60 = vadd.f32 %v6069_v12, %v5366_v30 }
0x1974   :  { %3656 = vmax.xlane.f32.xlu1 %v3655_v22  ;;  %v3581_v26 = vadd.f32 %v6067_v43, %v3580_v18  ;;  %v3661_v53 = vsel %vm1607_vm7, %v7308_v32, -inf  ;;  %v6077_v18 = vld [vmem:[#allocation2 + $0x168] sm:$0xff] }
0x1975   :  { %v7326_v31 = vadd.f32 %v3586_v60, %v6675_v16 }
0x1976   :  { %v5369_v1 = vpop.f32.mrb[70].mxu1  ;;  %v7316_v52 = vadd.f32 %v3581_v26, %v6675_v16 }
0x1977   :  { %v3590_v27 = vpop.f32.mrb[71].mxu1  ;;  %v3596_v61 = vadd.f32 %v6071_v5, %v5369_v1  ;;  %v3670_v35 = vsel %vm1607_vm7, %v7326_v31, -inf }
0x1978   :  { %v3591_v44 = vadd.f32 %v6068_v38, %v3590_v27  ;;  %3665 = vmax.xlane.f32.xlu1 %v3664_v24  ;;  %v3667_v2 = vsel %vm1607_vm7, %v7316_v52, -inf  ;;  %v6078_v27 = vld [vmem:[#allocation2 + $0x178] sm:$0xff] }
0x1979   :  { %v7336_v63 = vadd.f32 %v3596_v61, %v6675_v16 }
0x197a   :  { %v5372_v45 = vpop.f32.mrb[72].mxu1  ;;  %v7313_v4 = vadd.f32 %v3591_v44, %v6675_v16 }
0x197b   :  { %v3600_v51 = vpop.f32.mrb[73].mxu1  ;;  %v3606_v36 = vadd.f32 %v6073_v25, %v5372_v45  ;;  %v3676_v47 = vsel %vm1607_vm7, %v7336_v63, -inf }
0x197c   :  { %v3601_v40 = vadd.f32 %v6070_v62, %v3600_v51  ;;  %3662 = vmax.xlane.f32.xlu1 %v3661_v53  ;;  %v3673_v10 = vsel %vm1607_vm7, %v7313_v4, -inf }
0x197d   :  { %3674 = vmax.xlane.f32.xlu0 %v3673_v10  ;;  %v7346_v34 = vadd.f32 %v3606_v36, %v6675_v16 }
0x197e   :  { %v5375_v37 = vpop.f32.mrb[74].mxu1  ;;  %v7323_v3 = vadd.f32 %v3601_v40, %v6675_v16 }
0x197f   :  { %v3610_v48 = vpop.f32.mrb[75].mxu1  ;;  %v3616_v14 = vadd.f32 %v6075_v23, %v5375_v37  ;;  %v3682_v1 = vsel %vm1607_vm7, %v7346_v34, -inf }
0x1980   :  { %v3611_v54 = vadd.f32 %v6072_v0, %v3610_v48  ;;  %3668 = vmax.xlane.f32.xlu1 %v3667_v2  ;;  %v3679_v42 = vsel %vm1607_vm7, %v7323_v3, -inf }
0x1981   :  { %3680 = vmax.xlane.f32.xlu0 %v3679_v42  ;;  %v7356_v19 = vadd.f32 %v3616_v14, %v6675_v16 }
0x1982   :  { %v5378_v8 = vpop.f32.mrb[76].mxu1  ;;  %v7333_v21 = vadd.f32 %v3611_v54, %v6675_v16 }
0x1983   :  { %v3620_v56 = vpop.f32.mrb[77].mxu1  ;;  %v3626_v22 = vadd.f32 %v6077_v18, %v5378_v8  ;;  %v3688_v38 = vsel %vm1607_vm7, %v7356_v19, -inf }
0x1984   :  { %v3621_v6 = vadd.f32 %v6074_v49, %v3620_v56  ;;  %3671 = vmax.xlane.f32.xlu1 %v3670_v35  ;;  %v3685_v50 = vsel %vm1607_vm7, %v7333_v21, -inf }
0x1985   :  { %3686 = vmax.xlane.f32.xlu0 %v3685_v50  ;;  %v7363_v26 = vadd.f32 %v3626_v22, %v6675_v16 }
0x1986   :  { %v5381_v28 = vpop.f32.mrb[78].mxu1  ;;  %v7343_v46 = vadd.f32 %v3621_v6, %v6675_v16 }
0x1987   :  { %v3630_v39 = vpop.f32.mrb[79].mxu1  ;;  %v3636_v24 = vadd.f32 %v6078_v27, %v5381_v28  ;;  %v3694_v45 = vsel %vm1607_vm7, %v7363_v26, -inf }
0x1988   :  { %v3631_v11 = vadd.f32 %v6076_v13, %v3630_v39  ;;  %3677 = vmax.xlane.f32.xlu1 %v3676_v47  ;;  %v3691_v30 = vsel %vm1607_vm7, %v7343_v46, -inf }
0x1989   :  { %3692 = vmax.xlane.f32.xlu0 %v3691_v30  ;;  %v7368_v44 = vadd.f32 %v3636_v24, %v6675_v16 }
0x198a   :  { %v7353_v9 = vadd.f32 %v3631_v11, %v6675_v16 }
0x198b   :  { %v3700_v12 = vsel %vm1607_vm7, %v7368_v44, -inf }
0x198c   :  { %3683 = vmax.xlane.f32.xlu1 %v3682_v1  ;;  %v3697_v43 = vsel %vm1607_vm7, %v7353_v9, -inf }
0x198d   :  { %3698 = vmax.xlane.f32.xlu0 %v3697_v43 }
0x1990   :  { %3689 = vmax.xlane.f32.xlu1 %v3688_v38 }
0x1994   :  { %3695 = vmax.xlane.f32.xlu1 %v3694_v45 }
0x1998   :  { %3701 = vmax.xlane.f32.xlu1 %v3700_v12 }
0x19fd   :  { %v3660_v60 = vpop.xlane.xlu1 %3659 }
0x19fe   :  { %v3704_v51 = vsub.f32 %v7295_v33, %v3660_v60 }
0x1a00   :  { %v3721_v53 = vmul.f32 1.442695, %v3704_v51 }
0x1a01   :  { %v3657_v62 = vpop.xlane.xlu1 %3656 }
0x1a02   :  { %5942 = vpow2.f32 %v3721_v53  ;;  %v3703_v40 = vsub.f32 %v7298_v58, %v3657_v62 }
0x1a04   :  { %v3719_v10 = vmul.f32 1.442695, %v3703_v40 }
0x1a05   :  { %v3666_v37 = vpop.xlane.xlu1 %3665 }
0x1a06   :  { %5944 = vpow2.f32 %v3719_v10  ;;  %v3706_v16 = vsub.f32 %v7303_v57, %v3666_v37 }
0x1a08   :  { %v3725_v5 = vmul.f32 1.442695, %v3706_v16 }
0x1a09   :  { %v3663_v61 = vpop.xlane.xlu1 %3662 }
0x1a0a   :  { %5946 = vpow2.f32 %v3725_v5  ;;  %v3705_v48 = vsub.f32 %v7308_v32, %v3663_v61  ;;  %v3675_v2 = vpop.xlane.xlu0 %3674 }
0x1a0b   :  { %v3709_v33 = vsub.f32 %v7313_v4, %v3675_v2 }
0x1a0c   :  { %v7378_v0 = vpop.eup %5942  ;;  %v3723_v54 = vmul.f32 1.442695, %v3705_v48 }
0x1a0d   :  { %v3669_v42 = vpop.xlane.xlu1 %3668  ;;  %v3754_v58 = vsel %vm1607_vm7, %v7378_v0, 0.0  ;;  %v3731_v36 = vmul.f32 1.442695, %v3709_v33 }
0x1a0e   :  { %5948 = vpow2.f32 %v3723_v54  ;;  %v3707_v8 = vsub.f32 %v7316_v52, %v3669_v42  ;;  %v3681_v25 = vpop.xlane.xlu0 %3680  ;;  %3755 = vadd.xlane.f32.xlu1 %v3754_v58 }
0x1a0f   :  { %v3711_v32 = vsub.f32 %v7323_v3, %v3681_v25 }
0x1a10   :  { %v7384_v57 = vpop.eup %5944  ;;  %v3727_v56 = vmul.f32 1.442695, %v3707_v8 }
0x1a11   :  { %v3672_v35 = vpop.xlane.xlu1 %3671  ;;  %v3751_v49 = vsel %vm1607_vm7, %v7384_v57, 0.0  ;;  %v3735_v52 = vmul.f32 1.442695, %v3711_v32 }
0x1a12   :  { %5950 = vpow2.f32 %v3727_v56  ;;  %v3708_v4 = vsub.f32 %v7326_v31, %v3672_v35  ;;  %3752 = vadd.xlane.f32.xlu0 %v3751_v49  ;;  %v3687_v47 = vpop.xlane.xlu0 %3686 }
0x1a13   :  { %5952 = vpow2.f32 %v3731_v36  ;;  %v3713_v18 = vsub.f32 %v7333_v21, %v3687_v47 }
0x1a14   :  { %v7390_v6 = vpop.eup %5946  ;;  %v3729_v50 = vmul.f32 1.442695, %v3708_v4 }
0x1a15   :  { %v3678_v28 = vpop.xlane.xlu1 %3677  ;;  %v3760_v23 = vsel %vm1607_vm7, %v7390_v6, 0.0  ;;  %v3739_v38 = vmul.f32 1.442695, %v3713_v18 }
0x1a16   :  { %5954 = vpow2.f32 %v3729_v50  ;;  %v3710_v3 = vsub.f32 %v7336_v63, %v3678_v28  ;;  %3761 = vadd.xlane.f32.xlu1 %v3760_v23  ;;  %v3693_v45 = vpop.xlane.xlu0 %3692 }
0x1a17   :  { %5956 = vpow2.f32 %v3735_v52  ;;  %v3715_v62 = vsub.f32 %v7343_v46, %v3693_v45 }
0x1a18   :  { %v7395_v14 = vpop.eup %5948  ;;  %v3733_v39 = vmul.f32 1.442695, %v3710_v3 }
0x1a19   :  { %v3684_v31 = vpop.xlane.xlu1 %3683  ;;  %v3757_v13 = vsel %vm1607_vm7, %v7395_v14, 0.0  ;;  %v3743_v5 = vmul.f32 1.442695, %v3715_v62 }
0x1a1a   :  { %5958 = vpow2.f32 %v3733_v39  ;;  %v3712_v11 = vsub.f32 %v7346_v34, %v3684_v31  ;;  %3758 = vadd.xlane.f32.xlu0 %v3757_v13  ;;  %v3699_v8 = vpop.xlane.xlu0 %3698 }
0x1a1b   :  { %v3717_v25 = vsub.f32 %v7353_v9, %v3699_v8 }
0x1a1c   :  { %v7400_v30 = vpop.eup %5950  ;;  %v3737_v22 = vmul.f32 1.442695, %v3712_v11 }
0x1a1d   :  { %v3690_v63 = vpop.xlane.xlu1 %3689  ;;  %v3763_v1 = vsel %vm1607_vm7, %v7400_v30, 0.0  ;;  %v7405_v43 = vpop.eup %5952  ;;  %v3747_v36 = vmul.f32 1.442695, %v3717_v25 }
0x1a1e   :  { %5960 = vpow2.f32 %v3737_v22  ;;  %v3714_v27 = vsub.f32 %v7356_v19, %v3690_v63  ;;  %3764 = vadd.xlane.f32.xlu0 %v3763_v1  ;;  %v3769_v21 = vsel %vm1607_vm7, %v7405_v43, 0.0 }
0x1a20   :  { %v7408_v24 = vpop.eup %5954  ;;  %v3741_v34 = vmul.f32 1.442695, %v3714_v27 }
0x1a21   :  { %v3696_v12 = vpop.xlane.xlu1 %3695  ;;  %v3766_v60 = vsel %vm1607_vm7, %v7408_v24, 0.0  ;;  %v7414_v51 = vpop.eup %5956 }
0x1a22   :  { %5962 = vpow2.f32 %v3741_v34  ;;  %v3716_v53 = vsub.f32 %v7363_v26, %v3696_v12  ;;  %3770 = vadd.xlane.f32.xlu0 %v3769_v21  ;;  %3767 = vadd.xlane.f32.xlu1 %v3766_v60  ;;  %v3775_v10 = vsel %vm1607_vm7, %v7414_v51, 0.0 }
0x1a23   :  { %5964 = vpow2.f32 %v3739_v38 }
0x1a24   :  { %v7417_v19 = vpop.eup %5958  ;;  %v3745_v40 = vmul.f32 1.442695, %v3716_v53 }
0x1a25   :  { %v3772_v37 = vsel %vm1607_vm7, %v7417_v19, 0.0  ;;  %v3702_v56 = vpop.xlane.xlu1 %3701 }
0x1a26   :  { %3776 = vadd.xlane.f32.xlu0 %v3775_v10  ;;  %3773 = vadd.xlane.f32.xlu1 %v3772_v37  ;;  %5966 = vpow2.f32 %v3745_v40  ;;  %v3718_v32 = vsub.f32 %v7368_v44, %v3702_v56 }
0x1a27   :  { %5968 = vpow2.f32 %v3743_v5 }
0x1a28   :  { %v7424_v16 = vpop.eup %5960  ;;  %5970 = vpow2.f32 %v3747_v36  ;;  %v3749_v49 = vmul.f32 1.442695, %v3718_v32  ;;  %v4063_v32 = vld [vmem:[#allocation2 + $0x369] sm:$0xff] }
0x1a29   :  { %v3778_v26 = vsel %vm1607_vm7, %v7424_v16, 0.0 }
0x1a2a   :  { %3779 = vadd.xlane.f32.xlu1 %v3778_v26  ;;  %5972 = vpow2.f32 %v3749_v49  ;;  %v4064_v49 = vld [vmem:[#allocation2 + $0x371] sm:$0xff] }
0x1a2c   :  { %v7428_v61 = vpop.eup %5962 }
0x1a2d   :  { %v3784_v46 = vsel %vm1607_vm7, %v7428_v61, 0.0  ;;  %v7432_v48 = vpop.eup %5964 }
0x1a2e   :  { %3785 = vadd.xlane.f32.xlu0 %v3784_v46  ;;  %v3781_v2 = vsel %vm1607_vm7, %v7432_v48, 0.0 }
0x1a30   :  { %v7436_v54 = vpop.eup %5966 }
0x1a31   :  { %v3790_v33 = vsel %vm1607_vm7, %v7436_v54, 0.0  ;;  %v7440_v42 = vpop.eup %5968 }
0x1a32   :  { %3782 = vadd.xlane.f32.xlu0 %v3781_v2  ;;  %v3787_v58 = vsel %vm1607_vm7, %v7440_v42, 0.0  ;;  %v7452_v35 = vpop.eup %5970 }
0x1a33   :  { %v3793_v4 = vsel %vm1607_vm7, %v7452_v35, 0.0 }
0x1a34   :  { %v7456_v15 = vpop.eup %5972 }
0x1a35   :  { %v3796_v41 = vsel %vm1607_vm7, %v7456_v15, 0.0 }
0x1a36   :  { %3791 = vadd.xlane.f32.xlu0 %v3790_v33 }
0x1a3a   :  { %3788 = vadd.xlane.f32.xlu0 %v3787_v58 }
0x1a3b   :  { %5720 = vrot.lane.b32.xlu1 %v5719_v55, %s6149_s2 }
0x1a50   :  { %3835 = vrot.lane.b32.xlu0 %v7236_v59, %s6149_s2 }
0x1a5f   :  { %3794 = vadd.xlane.f32.xlu1 %v3793_v4  ;;  %v4065_v4 = vld [vmem:[#allocation2 + $0x379] sm:$0xff] }
0x1a6f   :  { %3797 = vadd.xlane.f32.xlu0 %v3796_v41  ;;  %v4066_v41 = vld [vmem:[#allocation2 + $0x381] sm:$0xff] }
0x1a9b   :  { %v3756_v59 = vpop.xlane.xlu1 %3755 }
0x1a9f   :  { %v3753_v55 = vpop.xlane.xlu0 %3752 }
0x1aa0   :  { %5974 = vrcp.f32 %v3753_v55  ;;  %v5635_v55 = vpack.c.bf16 %v4066_v41, %v4065_v4  ;;  %v6094_v41 = vld [vmem:[#allocation2 + $0x70] sm:$0xff] }
0x1aa1   :  { %5976 = vrcp.f32 %v3756_v59 }
0x1aa3   :  { %v3762_v44 = vpop.xlane.xlu1 %3761 }
0x1aa7   :  { %v3759_v9 = vpop.xlane.xlu0 %3758 }
0x1aa8   :  { %5978 = vrcp.f32 %v3759_v9 }
0x1aa9   :  { %5980 = vrcp.f32 %v3762_v44 }
0x1aaa   :  { %v5975_v52 = vpop.eup %5974 }
0x1aab   :  { %v3765_v50 = vpop.xlane.xlu0 %3764  ;;  %v3815_v28 = vmul.f32 %v5975_v52, %v7384_v57  ;;  %v5977_v38 = vpop.eup %5976  ;;  %v6079_v52 = vld [vmem:[#allocation2 + $0x8] sm:$0xff] }
0x1aac   :  { %5982 = vrcp.f32 %v3765_v50  ;;  %v3816_v12 = vmul.f32 %v5977_v38, %v7378_v0  ;;  %v6080_v50 = vld [vmem:[#allocation2 + $0x18] sm:$0xff] }
0x1aad   :  { %5388 = vmatprep.mubr.msk.f32.mxu0 %vm1607_vm7, %v3815_v28 }
0x1aaf   :  { %v3768_v23 = vpop.xlane.xlu1 %3767  ;;  %v3771_v3 = vpop.xlane.xlu0 %3770 }
0x1ab0   :  { %5984 = vrcp.f32 %v3768_v23  ;;  %v6081_v23 = vld [vmem:[#allocation2] sm:$0xff] }
0x1ab1   :  { %5986 = vrcp.f32 %v3771_v3 }
0x1ab2   :  { %v5979_v34 = vpop.eup %5978 }
0x1ab3   :  { %v3774_v39 = vpop.xlane.xlu1 %3773  ;;  %v3777_v47 = vpop.xlane.xlu0 %3776  ;;  %v3817_v60 = vmul.f32 %v5979_v34, %v7395_v14 }
0x1ab4   :  { %5988 = vrcp.f32 %v3774_v39  ;;  %v5981_v21 = vpop.eup %5980  ;;  %v6082_v39 = vld [vmem:[#allocation2 + $0x10] sm:$0xff] }
0x1ab5   :  { %5990 = vrcp.f32 %v3777_v47  ;;  %v3818_v62 = vmul.f32 %v5981_v21, %v7390_v6 }
0x1ab6   :  { %v5983_v53 = vpop.eup %5982 }
0x1ab7   :  { %v3780_v31 = vpop.xlane.xlu1 %3779  ;;  %v3819_v10 = vmul.f32 %v5983_v53, %v7400_v30 }
0x1ab8   :  { %5992 = vrcp.f32 %v3780_v31 }
0x1aba   :  { %v5985_v40 = vpop.eup %5984 }
0x1abb   :  { %v3786_v13 = vpop.xlane.xlu0 %3785  ;;  %v5721_v11 = vpop.permute.xlu1 %5720  ;;  %v3820_v0 = vmul.f32 %v5985_v40, %v7408_v24 }
0x1abc   :  { %v5723_v18 = vunpack.i.h.bf16 %v5721_v11  ;;  %v5722_v22 = vunpack.i.l.bf16 %v5721_v11  ;;  %v5987_v37 = vpop.eup %5986 }
0x1abd   :  { %v3821_v5 = vmul.f32 %v5987_v37, %v7405_v43  ;;  %v6087_v37 = vld [vmem:[#allocation2 + $0x48] sm:$0xff] }
0x1abe   :  { %v5627_v63 = vpack.c.bf16 %v5723_v18, %v5722_v22  ;;  %v5989_v14 = vpop.eup %5988  ;;  %v6083_v18 = vld [vmem:[#allocation2 + $0x28] sm:$0xff] }
0x1abf   :  { %v3783_v1 = vpop.xlane.xlu0 %3782  ;;  %v5991_v26 = vpop.eup %5990  ;;  %v3822_v6 = vmul.f32 %v5989_v14, %v7417_v19 }
0x1ac0   :  { %5628 = vmatprep.subr.bf16.mxu0 %v5627_v63  ;;  %5994 = vrcp.f32 %v3783_v1  ;;  %v3823_v46 = vmul.f32 %v5991_v26, %v7414_v51  ;;  %v6084_v1 = vld [vmem:[#allocation2 + $0x20] sm:$0xff] }
0x1ac1   :  { %5630 = vmatpush3.bf16.msra.mxu0 %v5627_v63  ;;  %5996 = vrcp.f32 %v3786_v13 }
0x1ac2   :  { %v5993_v30 = vpop.eup %5992 }
0x1ac3   :  { %v3792_v27 = vpop.xlane.xlu0 %3791  ;;  %v3824_v24 = vmul.f32 %v5993_v30, %v7424_v16 }
0x1ac7   :  { %v3789_v57 = vpop.xlane.xlu0 %3788 }
0x1ac8   :  { %5998 = vrcp.f32 %v3789_v57 }
0x1ac9   :  { %6000 = vrcp.f32 %v3792_v27 }
0x1aca   :  { %v5995_v2 = vpop.eup %5994 }
0x1acb   :  { %v3836_v45 = vpop.permute.xlu0 %3835  ;;  %v5997_v33 = vpop.eup %5996  ;;  %v3825_v43 = vmul.f32 %v5995_v2, %v7432_v48  ;;  %v6089_v2 = vld [vmem:[#allocation2 + $0x58] sm:$0xff] }
0x1acc   :  { %5386 = vmatprep.subr.mxu0 %v3836_v45  ;;  %v3826_v19 = vmul.f32 %v5997_v33, %v7428_v61 }
0x1acd   :  { %5387 = vmatpush3.msra.mxu0 %v3836_v45  ;;  %v6085_v45 = vld [vmem:[#allocation2 + $0x38] sm:$0xff] }
0x1ace   :  { %5389 = vmatmul.mubr.msk.f32.vlgmr.msra.gmra.mrb[68].mxu0 %vm1607_vm7, %v3816_v12 }
0x1acf   :  { %5391 = vmatprep.mubr.msk.f32.mxu0 %vm1607_vm7, %v3817_v60  ;;  %v6086_v60 = vld [vmem:[#allocation2 + $0x30] sm:$0xff] }
0x1ad2   :  { %5392 = vmatmul.mubr.msk.f32.gmra.mrb[70].mxu0 %vm1607_vm7, %v3818_v62  ;;  %v5999_v58 = vpop.eup %5998 }
0x1ad3   :  { %5394 = vmatprep.mubr.msk.f32.mxu0 %vm1607_vm7, %v3819_v10  ;;  %v6001_v8 = vpop.eup %6000  ;;  %v3827_v51 = vmul.f32 %v5999_v58, %v7440_v42 }
0x1ad4   :  { %v3828_v25 = vmul.f32 %v6001_v8, %v7436_v54  ;;  %v5631_v54 = vpack.c.bf16 %v4064_v49, %v4063_v32  ;;  %v6093_v49 = vld [vmem:[#allocation2 + $0x78] sm:$0xff] }
0x1ad6   :  { %5395 = vmatmul.mubr.msk.f32.gmra.mrb[72].mxu0 %vm1607_vm7, %v3820_v0  ;;  %5632 = vmatprep.subr.bf16.mxu1 %v5631_v54 }
0x1ad7   :  { %5397 = vmatprep.mubr.msk.f32.mxu0 %vm1607_vm7, %v3821_v5  ;;  %5634 = vmatpush3.bf16.msra.mxu1 %v5631_v54  ;;  %v6088_v5 = vld [vmem:[#allocation2 + $0x40] sm:$0xff] }
0x1ad8   :  { %5636 = vmatprep.subr.bf16.mxu1 %v5635_v55 }
0x1ada   :  { %5398 = vmatmul.mubr.msk.f32.gmra.mrb[74].mxu0 %vm1607_vm7, %v3822_v6 }
0x1adb   :  { %5400 = vmatprep.mubr.msk.f32.mxu0 %vm1607_vm7, %v3823_v46  ;;  %5638 = vmatpush3.bf16.msra.mxu1 %v5635_v55 }
0x1ade   :  { %5401 = vmatmul.mubr.msk.f32.gmra.mrb[76].mxu0 %vm1607_vm7, %v3824_v24 }
0x1adf   :  { %5403 = vmatprep.mubr.msk.f32.mxu0 %vm1607_vm7, %v3825_v43  ;;  %v6090_v43 = vld [vmem:[#allocation2 + $0x50] sm:$0xff] }
0x1ae2   :  { %5404 = vmatmul.mubr.msk.f32.gmra.mrb[78].mxu0 %vm1607_vm7, %v3826_v19 }
0x1ae3   :  { %5406 = vmatprep.mubr.msk.f32.mxu0 %vm1607_vm7, %v3827_v51 }
0x1ae6   :  { %5407 = vmatmul.mubr.msk.f32.gmra.mrb[80].mxu0 %vm1607_vm7, %v3828_v25  ;;  %v6091_v25 = vld [vmem:[#allocation2 + $0x68] sm:$0xff] }
0x1aec   :  { %v3795_v16 = vpop.xlane.xlu1 %3794 }
0x1aed   :  { %6002 = vrcp.f32 %v3795_v16 }
0x1af7   :  { %v6003_v48 = vpop.eup %6002 }
0x1af8   :  { %v3829_v36 = vmul.f32 %v6003_v48, %v7452_v35 }
0x1afa   :  { %5409 = vmatprep.mubr.msk.f32.mxu0 %vm1607_vm7, %v3829_v36  ;;  %v6092_v36 = vld [vmem:[#allocation2 + $0x60] sm:$0xff] }
0x1afc   :  { %v3798_v56 = vpop.xlane.xlu0 %3797 }
0x1afd   :  { %6004 = vrcp.f32 %v3798_v56 }
0x1b07   :  { %v6005_v61 = vpop.eup %6004 }
0x1b08   :  { %v3830_v42 = vmul.f32 %v6005_v61, %v7456_v15 }
0x1b0a   :  { %5410 = vmatmul.mubr.msk.f32.gmra.mrb[82].mxu0 %vm1607_vm7, %v3830_v42 }
0x1ba1   :  { %v5390_v35 = vpop.f32.mrb[68].mxu0 }
0x1ba2   :  { %v3954_v59 = vpop.f32.mrb[69].mxu0  ;;  %v4034_v44 = vmul.f32 %v6079_v52, %v5390_v35 }
0x1ba3   :  { %v4033_v3 = vmul.f32 %v6081_v23, %v3954_v59 }
0x1ba5   :  { %v5393_v9 = vpop.f32.mrb[70].mxu0 }
0x1ba6   :  { %v4036_v28 = vmul.f32 %v6080_v50, %v5393_v9  ;;  %v3964_v15 = vpop.f32.mrb[71].mxu0  ;;  %v4729_v9 = vld [vmem:[#allocation2 + $0x389] ss:$0 sm:$0xff] }
0x1ba7   :  { %v4035_v47 = vmul.f32 %v6082_v39, %v3964_v15 }
0x1ba8   :  { %v4050_v31 = vadd.f32 %v4036_v28, %v4034_v44 }
0x1ba9   :  { %v4049_v13 = vadd.f32 %v4035_v47, %v4033_v3  ;;  %v5396_v11 = vpop.f32.mrb[72].mxu0  ;;  %v4195_v47 = vld [vmem:[#allocation2 + $0x38a] sm:$0xff] }
0x1baa   :  { %v4038_v22 = vmul.f32 %v6083_v18, %v5396_v11  ;;  %v3974_v63 = vpop.f32.mrb[73].mxu0 }
0x1bab   :  { %v4037_v27 = vmul.f32 %v6084_v1, %v3974_v63 }
0x1bac   :  { %v4052_v57 = vadd.f32 %v4050_v31, %v4038_v22  ;;  %v4196_v31 = vld [vmem:[#allocation2 + $0x392] sm:$0xff] }
0x1bad   :  { %v4051_v38 = vadd.f32 %v4049_v13, %v4037_v27  ;;  %v5399_v34 = vpop.f32.mrb[74].mxu0  ;;  %v5639_v13 = vpack.c.bf16 %v4196_v31, %v4195_v47 }
0x1bae   :  { %v4040_v12 = vmul.f32 %v6085_v45, %v5399_v34  ;;  %v3984_v21 = vpop.f32.mrb[75].mxu0  ;;  %v4197_v34 = vld [vmem:[#allocation2 + $0x39a] sm:$0xff]  ;;  %v4198_v45 = vld [vmem:[#allocation2 + $0x3a2] sm:$0xff] }
0x1baf   :  { %v4039_v53 = vmul.f32 %v6086_v60, %v3984_v21  ;;  %5640 = vmatprep.subr.bf16.mxu0 %v5639_v13  ;;  %v4287_v21 = vld [vmem:[#allocation2 + $0x3ab] sm:$0xff]  ;;  %v4288_v60 = vld [vmem:[#allocation2 + $0x3b3] sm:$0xff] }
0x1bb0   :  { %v4054_v62 = vadd.f32 %v4052_v57, %v4040_v12  ;;  %5642 = vmatpush3.bf16.msra.mxu0 %v5639_v13  ;;  %v5643_v12 = vpack.c.bf16 %v4198_v45, %v4197_v34 }
0x1bb1   :  { %v4053_v40 = vadd.f32 %v4051_v38, %v4039_v53  ;;  %v5402_v10 = vpop.f32.mrb[76].mxu0  ;;  %v4289_v53 = vld [vmem:[#allocation2 + $0x3bb] sm:$0xff] }
0x1bb2   :  { %v4042_v0 = vmul.f32 %v6087_v37, %v5402_v10  ;;  %v3994_v14 = vpop.f32.mrb[77].mxu0  ;;  %5644 = vmatprep.subr.bf16.mxu0 %v5643_v12  ;;  %v4291_v37 = vld [vmem:[#allocation2 + $0x3cb] sm:$0xff] }
0x1bb3   :  { %v4041_v26 = vmul.f32 %v6088_v5, %v3994_v14  ;;  %v4293_v5 = vld [vmem:[#allocation2 + $0x3db] sm:$0xff] }
0x1bb4   :  { %v4056_v6 = vadd.f32 %v4054_v62, %v4042_v0  ;;  %5646 = vmatpush3.bf16.msra.mxu0 %v5643_v12  ;;  %v5647_v62 = vpack.c.bf16 %v4288_v60, %v4287_v21  ;;  %v4292_v0 = vld [vmem:[#allocation2 + $0x3d3] sm:$0xff] }
0x1bb5   :  { %v4055_v30 = vadd.f32 %v4053_v40, %v4041_v26  ;;  %v5405_v46 = vpop.f32.mrb[78].mxu0  ;;  %5679 = vmatprep.subr.bf16.mxu0 %v6146_v17  ;;  %v4290_v40 = vld [vmem:[#allocation2 + $0x3c3] sm:$0xff]  ;;  %v5655_v14 = vpack.c.bf16 %v4292_v0, %v4291_v37 }
0x1bb6   :  { %v4044_v24 = vmul.f32 %v6089_v2, %v5405_v46  ;;  %v4004_v33 = vpop.f32.mrb[79].mxu0  ;;  %v5651_v10 = vpack.c.bf16 %v4290_v40, %v4289_v53  ;;  %5648 = vmatprep.subr.bf16.mxu1 %v5647_v62  ;;  %v4294_v26 = vld [vmem:[#allocation2 + $0x3e3] sm:$0xff]  ;;  %v4296_v46 = vld [vmem:[#allocation2 + $0x3f3] sm:$0xff] }
0x1bb7   :  { %v4043_v58 = vmul.f32 %v6090_v43, %v4004_v33  ;;  %v4298_v33 = vld [vmem:[#allocation2 + $0x403] sm:$0xff]  ;;  %v4444_v40 = vld [vmem:[#allocation2 + $0x436] sm:$0xff] }
0x1bb8   :  { %v4058_v19 = vadd.f32 %v4056_v6, %v4044_v24  ;;  %v5659_v6 = vpack.c.bf16 %v4294_v26, %v4293_v5  ;;  %v4297_v24 = vld [vmem:[#allocation2 + $0x3fb] sm:$0xff]  ;;  %v4446_v0 = vld [vmem:[#allocation2 + $0x446] sm:$0xff] }
0x1bb9   :  { %v4057_v8 = vadd.f32 %v4055_v30, %v4043_v58  ;;  %v5408_v51 = vpop.f32.mrb[80].mxu0  ;;  %v4295_v30 = vld [vmem:[#allocation2 + $0x3eb] sm:$0xff]  ;;  %v5667_v43 = vpack.c.bf16 %v4298_v33, %v4297_v24 }
0x1bba   :  { %v4046_v16 = vmul.f32 %v6091_v25, %v5408_v51  ;;  %v4014_v48 = vpop.f32.mrb[81].mxu0  ;;  %v5663_v2 = vpack.c.bf16 %v4296_v46, %v4295_v30  ;;  %v4299_v58 = vld [vmem:[#allocation2 + $0x40b] sm:$0xff] }
0x1bbb   :  { %v4045_v56 = vmul.f32 %v6092_v36, %v4014_v48  ;;  %v4738_v33 = vld [vmem:[#allocation2 + $0x42c] ss:$0 sm:$0xff] }
0x1bbc   :  { %v4060_v61 = vadd.f32 %v4058_v19, %v4046_v16  ;;  %v4300_v19 = vld [vmem:[#allocation2 + $0x413] sm:$0xff] }
0x1bbd   :  { %v4059_v42 = vadd.f32 %v4057_v8, %v4045_v56  ;;  %v5671_v8 = vpack.c.bf16 %v4300_v19, %v4299_v58  ;;  %v4739_v19 = vld [vmem:[#allocation2 + $0x42d] ss:$0 sm:$0xff] }
0x1bdd   :  { %v5411_v32 = vpop.f32.mrb[82].mxu0 }
0x1bde   :  { %v4048_v4 = vmul.f32 %v6093_v49, %v5411_v32  ;;  %v4024_v54 = vpop.f32.mrb[83].mxu0  ;;  %v4733_v49 = vld [vmem:[#allocation2 + $0x2e4] ss:$0 sm:$0xff] }
0x1bdf   :  { %v4047_v55 = vmul.f32 %v6094_v41, %v4024_v54 }
0x1be0   :  { %v4062_v35 = vadd.f32 %v4060_v61, %v4048_v4 }
0x1be1   :  { %v4061_v59 = vadd.f32 %v4059_v42, %v4047_v55  ;;  %v4732_v42 = vld [vmem:[#allocation2 + $0x2e3] ss:$0 sm:$0xff] }
0x1be3   :  { %5420 = vmatprep.mubr.msk.f32.mxu1 %vm180_vm0, %v4061_v59 }
0x1be4   :  { %5421 = vmatmul.mubr.msk.f32.vlgmr.msra.gmra.mrb[80].mxu1 %vm180_vm0, %v4062_v35 }
0x1be5   :  { %5650 = vmatpush3.bf16.msra.mxu1 %v5647_v62  ;;  %v4443_v62 = vld [vmem:[#allocation2 + $0x42e] sm:$0xff] }
0x1be6   :  { %5652 = vmatprep.subr.bf16.mxu1 %v5651_v10  ;;  %v5680_v37 = vpack.c.bf16 %v4444_v40, %v4443_v62 }
0x1be9   :  { %5654 = vmatpush3.bf16.msra.mxu1 %v5651_v10  ;;  %v4445_v10 = vld [vmem:[#allocation2 + $0x43e] sm:$0xff] }
0x1bea   :  { %5656 = vmatprep.subr.bf16.mxu1 %v5655_v14 }
0x1bed   :  { %5658 = vmatpush3.bf16.msra.mxu1 %v5655_v14  ;;  %v5683_v14 = vpack.c.bf16 %v4446_v0, %v4445_v10 }
0x1bee   :  { %5660 = vmatprep.subr.bf16.mxu1 %v5659_v6 }
0x1bf1   :  { %5662 = vmatpush3.bf16.msra.mxu1 %v5659_v6 }
0x1bf2   :  { %5664 = vmatprep.subr.bf16.mxu1 %v5663_v2 }
0x1bf5   :  { %5666 = vmatpush3.bf16.msra.mxu1 %v5663_v2 }
0x1bf6   :  { %5668 = vmatprep.subr.bf16.mxu1 %v5667_v43 }
0x1bf9   :  { %5670 = vmatpush3.bf16.msra.mxu1 %v5667_v43 }
0x1bfa   :  { %5672 = vmatprep.subr.bf16.mxu1 %v5671_v8 }
0x1bfd   :  { %5674 = vmatpush3.bf16.msra.mxu1 %v5671_v8 }
0x1cb7   :  { %v5422_v52 = vpop.f32.mrb[80].mxu1 }
0x1cb8   :  { %v4144_v44 = vpop.f32.mrb[81].mxu1  ;;  %v4150_v50 = vadd.f32 %v5422_v52, %v4729_v9  ;;  %v4302_v52 = vld [vmem:[#allocation2 + $0x423] sm:$0xff] }
0x1cb9   :  { %v4145_v28 = vadd.f32 %v4729_v9, %v4144_v44  ;;  %v4301_v9 = vld [vmem:[#allocation2 + $0x41b] sm:$0xff] }
0x1cba   :  { %v7498_v23 = vadd.f32 %v4150_v50, %v7244_v7  ;;  %v5675_v44 = vpack.c.bf16 %v4302_v52, %v4301_v9  ;;  %v4734_v50 = vld [vmem:[#allocation2 + $0x3aa] ss:$0 sm:$0xff] }
0x1cbb   :  { %v7495_v15 = vadd.f32 %v4145_v28, %v7241_v29 }
0x1cbc   :  { %v4160_v39 = vsel %vm180_vm0, %v7498_v23, 0.0  ;;  %5676 = vmatprep.subr.bf16.mxu1 %v5675_v44 }
0x1cbd   :  { %v4157_v3 = vsel %vm180_vm0, %v7495_v15, 0.0  ;;  %5678 = vmatpush3.bf16.msra.mxu1 %v5675_v44  ;;  %v4740_v44 = vld [vmem:[#allocation2 + $0x44e] ss:$0 sm:$0xff] }
0x1cbe   :  { %4158 = vadd.xlane.f32.xlu1 %v4157_v3 }
0x1cc2   :  { %4161 = vadd.xlane.f32.xlu1 %v4160_v39 }
0x1d4b   :  { %v4159_v11 = vpop.xlane.xlu1 %4158 }
0x1d4c   :  { %v4163_v18 = vmul.f32 0.03125, %v4159_v11 }
0x1d4e   :  { %v4165_v29 = vsub.f32 %v7495_v15, %v4163_v18  ;;  %v4737_v18 = vld [vmem:[#allocation2 + $0x42b] ss:$0 sm:$0xff] }
0x1d4f   :  { %v4162_v22 = vpop.xlane.xlu1 %4161 }
0x1d50   :  { %v4164_v7 = vmul.f32 0.03125, %v4162_v22  ;;  %v4167_v63 = vmul.f32 %v4165_v29, %v4165_v29 }
0x1d52   :  { %v4166_v1 = vsub.f32 %v7498_v23, %v4164_v7  ;;  %v4169_v27 = vsel %vm180_vm0, %v4167_v63, 0.0 }
0x1d53   :  { %4170 = vadd.xlane.f32.xlu1 %v4169_v27 }
0x1d54   :  { %v4168_v57 = vmul.f32 %v4166_v1, %v4166_v1 }
0x1d56   :  { %v4172_v38 = vsel %vm180_vm0, %v4168_v57, 0.0 }
0x1d57   :  { %4173 = vadd.xlane.f32.xlu1 %v4172_v38 }
0x1de0   :  { %v4171_v51 = vpop.xlane.xlu1 %4170 }
0x1de1   :  { %v4175_v25 = vmul.f32 0.03125, %v4171_v51 }
0x1de3   :  { %v4177_v16 = vadd.f32 1e-05, %v4175_v25 }
0x1de4   :  { %v4174_v48 = vpop.xlane.xlu1 %4173 }
0x1de5   :  { %6006 = vrsqrt.f32 %v4177_v16  ;;  %v4176_v36 = vmul.f32 0.03125, %v4174_v48 }
0x1de7   :  { %v4178_v56 = vadd.f32 1e-05, %v4176_v36 }
0x1de9   :  { %6008 = vrsqrt.f32 %v4178_v56 }
0x1def   :  { %v6007_v61 = vpop.eup %6006 }
0x1df0   :  { %v4181_v32 = vmul.f32 %v6007_v61, %v4165_v29 }
0x1df2   :  { %v4187_v4 = vmul.f32 %v4732_v42, %v4181_v32 }
0x1df3   :  { %v6009_v54 = vpop.eup %6008 }
0x1df4   :  { %v4182_v41 = vmul.f32 %v6009_v54, %v4166_v1  ;;  %v4193_v55 = vadd.f32 %v4733_v49, %v4187_v4 }
0x1df6   :  { %v4188_v35 = vmul.f32 %v4732_v42, %v4182_v41  ;;  %5431 = vmatprep.mubr.msk.f32.mxu0 %vm180_vm0, %v4193_v55 }
0x1df8   :  { %v4194_v59 = vadd.f32 %v4733_v49, %v4188_v35 }
0x1dfa   :  { %5432 = vmatmul.mubr.msk.f32.vlgmr.msra.gmra.mrb[84].mxu0 %vm180_vm0, %v4194_v59 }
0x1dfb   :  { %5477 = vmatprep.mubr.msk.f32.mxu0 %vm6147_vm1, %v6148_v20  ;;  %5681 = vmatpush3.bf16.msra.mxu0 %v5680_v37 }
0x1dfc   :  { %5682 = vmatprep.subr.bf16.mxu0 %v6146_v17 }
0x1dff   :  { %5684 = vmatpush3.bf16.msra.mxu0 %v5683_v14 }
0x1ecd   :  { %v5433_v28 = vpop.f32.mrb[84].mxu0 }
0x1ece   :  { %v4282_v3 = vadd.f32 %v5433_v28, %v4734_v50  ;;  %v4276_v39 = vpop.f32.mrb[85].mxu0 }
0x1ecf   :  { %v4277_v47 = vadd.f32 %v4734_v50, %v4276_v39 }
0x1ed0   :  { %v4286_v13 = vmax.f32 %v4282_v3, 0.0 }
0x1ed1   :  { %v4285_v31 = vmax.f32 %v4277_v47, 0.0 }
0x1ed3   :  { %5466 = vmatprep.mubr.f32.mxu1 %v4285_v31 }
0x1ed4   :  { %5467 = vmatmul.mubr.f32.vlgmr.msra.gmra.mrb[82].mxu1 %v4286_v13 }
0x1fa7   :  { %v5468_v11 = vpop.f32.mrb[82].mxu1 }
0x1fa8   :  { %v4379_v29 = vadd.f32 %v5468_v11, %v7498_v23  ;;  %v4369_v22 = vpop.f32.mrb[83].mxu1 }
0x1fa9   :  { %v4378_v20 = vadd.f32 %v4369_v22, %v7495_v15 }
0x1faa   :  { %v4386_v7 = vadd.f32 %v4737_v18, %v4379_v29 }
0x1fab   :  { %v4385_v63 = vadd.f32 %v4737_v18, %v4378_v20 }
0x1fac   :  { %v4392_v1 = vsel %vm180_vm0, %v4386_v7, 0.0 }
0x1fad   :  { %4393 = vadd.xlane.f32.xlu1 %v4392_v1  ;;  %v4389_v27 = vsel %vm180_vm0, %v4385_v63, 0.0 }
0x1fae   :  { %4390 = vadd.xlane.f32.xlu0 %v4389_v27 }
0x203a   :  { %v4394_v57 = vpop.xlane.xlu1 %4393 }
0x203b   :  { %v4396_v38 = vmul.f32 0.03125, %v4394_v57  ;;  %v4391_v34 = vpop.xlane.xlu0 %4390 }
0x203c   :  { %v4395_v45 = vmul.f32 0.03125, %v4391_v34 }
0x203d   :  { %v4398_v12 = vsub.f32 %v4386_v7, %v4396_v38 }
0x203e   :  { %v4397_v21 = vsub.f32 %v4385_v63, %v4395_v45 }
0x203f   :  { %v4400_v60 = vmul.f32 %v4398_v12, %v4398_v12 }
0x2040   :  { %v4399_v53 = vmul.f32 %v4397_v21, %v4397_v21 }
0x2041   :  { %v4404_v23 = vsel %vm180_vm0, %v4400_v60, 0.0 }
0x2042   :  { %4405 = vadd.xlane.f32.xlu1 %v4404_v23  ;;  %v4401_v15 = vsel %vm180_vm0, %v4399_v53, 0.0 }
0x2043   :  { %4402 = vadd.xlane.f32.xlu0 %v4401_v15 }
0x20cf   :  { %v4406_v5 = vpop.xlane.xlu1 %4405 }
0x20d0   :  { %v4408_v26 = vmul.f32 0.03125, %v4406_v5  ;;  %v4403_v6 = vpop.xlane.xlu0 %4402 }
0x20d1   :  { %v4407_v30 = vmul.f32 0.03125, %v4403_v6 }
0x20d2   :  { %v4410_v46 = vadd.f32 1e-05, %v4408_v26 }
0x20d3   :  { %v4409_v2 = vadd.f32 1e-05, %v4407_v30 }
0x20d4   :  { %6010 = vrsqrt.f32 %v4410_v46 }
0x20d5   :  { %6012 = vrsqrt.f32 %v4409_v2 }
0x20de   :  { %v6011_v24 = vpop.eup %6010 }
0x20df   :  { %v6013_v43 = vpop.eup %6012  ;;  %v4414_v58 = vmul.f32 %v6011_v24, %v4398_v12 }
0x20e0   :  { %v4413_v8 = vmul.f32 %v6013_v43, %v4397_v21 }
0x20e1   :  { %v4420_v51 = vmul.f32 %v4738_v33, %v4414_v58 }
0x20e2   :  { %v4419_v25 = vmul.f32 %v4738_v33, %v4413_v8 }
0x20e3   :  { %v4426_v16 = vadd.f32 %v4739_v19, %v4420_v51 }
0x20e4   :  { %v4425_v48 = vadd.f32 %v4739_v19, %v4419_v25 }
0x20e5   :  { %v4434_v17 = vsel %vm180_vm0, %v4426_v16, -inf }
0x20e6   :  { %v4427_v36 = vsel %vm180_vm0, %v4425_v48, -inf  ;;  %v4435_v56 = vrot.slane %v4434_v17, 4 }
0x20e7   :  { %v4428_v61 = vrot.slane %v4427_v36, 4 }
0x20e8   :  { %v4436_v42 = vmax.f32 %v4434_v17, %v4435_v56 }
0x20e9   :  { %v4429_v32 = vmax.f32 %v4427_v36, %v4428_v61 }
0x20ea   :  { %v4437_v49 = vrot.slane %v4436_v42, 2 }
0x20eb   :  { %v4430_v4 = vrot.slane %v4429_v32, 2 }
0x20ec   :  { %v4438_v54 = vmax.f32 %v4436_v42, %v4437_v49 }
0x20ed   :  { %v4431_v41 = vmax.f32 %v4429_v32, %v4430_v4 }
0x20ee   :  { %v4439_v55 = vrot.slane %v4438_v54, 1 }
0x20ef   :  { %v4432_v35 = vrot.slane %v4431_v41, 1 }
0x20f0   :  { %v4440_v59 = vmax.f32 %v4438_v54, %v4439_v55 }
0x20f1   :  { %v4433_v9 = vmax.f32 %v4431_v41, %v4432_v35 }
0x20f3   :  { %v4442_v52 = vsel %vm4441_vm8, %v4433_v9, %v4440_v59 }
0x20f4   :  { %5478 = vmatmul.mubr.msk.f32.vlgmr.msra.gmra.mrb[86].mxu0 %vm180_vm0, %v4442_v52 }
0x21c7   :  { %v4521_v50 = vpop.f32.mrb[86].mxu0 }
0x21c8   :  { %v4522_v28 = vadd.f32 %v4740_v44, %v4521_v50  ;;  %v5479_v3 = vpop.f32.mrb[87].mxu0 }
0x21ca   :  { %4526 = vst.msk [vmem:[#allocation5] sm:$0x3] %vm4525_vm9, %v4522_v28 }
0x21cb   :  { %6128 = shalt.err (!%p6125_p12)
}
0x21cc   :  { %s6129_s20 = scalar_lea.hbm %s7539_s4, 32 }
0x21cd   :  { %p6130_p13 = scmp.ne.s32.totalorder %s7539_s4, %s6129_s20  ;;  %p6133_p0 = scmp.lt.u32.totalorder %s6129_s20, %s7539_s4 }
0x21cf   :  { %p6135_p1 = pnand %p6133_p0, %p6130_p13 }
0x21d1   :  { %6138 = shalt.err (!%p6135_p1)
}
0x21d2   :  { %4536 = dma.vmem_to_hbm [thread:$0]  %s4534_s16, 32, %s7539_s4, [#allocation4]  }
0x21d3   :  { %6141 = dma.done.wait [#allocation4], 32  }
0x21d4   :  { %6142 = vsyncadd [#allocation4], 4294967264 }
0x21d5   :  { %4540 = vsyncpa [#allocation3], 1 }
0x21d6   :  { %4541 = vsyncpa [#allocation4], 1 }

</bundles_post_ra>
